<compile_context>
chip_gen: v7x
topology: tpu7x:2x2x1
jax: 0.10.0
libtpu: 0.0.40
codegen_flags: <defaults>
</compile_context>

<pallas_src>
import functools

import jax
import jax.numpy as jnp
from jax.experimental import pallas as pl
from jax.experimental.pallas import tpu as pltpu


def sparse_attention3d_kernel(qc_ref, kf_ref, mb_ref, wbig_ref, wsmall_ref, out_ref, *,
                              C, K, H, ff_pad, out_lanes,
                              r_wb, r_wqe, r_wqp, r_bqp, r_bqe, r_ba):
  f32 = jnp.float32
  d = C // H
  KC = K * C
  HK = H * K
  TAIL = ff_pad + out_lanes

  # ---- packed weights: static, tile-friendly slices of two slabs ----
  wkv  = wbig_ref[:, :2 * KC]                          # (KC, 2KC) bf16 block-diag [Wk | Wv]
  wa   = wbig_ref[:, 2 * KC:2 * KC + TAIL]             # (KC, 256) bf16 K-tiled [wo@w1 | wo@wout']
  wb   = wsmall_ref[r_wb:r_wb + ff_pad, :out_lanes]    # (128, 128) f32  w2@wout'
  wq_e = wsmall_ref[r_wqe:r_wqe + C, :]                # (C, KC)   f32  (wq/sqrt(d)) tiled over K
  wqp  = wsmall_ref[r_wqp:r_wqp + 8, :C]               # (8, C)    f32  q_pos_proj (3->C, padded)
  bqp  = wsmall_ref[r_bqp:r_bqp + 1, :C]               # (1, C)
  bq_e = wsmall_ref[r_bqe:r_bqe + 1, :]                # (1, KC)
  b_a  = wsmall_ref[r_ba:r_ba + 1, :TAIL]              # (1, 256)

  # ---- structural 0/1 segment matrices, generated in-register (no DMA'd constants) ----
  def iota(shape, dim):
    return jax.lax.broadcasted_iota(jnp.int32, shape, dim).astype(f32)

  def fdiv(x, c):  # exact floor-divide for the small non-negative integers held here
    return jnp.floor(x / float(c))

  r = iota((KC, HK), 0)
  j = iota((KC, HK), 1)
  k_row = fdiv(r, C)
  h_row = fdiv(r - k_row * C, d)
  h_col = fdiv(j, K)
  k_col = j - h_col * K
  seg = jnp.logical_and(k_row == k_col, h_row == h_col).astype(f32)      # (KC, HK)

  i2 = iota((HK, KC), 0)
  c2 = iota((HK, KC), 1)
  h_i = fdiv(i2, K)
  k_i = i2 - h_i * K
  k_c = fdiv(c2, C)
  h_c = fdiv(c2 - k_c * C, d)
  segT = jnp.logical_and(k_i == k_c, h_i == h_c).astype(f32)             # (HK, KC)

  g0 = iota((HK, HK), 0)
  g1 = iota((HK, HK), 1)
  grp = (fdiv(g0, K) == fdiv(g1, K)).astype(f32)                         # (HK, HK)

  # ---- query path: q_pos_proj (Linear 3->C + ReLU) then scaled q in-projection, pre-tiled
  #      across the K key slots so no in-kernel broadcast / relayout is needed ----
  qf = jnp.maximum(jnp.dot(qc_ref[...], wqp, preferred_element_type=f32) + bqp, 0.0)
  q_exp = jnp.dot(qf, wq_e, preferred_element_type=f32) + bq_e           # (TQ, KC)

  # ---- K/V in-projection: one bf16 block-diagonal matmul, output stays (TQ, lanes)-dense ----
  kv = jnp.dot(kf_ref[...], wkv, preferred_element_type=f32)             # (TQ, 2KC) f32
  k_flat = kv[:, :KC]
  v_flat = kv[:, KC:]

  # ---- attention scores in the lane-dense (TQ, H*K) layout ----
  prod = q_exp * k_flat                                                  # (TQ, KC)
  s = jnp.dot(prod, seg, preferred_element_type=f32) + mb_ref[...]       # + additive pad bias

  # softmax over keys within each head group; subtracting the global row max is exact
  # (a shared constant per group) and keeps every exp() <= 1.
  s = s - jnp.max(s, axis=-1, keepdims=True)
  p = jnp.exp(s)
  denom = jnp.dot(p, grp, preferred_element_type=f32)        # per-group sums, broadcast back
  p = p * pl.reciprocal(jnp.maximum(denom, 1e-30), approx=True)

  # ---- weighted value sum fused with the whole post-attention tail ----
  p_exp = jnp.dot(p, segT, preferred_element_type=f32)                   # (TQ, KC)
  pv = (p_exp * v_flat).astype(jnp.bfloat16)
  t = jnp.dot(pv, wa, preferred_element_type=f32) + b_a                  # (TQ, 256)
  hidden = jnp.maximum(t[:, :ff_pad], 0.0)                               # FFN hidden (padded)
  y = t[:, ff_pad:] + jnp.dot(hidden, wb, preferred_element_type=f32)
  out_ref[...] = jnp.maximum(y, 0.0)                                     # lane-dense 128 store


def fold_params(p, *, num_heads, num_keys, eps=1e-5, out_lanes=128, ff_pad=128):
  """Fold eval BatchNorms + the whole post-attention linear chain; pack weights into 2 slabs."""
  f32 = jnp.float32
  C, F = p['w1'].shape
  Co = p['wout'].shape[1]
  H, K = num_heads, num_keys
  d = C // H
  KC = K * C
  scale = 1.0 / (float(d) ** 0.5)
  assert Co <= out_lanes and F <= ff_pad and KC >= ff_pad + out_lanes and C % 8 == 0

  # eval-mode BatchNorm folds: BN1 -> output Linear -> BN2 -> ReLU  ==  ReLU(x@wout_p + bout_p)
  s1 = p['g1'] * jax.lax.rsqrt(p['rv1'] + eps)
  t1 = p['be1'] - p['rm1'] * s1
  s2 = p['g2'] * jax.lax.rsqrt(p['rv2'] + eps)
  t2 = p['be2'] - p['rm2'] * s2
  wout_f = (p['wout'] * s1[:, None]) * s2[None, :]
  bout_f = (t1 @ p['wout'] + p['bout']) * s2 + t2
  wout_p = jnp.zeros((C, out_lanes), f32).at[:, :Co].set(wout_f)
  bout_p = jnp.zeros((out_lanes,), f32).at[:Co].set(bout_f)

  # FFN padded to 128 hidden lanes so in-kernel slices stay lane-tile aligned
  w1p = jnp.zeros((C, ff_pad), f32).at[:, :F].set(p['w1'])
  b1p = jnp.zeros((ff_pad,), f32).at[:F].set(p['b1'])
  w2p = jnp.zeros((ff_pad, C), f32).at[:F, :].set(p['w2'])

  # value bias folds exactly through softmax (probs sum to 1); key bias is softmax-invariant.
  bo_eff = p['bv'] @ p['wo'] + p['bo']

  # fused tail: t = o @ wa + b_a ; hidden = ReLU(t[:, :128]) ; out = ReLU(t[:, 128:] + hidden@wb)
  wa = jnp.concatenate([p['wo'] @ w1p, p['wo'] @ wout_p], axis=1)                 # (C, 256)
  b_a = jnp.concatenate([bo_eff @ w1p + b1p,
                         bo_eff @ wout_p + p['b2'] @ wout_p + bout_p], axis=0)    # (256,)
  wb = w2p @ wout_p                                                               # (ff_pad, 128)

  # big bf16 slab (rows = K*C): block-diagonal K/V in-projection + K-tiled tail weight
  eye_k = jnp.eye(K, dtype=f32)
  w_big = jnp.concatenate(
      [jnp.kron(eye_k, p['wk']), jnp.kron(eye_k, p['wv']), jnp.tile(wa, (K, 1))],
      axis=1).astype(jnp.bfloat16)                                     # (KC, 2*KC + 256)

  # small f32 slab: everything else, packed once (one DMA, one VMEM buffer pair)
  def ceil8(x):
    return -(-x // 8) * 8
  r_wb, r_wqe = 0, ff_pad
  r_wqp = r_wqe + C
  r_bqp = r_wqp + 8
  r_bqe = ceil8(r_bqp + 1)
  r_ba = ceil8(r_bqe + 1)
  n_rows = ceil8(r_ba + 1)

  wq_exp = jnp.tile(p['wq'] * scale, (1, K))                           # (C, KC)
  bq_exp = jnp.tile(p['bq'] * scale, K)                                # (KC,)
  wqp8 = jnp.zeros((8, C), f32).at[:3, :].set(p['wqp'])

  w_small = jnp.zeros((n_rows, KC), f32)
  w_small = w_small.at[r_wb:r_wb + ff_pad, :out_lanes].set(wb)
  w_small = w_small.at[r_wqe:r_wqe + C, :].set(wq_exp)
  w_small = w_small.at[r_wqp:r_wqp + 8, :C].set(wqp8)
  w_small = w_small.at[r_bqp, :C].set(p['bqp'])
  w_small = w_small.at[r_bqe, :].set(bq_exp)
  w_small = w_small.at[r_ba, :ff_pad + out_lanes].set(b_a)

  meta = dict(ff_pad=ff_pad, out_lanes=out_lanes, r_wb=r_wb, r_wqe=r_wqe,
              r_wqp=r_wqp, r_bqp=r_bqp, r_bqe=r_bqe, r_ba=r_ba)
  return w_big, w_small, meta


def sparse_attention3d_forward(query_coords, voxel_features, voxel_coords,
                               key_indices, key_mask, raw_params, *,
                               num_heads, block_q=64):
  """SparseAttention3d forward (eval mode).

  query_coords (Nq,3), voxel_features (Nv,C), voxel_coords (Nv,3),
  key_indices (Nq,K) int32 (-1 == padded), key_mask (Nq,K) {0,1} (1.0 == padded).
  """
  f32 = jnp.float32
  Nv, C = voxel_features.shape
  Nq, K = key_indices.shape
  Co = raw_params['wout'].shape[1]
  H = num_heads
  assert C % H == 0
  assert Nq % block_q == 0 and block_q % 16 == 0

  # k_pos_proj (Conv1d 3->C k=1 + ReLU) is pointwise in the key coordinate and key_coords are a
  # gather of per-voxel coords, so fold it into the features once per SOURCE voxel (Nv rows, 4x
  # fewer than Nq*K) before grouping -- removes the (Nq*K, 3) coords stream from the kernel.
  # TODO(synk): with use_relative_coords=True the embedding depends on (query, key) pairs and
  # would have to move back inside the kernel.
  kpe = jax.nn.relu(voxel_coords @ raw_params['wkp'] + raw_params['bkp'])
  vf_pe = (voxel_features + kpe).astype(f32)

  safe_idx = jnp.where(key_indices < 0, 0, key_indices)
  key_slab = vf_pe[safe_idx].reshape(Nq, K * C).astype(jnp.bfloat16)   # lane-dense bf16 stream

  # additive key-padding bias pre-expanded to the (Nq, H*K) score layout (column = h*K + k)
  mask_bias = jnp.tile(key_mask.astype(f32) * jnp.float32(-1e30), (1, H))

  qc8 = jnp.zeros((Nq, 8), f32).at[:, :3].set(query_coords.astype(f32))

  w_big, w_small, meta = fold_params(raw_params, num_heads=H, num_keys=K)
  KC, HK = K * C, H * K

  kernel = functools.partial(sparse_attention3d_kernel, C=C, K=K, H=H, **meta)

  out_padded = pl.pallas_call(
      kernel,
      out_shape=jax.ShapeDtypeStruct((Nq, meta['out_lanes']), f32),
      grid=(Nq // block_q,),
      in_specs=[
          pl.BlockSpec((block_q, 8), lambda i: (i, 0)),
          pl.BlockSpec((block_q, KC), lambda i: (i, 0)),
          pl.BlockSpec((block_q, HK), lambda i: (i, 0)),
          pl.BlockSpec(w_big.shape, lambda i: (0, 0)),     # weights: constant block, DMA'd once
          pl.BlockSpec(w_small.shape, lambda i: (0, 0)),
      ],
      out_specs=pl.BlockSpec((block_q, meta['out_lanes']), lambda i: (i, 0)),
      compiler_params=pltpu.CompilerParams(
          dimension_semantics=("parallel",),
          vmem_limit_bytes=32 * 1024 * 1024),   # explicit: v5e default scoped VMEM is 16 MiB
  )(qc8, key_slab, mask_bias, w_big, w_small)
  return out_padded[:, :Co]


# ------------------------- pure-JAX reference (for validation) -------------------------

def reference_forward(qc, kc, kf, mask, p, *, num_heads):
  Nq, K, C = kf.shape
  H = num_heads
  d = C // H
  qf = jax.nn.relu(qc @ p['wqp'] + p['bqp'])
  kpe = jax.nn.relu(kc @ p['wkp'] + p['bkp'])
  kf2 = kf + kpe
  q = (qf @ p['wq'] + p['bq']).reshape(Nq, H, d)
  k = (kf2 @ p['wk'] + p['bk']).reshape(Nq, K, H, d)
  v = (kf2 @ p['wv'] + p['bv']).reshape(Nq, K, H, d)
  s = jnp.einsum('qhd,qkhd->qhk', q, k) / jnp.sqrt(jnp.float32(d))
  s = jnp.where(mask[:, None, :] > 0.5, -jnp.inf, s)
  a = jax.nn.softmax(s, axis=-1)
  o = jnp.einsum('qhk,qkhd->qhd', a, v).reshape(Nq, C)
  attend = o @ p['wo'] + p['bo']
  ff = jax.nn.relu(attend @ p['w1'] + p['b1']) @ p['w2'] + p['b2']
  x = attend + ff
  eps = 1e-5
  x = (x - p['rm1']) * jax.lax.rsqrt(p['rv1'] + eps) * p['g1'] + p['be1']
  y = x @ p['wout'] + p['bout']
  y = (y - p['rm2']) * jax.lax.rsqrt(p['rv2'] + eps) * p['g2'] + p['be2']
  return jax.nn.relu(y)


# ------------------------- JAX glue (no hot-path compute) -------------------------

def with_coords(indices, point_cloud_range, voxel_size):
  vs = jnp.asarray(voxel_size, jnp.float32)[None, :]
  mn = jnp.asarray(point_cloud_range[:3], jnp.float32)[None, :]
  return (indices[:, jnp.array([3, 2, 1])].astype(jnp.float32) + 0.5) * vs + mn


def grouping(feats, key_indices):
  # votr_utils.grouping_operation equivalent (dense gather). Masked (-1) entries gather row 0;
  # they are excluded from attention via key_mask anyway.
  safe = jnp.where(key_indices < 0, 0, key_indices)
  return feats[safe]          # (Nq, K, feat_dim)   -- channel-last


def init_params(key, C, F, Co):
  ks = jax.random.split(key, 9)

  def w(k, shape, scale=0.1):
    return jax.random.normal(k, shape, jnp.float32) * scale

  p = {}
  p['wqp'], p['bqp'] = w(ks[0], (3, C)), jnp.zeros((C,), jnp.float32)
  p['wkp'], p['bkp'] = w(ks[1], (3, C)), jnp.zeros((C,), jnp.float32)
  p['wq'], p['bq'] = w(ks[2], (C, C)), jnp.zeros((C,), jnp.float32)
  p['wk'], p['bk'] = w(ks[3], (C, C)), jnp.zeros((C,), jnp.float32)
  p['wv'], p['bv'] = w(ks[4], (C, C)), jnp.zeros((C,), jnp.float32)
  p['wo'], p['bo'] = w(ks[5], (C, C)), jnp.zeros((C,), jnp.float32)
  p['w1'], p['b1'] = w(ks[6], (C, F)), jnp.zeros((F,), jnp.float32)
  p['w2'], p['b2'] = w(ks[7], (F, C)), jnp.zeros((C,), jnp.float32)
  p['g1'], p['be1'] = jnp.ones((C,), jnp.float32), jnp.zeros((C,), jnp.float32)
  p['rm1'], p['rv1'] = jnp.zeros((C,), jnp.float32), jnp.ones((C,), jnp.float32)
  p['wout'], p['bout'] = w(ks[8], (C, Co)), jnp.zeros((Co,), jnp.float32)
  p['g2'], p['be2'] = jnp.ones((Co,), jnp.float32), jnp.zeros((Co,), jnp.float32)
  p['rm2'], p['rv2'] = jnp.zeros((Co,), jnp.float32), jnp.ones((Co,), jnp.float32)
  return p


if __name__ == "__main__":
  # module hyper-params: input_channels=32, output_channels=32, ff_channels=64, num_heads=4,
  # strides=(2,2,2); K = total attended keys per downsampled voxel.
  C, F, Co, H = 32, 64, 32, 4
  K = 16
  Nv, Nq = 2048, 512          # source voxels / downsampled query voxels
  B = 2
  # block_q=64 -> grid=8: >= 4 pipelined steps per TensorCore on dual-TC v7x. On single-TC
  # v5e/v6e raise to 128-512 (when Nq allows) to amortize the ~0.35us per-grid-step overhead.
  block_q = 64
  strides = (2, 2, 2)
  voxel_size = (0.1, 0.1, 0.2)
  pc_range = (0.0, -4.0, -2.0, 8.0, 4.0, 2.0)
  spatial_shape = (64, 64, 16)   # x, y, z

  root = jax.random.PRNGKey(0)
  kf_, kb_, kx_, ky_, kz_, kidx_, kmask_, kpar_ = jax.random.split(root, 8)

  voxel_features = jax.random.normal(kf_, (Nv, C), jnp.float32)
  # sparse indices: (batch, z, y, x)
  indices = jnp.stack([
      jax.random.randint(kb_, (Nv,), 0, B),
      jax.random.randint(kz_, (Nv,), 0, spatial_shape[2]),
      jax.random.randint(ky_, (Nv,), 0, spatial_shape[1]),
      jax.random.randint(kx_, (Nv,), 0, spatial_shape[0]),
  ], axis=1).astype(jnp.int32)

  # TODO(synk): votr_utils.hash_table_down_sample and the hash-based local/strided attention
  # index builders are GPU hash-table kernels with no Pallas equivalent; deterministic
  # synthetic downsample/gather indices with identical shapes and masking semantics are used.
  ds = jnp.asarray([1, strides[2], strides[1], strides[0]], jnp.int32)
  new_indices = indices[:Nq] // ds

  key_indices = jax.random.randint(kidx_, (Nq, K), 0, Nv)
  drop = jax.random.bernoulli(kmask_, 0.25, (Nq, K))
  drop = drop.at[:, 0].set(False)                 # guarantee >= 1 valid key per query
  key_indices = jnp.where(drop, -1, key_indices)
  key_mask = drop.astype(jnp.float32)             # 1.0 == padding (ignored key)

  new_voxel_size = tuple(v * s for v, s in zip(voxel_size, strides))
  voxel_coords = with_coords(indices, pc_range, voxel_size)            # (Nv, 3)
  query_coords = with_coords(new_indices, pc_range, new_voxel_size)    # (Nq, 3)

  params = init_params(kpar_, C, F, Co)

  out = sparse_attention3d_forward(query_coords, voxel_features, voxel_coords,
                                   key_indices, key_mask, params,
                                   num_heads=H, block_q=block_q)
  out = jax.block_until_ready(out)

  # reference path groups features/coords first and applies k_pos_proj on the grouped coords
  # (the original op order), validating the per-voxel pos-emb precompute fold.
  key_feats = grouping(voxel_features, key_indices)    # (Nq, K, C) channel-last
  key_coords = grouping(voxel_coords, key_indices)     # (Nq, K, 3) channel-last
  ref = reference_forward(query_coords, key_coords, key_feats, key_mask,
                          params, num_heads=H)
  ref = jax.block_until_ready(ref)

  assert out.shape == (Nq, Co)
  assert bool(jnp.all(jnp.isfinite(out)))
  assert bool(jnp.all(out >= 0.0))                     # final ReLU
  # loose tolerance: bf16 key-feature/weight slabs + approx reciprocal + BN/tail folding
  err = float(jnp.max(jnp.abs(out - ref)))
  assert bool(jnp.allclose(out, ref, rtol=5e-2, atol=2e-2)), err
  print("KERNEL_OK")
</pallas_src>

<mosaic_0001>
module attributes {stable_mosaic.version = 11 : i64} {
  func.func @sparse_attention3d_kernel(%arg0: i32, %arg1: memref<64x8xf32, #tpu.memory_space<vmem>>, %arg2: memref<64x512xbf16, #tpu.memory_space<vmem>>, %arg3: memref<64x64xf32, #tpu.memory_space<vmem>>, %arg4: memref<512x1280xbf16, #tpu.memory_space<vmem>>, %arg5: memref<192x512xf32, #tpu.memory_space<vmem>>, %arg6: memref<64x128xf32, #tpu.memory_space<vmem>>) attributes {dimension_semantics = [#tpu.dimension_semantics<parallel>], iteration_bounds = array<i64: 8>, scalar_prefetch = 0 : i64, scratch_operands = 0 : i64, tpu.core_type = #tpu.core_type<tc>, window_params = [{transform_indices = @transform_0, window_bounds = array<i64: 64, 8>}, {transform_indices = @transform_1, window_bounds = array<i64: 64, 512>}, {transform_indices = @transform_2, window_bounds = array<i64: 64, 64>}, {pipeline_mode = #tpu.pipeline_mode<synchronous>, transform_indices = @transform_3, window_bounds = array<i64: 512, 1280>}, {pipeline_mode = #tpu.pipeline_mode<synchronous>, transform_indices = @transform_4, window_bounds = array<i64: 192, 512>}, {transform_indices = @transform_5, window_bounds = array<i64: 64, 128>}]} {
    %c0 = arith.constant 0 : index
    %c0_0 = arith.constant 0 : index
    %0 = vector.load %arg4[%c0, %c0_0] : memref<512x1280xbf16, #tpu.memory_space<vmem>>, vector<512x1024xbf16>
    %c0_1 = arith.constant 0 : index
    %c1024 = arith.constant 1024 : index
    %1 = vector.load %arg4[%c0_1, %c1024] : memref<512x1280xbf16, #tpu.memory_space<vmem>>, vector<512x256xbf16>
    %c0_2 = arith.constant 0 : index
    %c0_3 = arith.constant 0 : index
    %2 = vector.load %arg5[%c0_2, %c0_3] : memref<192x512xf32, #tpu.memory_space<vmem>>, vector<128x128xf32>
    %c128 = arith.constant 128 : index
    %c0_4 = arith.constant 0 : index
    %3 = vector.load %arg5[%c128, %c0_4] : memref<192x512xf32, #tpu.memory_space<vmem>>, vector<32x512xf32>
    %c160 = arith.constant 160 : index
    %c0_5 = arith.constant 0 : index
    %4 = vector.load %arg5[%c160, %c0_5] : memref<192x512xf32, #tpu.memory_space<vmem>>, vector<8x32xf32>
    %c168 = arith.constant 168 : index
    %c0_6 = arith.constant 0 : index
    %5 = vector.load %arg5[%c168, %c0_6] : memref<192x512xf32, #tpu.memory_space<vmem>>, vector<1x32xf32>
    %c176 = arith.constant 176 : index
    %c0_7 = arith.constant 0 : index
    %6 = vector.load %arg5[%c176, %c0_7] : memref<192x512xf32, #tpu.memory_space<vmem>>, vector<1x512xf32>
    %c184 = arith.constant 184 : index
    %c0_8 = arith.constant 0 : index
    %7 = vector.load %arg5[%c184, %c0_8] : memref<192x512xf32, #tpu.memory_space<vmem>>, vector<1x256xf32>
    %8 = tpu.iota {dimensions = array<i32: 0>} : vector<512x64xi32>
    %9 = arith.sitofp %8 : vector<512x64xi32> to vector<512x64xf32>
    %10 = tpu.iota {dimensions = array<i32: 1>} : vector<512x64xi32>
    %11 = arith.sitofp %10 : vector<512x64xi32> to vector<512x64xf32>
    %cst = arith.constant 3.200000e+01 : f32
    %12 = vector.broadcast %cst : f32 to vector<512x64xf32>
    %13 = arith.divf %9, %12 : vector<512x64xf32>
    %14 = math.floor %13 : vector<512x64xf32>
    %cst_9 = arith.constant 3.200000e+01 : f32
    %15 = vector.broadcast %cst_9 : f32 to vector<512x64xf32>
    %16 = arith.mulf %14, %15 : vector<512x64xf32>
    %17 = arith.subf %9, %16 : vector<512x64xf32>
    %cst_10 = arith.constant 8.000000e+00 : f32
    %18 = vector.broadcast %cst_10 : f32 to vector<512x64xf32>
    %19 = arith.divf %17, %18 : vector<512x64xf32>
    %20 = math.floor %19 : vector<512x64xf32>
    %cst_11 = arith.constant 1.600000e+01 : f32
    %21 = vector.broadcast %cst_11 : f32 to vector<512x64xf32>
    %22 = arith.divf %11, %21 : vector<512x64xf32>
    %23 = math.floor %22 : vector<512x64xf32>
    %cst_12 = arith.constant 1.600000e+01 : f32
    %24 = vector.broadcast %cst_12 : f32 to vector<512x64xf32>
    %25 = arith.mulf %23, %24 : vector<512x64xf32>
    %26 = arith.subf %11, %25 : vector<512x64xf32>
    %27 = arith.cmpf oeq, %14, %26 : vector<512x64xf32>
    %28 = arith.cmpf oeq, %20, %23 : vector<512x64xf32>
    %29 = arith.andi %27, %28 : vector<512x64xi1>
    %30 = arith.extui %29 : vector<512x64xi1> to vector<512x64xi32>
    %31 = arith.sitofp %30 : vector<512x64xi32> to vector<512x64xf32>
    %32 = tpu.iota {dimensions = array<i32: 0>} : vector<64x512xi32>
    %33 = arith.sitofp %32 : vector<64x512xi32> to vector<64x512xf32>
    %34 = tpu.iota {dimensions = array<i32: 1>} : vector<64x512xi32>
    %35 = arith.sitofp %34 : vector<64x512xi32> to vector<64x512xf32>
    %cst_13 = arith.constant 1.600000e+01 : f32
    %36 = vector.broadcast %cst_13 : f32 to vector<64x512xf32>
    %37 = arith.divf %33, %36 : vector<64x512xf32>
    %38 = math.floor %37 : vector<64x512xf32>
    %cst_14 = arith.constant 1.600000e+01 : f32
    %39 = vector.broadcast %cst_14 : f32 to vector<64x512xf32>
    %40 = arith.mulf %38, %39 : vector<64x512xf32>
    %41 = arith.subf %33, %40 : vector<64x512xf32>
    %cst_15 = arith.constant 3.200000e+01 : f32
    %42 = vector.broadcast %cst_15 : f32 to vector<64x512xf32>
    %43 = arith.divf %35, %42 : vector<64x512xf32>
    %44 = math.floor %43 : vector<64x512xf32>
    %cst_16 = arith.constant 3.200000e+01 : f32
    %45 = vector.broadcast %cst_16 : f32 to vector<64x512xf32>
    %46 = arith.mulf %44, %45 : vector<64x512xf32>
    %47 = arith.subf %35, %46 : vector<64x512xf32>
    %cst_17 = arith.constant 8.000000e+00 : f32
    %48 = vector.broadcast %cst_17 : f32 to vector<64x512xf32>
    %49 = arith.divf %47, %48 : vector<64x512xf32>
    %50 = math.floor %49 : vector<64x512xf32>
    %51 = arith.cmpf oeq, %41, %44 : vector<64x512xf32>
    %52 = arith.cmpf oeq, %38, %50 : vector<64x512xf32>
    %53 = arith.andi %51, %52 : vector<64x512xi1>
    %54 = arith.extui %53 : vector<64x512xi1> to vector<64x512xi32>
    %55 = arith.sitofp %54 : vector<64x512xi32> to vector<64x512xf32>
    %56 = tpu.iota {dimensions = array<i32: 0>} : vector<64x64xi32>
    %57 = arith.sitofp %56 : vector<64x64xi32> to vector<64x64xf32>
    %58 = tpu.iota {dimensions = array<i32: 1>} : vector<64x64xi32>
    %59 = arith.sitofp %58 : vector<64x64xi32> to vector<64x64xf32>
    %cst_18 = arith.constant 1.600000e+01 : f32
    %60 = vector.broadcast %cst_18 : f32 to vector<64x64xf32>
    %61 = arith.divf %57, %60 : vector<64x64xf32>
    %62 = math.floor %61 : vector<64x64xf32>
    %cst_19 = arith.constant 1.600000e+01 : f32
    %63 = vector.broadcast %cst_19 : f32 to vector<64x64xf32>
    %64 = arith.divf %59, %63 : vector<64x64xf32>
    %65 = math.floor %64 : vector<64x64xf32>
    %66 = arith.cmpf oeq, %62, %65 : vector<64x64xf32>
    %67 = arith.extui %66 : vector<64x64xi1> to vector<64x64xi32>
    %68 = arith.sitofp %67 : vector<64x64xi32> to vector<64x64xf32>
    %c0_20 = arith.constant 0 : index
    %c0_21 = arith.constant 0 : index
    %69 = vector.load %arg1[%c0_20, %c0_21] : memref<64x8xf32, #tpu.memory_space<vmem>>, vector<64x8xf32>
    %cst_22 = arith.constant dense<0.000000e+00> : vector<64x32xf32>
    %70 = tpu.matmul %69, %4, %cst_22 {dimension_numbers = #tpu.dot_dimension_numbers<[1], [0], [0], [1], [0, 0, 1, 1], [], []>} : vector<64x8xf32>, vector<8x32xf32>, vector<64x32xf32> -> vector<64x32xf32>
    %71 = vector.broadcast %5 : vector<1x32xf32> to vector<64x32xf32>
    %72 = arith.addf %70, %71 : vector<64x32xf32>
    %cst_23 = arith.constant 0.000000e+00 : f32
    %73 = vector.broadcast %cst_23 : f32 to vector<64x32xf32>
    %74 = arith.maximumf %72, %73 : vector<64x32xf32>
    %cst_24 = arith.constant dense<0.000000e+00> : vector<64x512xf32>
    %75 = tpu.matmul %74, %3, %cst_24 {dimension_numbers = #tpu.dot_dimension_numbers<[1], [0], [0], [1], [0, 0, 1, 1], [], []>} : vector<64x32xf32>, vector<32x512xf32>, vector<64x512xf32> -> vector<64x512xf32>
    %76 = vector.broadcast %6 : vector<1x512xf32> to vector<64x512xf32>
    %77 = arith.addf %75, %76 : vector<64x512xf32>
    %c0_25 = arith.constant 0 : index
    %c0_26 = arith.constant 0 : index
    %78 = vector.load %arg2[%c0_25, %c0_26] : memref<64x512xbf16, #tpu.memory_space<vmem>>, vector<64x512xbf16>
    %cst_27 = arith.constant dense<0.000000e+00> : vector<64x1024xf32>
    %79 = tpu.matmul %78, %0, %cst_27 {dimension_numbers = #tpu.dot_dimension_numbers<[1], [0], [0], [1], [0, 0, 1, 1], [], []>} : vector<64x512xbf16>, vector<512x1024xbf16>, vector<64x1024xf32> -> vector<64x1024xf32>
    %80 = vector.extract_strided_slice %79 {offsets = [0, 0], sizes = [64, 512], strides = [1, 1]} : vector<64x1024xf32> to vector<64x512xf32>
    %81 = vector.extract_strided_slice %79 {offsets = [0, 512], sizes = [64, 512], strides = [1, 1]} : vector<64x1024xf32> to vector<64x512xf32>
    %82 = arith.mulf %77, %80 : vector<64x512xf32>
    %cst_28 = arith.constant dense<0.000000e+00> : vector<64x64xf32>
    %83 = tpu.matmul %82, %31, %cst_28 {dimension_numbers = #tpu.dot_dimension_numbers<[1], [0], [0], [1], [0, 0, 1, 1], [], []>} : vector<64x512xf32>, vector<512x64xf32>, vector<64x64xf32> -> vector<64x64xf32>
    %c0_29 = arith.constant 0 : index
    %c0_30 = arith.constant 0 : index
    %84 = vector.load %arg3[%c0_29, %c0_30] : memref<64x64xf32, #tpu.memory_space<vmem>>, vector<64x64xf32>
    %85 = arith.addf %83, %84 : vector<64x64xf32>
    %cst_31 = arith.constant dense<0xFF800000> : vector<64xf32>
    %86 = vector.multi_reduction <maximumf>, %85, %cst_31 [1] : vector<64x64xf32> to vector<64xf32>
    %87 = vector.shape_cast %86 : vector<64xf32> to vector<64x1xf32>
    %88 = vector.broadcast %87 : vector<64x1xf32> to vector<64x64xf32>
    %89 = arith.subf %85, %88 : vector<64x64xf32>
    %90 = math.exp %89 : vector<64x64xf32>
    %cst_32 = arith.constant dense<0.000000e+00> : vector<64x64xf32>
    %91 = tpu.matmul %90, %68, %cst_32 {dimension_numbers = #tpu.dot_dimension_numbers<[1], [0], [0], [1], [0, 0, 1, 1], [], []>} : vector<64x64xf32>, vector<64x64xf32>, vector<64x64xf32> -> vector<64x64xf32>
    %cst_33 = arith.constant 1.000000e-30 : f32
    %92 = vector.broadcast %cst_33 : f32 to vector<64x64xf32>
    %93 = arith.maximumf %91, %92 : vector<64x64xf32>
    %94 = tpu.reciprocal %93 {approx = true} : vector<64x64xf32> -> vector<64x64xf32>
    %95 = arith.mulf %90, %94 : vector<64x64xf32>
    %cst_34 = arith.constant dense<0.000000e+00> : vector<64x512xf32>
    %96 = tpu.matmul %95, %55, %cst_34 {dimension_numbers = #tpu.dot_dimension_numbers<[1], [0], [0], [1], [0, 0, 1, 1], [], []>} : vector<64x64xf32>, vector<64x512xf32>, vector<64x512xf32> -> vector<64x512xf32>
    %97 = arith.mulf %96, %81 : vector<64x512xf32>
    %98 = arith.truncf %97 : vector<64x512xf32> to vector<64x512xbf16>
    %cst_35 = arith.constant dense<0.000000e+00> : vector<64x256xf32>
    %99 = tpu.matmul %98, %1, %cst_35 {dimension_numbers = #tpu.dot_dimension_numbers<[1], [0], [0], [1], [0, 0, 1, 1], [], []>} : vector<64x512xbf16>, vector<512x256xbf16>, vector<64x256xf32> -> vector<64x256xf32>
    %100 = vector.broadcast %7 : vector<1x256xf32> to vector<64x256xf32>
    %101 = arith.addf %99, %100 : vector<64x256xf32>
    %102 = vector.extract_strided_slice %101 {offsets = [0, 0], sizes = [64, 128], strides = [1, 1]} : vector<64x256xf32> to vector<64x128xf32>
    %cst_36 = arith.constant 0.000000e+00 : f32
    %103 = vector.broadcast %cst_36 : f32 to vector<64x128xf32>
    %104 = arith.maximumf %102, %103 : vector<64x128xf32>
    %105 = vector.extract_strided_slice %101 {offsets = [0, 128], sizes = [64, 128], strides = [1, 1]} : vector<64x256xf32> to vector<64x128xf32>
    %cst_37 = arith.constant dense<0.000000e+00> : vector<64x128xf32>
    %106 = tpu.matmul %104, %2, %cst_37 {dimension_numbers = #tpu.dot_dimension_numbers<[1], [0], [0], [1], [0, 0, 1, 1], [], []>} : vector<64x128xf32>, vector<128x128xf32>, vector<64x128xf32> -> vector<64x128xf32>
    %107 = arith.addf %105, %106 : vector<64x128xf32>
    %cst_38 = arith.constant 0.000000e+00 : f32
    %108 = vector.broadcast %cst_38 : f32 to vector<64x128xf32>
    %109 = arith.maximumf %107, %108 : vector<64x128xf32>
    %c0_39 = arith.constant 0 : index
    %c0_40 = arith.constant 0 : index
    %110 = vector.load %arg6[%c0_39, %c0_40] : memref<64x128xf32, #tpu.memory_space<vmem>>, vector<64x128xf32>
    tpu.vector_store %arg6[%c0_39, %c0_40], %109 {strides = array<i32>} : memref<64x128xf32, #tpu.memory_space<vmem>>, vector<64x128xf32>,
    return
  }
  func.func @transform_0(%arg0: i32) -> (i32, i32) {
    %c0_i32 = arith.constant 0 : i32
    %c0_i32_0 = arith.constant 0 : i32
    return %arg0, %c0_i32 : i32, i32
  }
  func.func @transform_1(%arg0: i32) -> (i32, i32) {
    %c0_i32 = arith.constant 0 : i32
    %c0_i32_0 = arith.constant 0 : i32
    return %arg0, %c0_i32 : i32, i32
  }
  func.func @transform_2(%arg0: i32) -> (i32, i32) {
    %c0_i32 = arith.constant 0 : i32
    %c0_i32_0 = arith.constant 0 : i32
    return %arg0, %c0_i32 : i32, i32
  }
  func.func @transform_3(%arg0: i32) -> (i32, i32) {
    %c0_i32 = arith.constant 0 : i32
    %c0_i32_0 = arith.constant 0 : i32
    %c0_i32_1 = arith.constant 0 : i32
    return %c0_i32, %c0_i32_0 : i32, i32
  }
  func.func @transform_4(%arg0: i32) -> (i32, i32) {
    %c0_i32 = arith.constant 0 : i32
    %c0_i32_0 = arith.constant 0 : i32
    %c0_i32_1 = arith.constant 0 : i32
    return %c0_i32, %c0_i32_0 : i32, i32
  }
  func.func @transform_5(%arg0: i32) -> (i32, i32) {
    %c0_i32 = arith.constant 0 : i32
    %c0_i32_0 = arith.constant 0 : i32
    return %arg0, %c0_i32 : i32, i32
  }
}

</mosaic_0001>

<bundles_post_ra>
// kernel: tpu_custom_call.1
= control target key start
LH: loop header
LB: loop body
LE: loop exit
PB: predicated region body
PF: predicated region fallthrough
CT: control target
= control target key end

     0   :  { %10 = vsyncpa [#allocation3], 0  ;;  %s10815_s0 = inlined_call_operand.vmem [shape: f32[512,8], index: 0, kind: input, shape index: {}]   ;;  %s10816_s1 = inlined_call_operand.hbm [shape: bf16[512,512], index: 1, kind: input, shape index: {}]   ;;  %s10817_s2 = inlined_call_operand.vmem [shape: f32[512,64], index: 2, kind: input, shape index: {}]   ;;  %s10818_s3 = inlined_call_operand.hbm [shape: bf16[512,1280], index: 3, kind: input, shape index: {}]   ;;  %s10819_s4 = inlined_call_operand.hbm [shape: f32[192,512], index: 4, kind: input, shape index: {}]   ;;  %s10820_s5 = inlined_call_operand.hbm [shape: f32[512,128], index: 5, kind: output, shape index: {}]  }
   0x1   :  { %12 = vsyncpa [#allocation3 + $0x1], 0 }
   0x2   :  { %13 = vsyncpa [#allocation6], 0 }
   0x3   :  { %14 = vsyncpa [#allocation4], 0 }
   0x4   :  { %16 = vsyncpa [#allocation4 + $0x1], 0  ;;  %s7606_s18 = smov 0   ;;  %s7608_s19 = smov 0  }
   0x5   :  { %s7610_s20 = smov 0   ;;  %s7612_s21 = smov 0  }
   0x6 LB: > { %s7627_s22 = sadd.s32 4294967295, %s7560_s21   ;;  %s5638_s23 = sadd.s32 4294967294, %s7560_s21   ;;  %s7560_s21 = sphi %s7612_s21, %s11847_s21   ;;  %s7556_s20 = sphi %s7610_s20, %s11846_s20   ;;  %s7552_s19 = sphi %s7608_s19, %s11845_s19   ;;  %s7548_s18 = sphi %s7606_s18, %s11844_s18  }
   0x7   : > { %p68_p0 = scmp.ne.s32.totalorder %s7552_s19, %s7548_s18  ;;  %p10821_p1 = scmp.eq.s32.totalorder %s7627_s22, 0 }
   0x8   : > { %p166_p3 = scmp.eq.s32.totalorder %s5638_s23, 7  ;;  %p5639_p5 = scmp.ge.s32.totalorder %s7560_s21, 1 }
   0x9   : > { %p7636_p4 = por %p10821_p1, %p68_p0  ;;  %p173_p7 = scmp.lt.s32.totalorder %s7560_s21, 9 }
   0xa   : > { %p7641_p6 = por %p166_p3, %p68_p0  ;;  %s7562_s27 = smov [#allocation5]  }
   0xb   : > { %s10999_s24 = scalar_select %p7636_p4, 1, 0 }
   0xc   : > { %s11000_s25 = scalar_select %p7641_p6, 1, 0 }
   0xd   : > { %p7646_p8 = pnand %p5639_p5, %p173_p7  ;;  %s185_s28 = sshll.u32 %s7562_s27, 4  ;;  %s186_s28 = int_to_ptr.vmem [resolvable:$true] %s185_s28 }
   0xe   : > { %s7563_s30 = smov [#allocation7]   ;;  %s7404_s9 = scalar_lea.hbm %s10818_s3, 40960 }
   0xf   : > { %s11001_s26 = scalar_select %p7646_p8, 1, 0 }
  0x10   : > { %p6787_p9 = pneg %p7646_p8  ;;  %s198_s6 = sshll.u32 %s7563_s30, 4  ;;  %s7658_s6 = int_to_ptr.vmem [resolvable:$true] %s198_s6 }
  0x11   : > { %p7405_p11 = scmp.ne.s32.totalorder %s10818_s3, %s7404_s9  ;;  %p7411_p3 = scmp.lt.u32.totalorder %s7404_s9, %s10818_s3 }
  0x12   : > { %p7654_p10 = pnand %p6787_p9, %p10821_p1 }
  0x14   : > { %p7406_p12 = pneg %p7654_p10 }
  0x16   : > { %p7407_p13 = pnand %p7406_p12, %p7405_p11 }
  0x18   : > { %p7408_p0 = pneg %p7407_p13 }
  0x1a   : > { %p7413_p5 = pnand %p7411_p3, %p7408_p0 }
  0x1c   : > { %7416 = shalt.err (!%p7413_p5)
}
  0x1d   : > { %s7417_s14 = scalar_lea.vmem %s186_s28, 40960  ;;  %p7425_p2 = scmp.lt.s32.totalorder %s186_s28, %s186_s28 }
  0x1e   : > { %p7418_p7 = scmp.ne.s32.totalorder %s186_s28, %s7417_s14  ;;  %p7426_p6 = scmp.lt.s32.totalorder %s7417_s14, %s7417_s14 }
  0x20   : > { %p7420_p9 = pnand %p7418_p7, %p7406_p12  ;;  %p7427_p4 = por %p7426_p6, %p7425_p2 }
  0x22   : > { %p7421_p1 = pneg %p7420_p9 }
  0x24   : > { %p7428_p8 = pnand %p7427_p4, %p7421_p1 }
  0x26   : > { %7431 = shalt.err (!%p7428_p8)
}
  0x27   : > { %s7564_s15 = smov 640   ;;  %s7565_s16 = smov 40  }
  0x28   : > { %6790 = dma.hbm_to_vmem [thread:$0]  (!%p7654_p10), %s10818_s3, 40960, %s186_s28, [#allocation6], %s7564_s15, %s7564_s15, %s7565_s16  }
  0x29   : > { %s7432_s7 = scalar_lea.hbm %s10819_s4, 12288 }
  0x2a   : > { %p7433_p11 = scmp.ne.s32.totalorder %s10819_s4, %s7432_s7  ;;  %p7439_p4 = scmp.lt.u32.totalorder %s7432_s7, %s10819_s4 }
  0x2c   : > { %p7435_p1 = pnand %p7433_p11, %p7406_p12 }
  0x2e   : > { %p7436_p2 = pneg %p7435_p1 }
  0x30   : > { %p7441_p6 = pnand %p7439_p4, %p7436_p2 }
  0x32   : > { %7444 = shalt.err (!%p7441_p6)
}
  0x33   : > { %s7445_s28 = scalar_lea.vmem %s7658_s6, 12288  ;;  %p7453_p3 = scmp.lt.s32.totalorder %s7658_s6, %s7658_s6 }
  0x34   : > { %p7446_p8 = scmp.ne.s32.totalorder %s7658_s6, %s7445_s28  ;;  %p7454_p5 = scmp.lt.s32.totalorder %s7445_s28, %s7445_s28 }
  0x36   : > { %p7448_p13 = pnand %p7446_p8, %p7406_p12  ;;  %p7455_p7 = por %p7454_p5, %p7453_p3 }
  0x38   : > { %p7449_p0 = pneg %p7448_p13 }
  0x3a   : > { %p7456_p9 = pnand %p7455_p7, %p7449_p0 }
  0x3c   : > { %7459 = shalt.err (!%p7456_p9)
}
  0x3d   : > { %s7566_s12 = smov 512   ;;  %s7567_s13 = smov 32  }
  0x3e   : > { %6793 = dma.hbm_to_vmem [thread:$0]  (!%p7654_p10), %s10819_s4, 12288, %s7658_s6, [#allocation6], %s7566_s12, %s7566_s12, %s7567_s13  }
  0x3f   : > { %s7708_s16 = sadd.s32 1, %s7560_s21   ;;  %s55_s23 = sadd.s32 1, %s7556_s20 }
  0x40   : > { %s52_s17 = ssub.s32 %s7560_s21, %s7708_s16  ;;  %p62_p11 = scmp.ne.s32.totalorder %s7556_s20, %s7552_s19 }
  0x41   : > { %p53_p12 = scmp.eq.s32.totalorder %s52_s17, 0  ;;  %p63_p1 = scmp.eq.s32.totalorder %s7560_s21, 0 }
  0x42   : > { %p11003_p4 = scmp.eq.s32.totalorder %s7627_s22, 7  ;;  %p6804_p8 = scmp.lt.s32.totalorder %s7560_s21, 8 }
  0x43   : > { %s7717_s27 = scalar_select %p53_p12, %s7556_s20, %s55_s23  }
  0x44   : > { %p64_p2 = por %p63_p1, %p62_p11  ;;  %p7721_p6 = por %p11003_p4, %p62_p11 }
  0x45   : > { %s221_s29 = sand.u32 1, %s7556_s20   ;;  %s6254_s6 = sshll.u32 %s7560_s21, 11 }
  0x46   : > { %s5643_s7 = sshll.u32 %s221_s29, 7  ;;  %s7731_s10 = scalar_lea.hbm %s10816_s1, %s6254_s6 }
  0x47   : > { %s225_s11 = scalar_lea.vmem [#allocation2], %s5643_s7  ;;  %p7735_p10 = pnand %p6804_p8, %p64_p2 }
  0x48   : > { %s233_s28 = sshll.u32 %s225_s11, 4  ;;  %s7739_s13 = scalar_lea.sflag [#allocation3], %s221_s29  ;;  %s7733_s28 = int_to_ptr.vmem [resolvable:$true] %s233_s28 }
  0x49   : > { %s7460_s14 = scalar_lea.hbm %s7731_s10, 2048  ;;  %p7462_p0 = pneg %p7735_p10 }
  0x4a   : > { %p7461_p13 = scmp.ne.s32.totalorder %s7731_s10, %s7460_s14  ;;  %s7465_s23 = scalar_lea.hbm %s10816_s1, 16384 }
  0x4b   : > { %p7466_p7 = scmp.lt.u32.totalorder %s7731_s10, %s10816_s1  ;;  %p7467_p9 = scmp.lt.u32.totalorder %s7465_s23, %s7460_s14 }
  0x4c   : > { %p7463_p3 = pnand %p7462_p0, %p7461_p13  ;;  %p7469_p11 = scmp.lt.u32.totalorder %s7460_s14, %s7731_s10 }
  0x4d   : > { %p7468_p12 = por %p7467_p9, %p7466_p7 }
  0x4e   : > { %p7464_p5 = pneg %p7463_p3 }
  0x4f   : > { %p7470_p1 = por %p7469_p11, %p7468_p12 }
  0x51   : > { %p7471_p2 = pnand %p7470_p1, %p7464_p5 }
  0x53   : > { %7474 = shalt.err (!%p7471_p2)
}
  0x54   : > { %s7475_s29 = scalar_lea.vmem %s7733_s28, 2048  ;;  %s7568_s8 = smov [#allocation2]  }
  0x55   : > { %p7476_p4 = scmp.ne.s32.totalorder %s7733_s28, %s7475_s29  ;;  %s7480_s9 = sshll.u32 %s7568_s8, 4  ;;  %s7481_s9 = int_to_ptr.vmem [resolvable:$false] %s7480_s9 }
  0x56   : > { %s7482_s11 = scalar_lea.vmem %s7481_s9, 4096  ;;  %p7483_p3 = scmp.lt.s32.totalorder %s7733_s28, %s7481_s9 }
  0x57   : > { %p7478_p8 = pnand %p7476_p4, %p7462_p0  ;;  %p7484_p7 = scmp.lt.s32.totalorder %s7482_s11, %s7475_s29 }
  0x59   : > { %p7479_p13 = pneg %p7478_p8  ;;  %p7485_p9 = por %p7484_p7, %p7483_p3 }
  0x5b   : > { %p7486_p12 = pnand %p7485_p9, %p7479_p13 }
  0x5d   : > { %7489 = shalt.err (!%p7486_p12)
}
  0x5e   : > { %s7569_s14 = smov 256   ;;  %s7570_s15 = smov 16  }
  0x5f   : > { %6797 = dma.hbm_to_vmem [thread:$0]  (!%p7735_p10), %s7731_s10, 2048, %s7733_s28, %s7739_s13, %s7569_s14, %s7569_s14, %s7570_s15  }
  0x60   : > { %p11006_p0 = scmp.ne.s32.totalorder %s11001_s26, 0 }
  0x62   : > { %254 = sbr.rel (%p11006_p0) target bundleno = 2165 (0x875), region = 40 }
  0x69   : > { %s7770_s17 = sand.u32 1, %s7552_s19   ;;  %p11007_p5 = scmp.ne.s32.totalorder %s10999_s24, 0 }
  0x6a   : > { %s5648_s23 = sshll.u32 %s7770_s17, 7  ;;  %s257_s7 = scalar_lea.sflag [#allocation3], %s7770_s17 }
  0x6b   : > { %s7774_s6 = scalar_lea.vmem [#allocation2], %s5648_s23 }
  0x6c   : > { %7535 = dma.done.wait (%p11007_p5), %s257_s7, 2048  }
  0x6d   : > { %7537 = vsyncadd (%p11007_p5), %s257_s7, 4294965248  ;;  %p11008_p10 = scmp.eq.s32.totalorder %s7627_s22, 0 }
  0x6f   : > { %7539 = dma.done.wait (%p11008_p10), [#allocation6], 53248   ;;  %p11009_p11 = pmov %p11008_p10 }
  0x70   : > { %s5652_s26 = sshll.u32 %s7627_s22, 3  ;;  %vm1774_vm0 = vcmask 64512   ;;  %v671_v0 = vld [vmem:[#allocation7 + $0x280] sm:$0xff]  ;;  %v656_v6 = vld [vmem:[#allocation7 + $0x208] sm:$0xff]  ;;  %v658_v11 = vld [vmem:[#allocation7 + $0x218] sm:$0xff]  ;;  %v10826_v34 = vmov 0.0  }
  0x71   : > { %7541 = vsyncadd (%p11009_p11), [#allocation6], 4294914048  ;;  %p306_p1 = scmp.lt.s32.totalorder %s5652_s26, 63  ;;  %6417 = vmatprep.subr.mxu0 %v671_v0  ;;  %v660_v7 = vld [vmem:[#allocation7 + $0x228] sm:$0xff]  ;;  %v655_v8 = vld [vmem:[#allocation7 + $0x200] sm:$0xff]  ;;  %2022 = vmatprep.mubr.f32.mxu1 %v10826_v34  ;;  %vm1933_vm1 = vcmask 261120  }
  0x72   : > { %6418 = vmatpush3.msra.mxu0 %v671_v0  ;;  %v6503_v9 = vpack.c.bf16 %v660_v7, %v656_v6  ;;  %v659_v10 = vld [vmem:[#allocation7 + $0x220] sm:$0xff]  ;;  %v662_v12 = vld [vmem:[#allocation7 + $0x238] sm:$0xff]  ;;  %v657_v15 = vld [vmem:[#allocation7 + $0x210] sm:$0xff]  ;;  %s5651_s9 = sshll.u32 %s7770_s17, 6  ;;  %s6255_s15 = sshll.u32 %s7627_s22, 10 }
  0x73   : > { %s11849_s26 = smov (!%p306_p1, %s5652_s26), 63  ;;  %v6505_v13 = vpack.c.bf16 %v659_v10, %v655_v8  ;;  %v6511_v14 = vpack.c.bf16 %v662_v12, %v658_v11  ;;  %v661_v16 = vld [vmem:[#allocation7 + $0x230] sm:$0xff]  ;;  %v664_v21 = vld [vmem:[#allocation7 + $0x248] sm:$0xff]  ;;  %v663_v24 = vld [vmem:[#allocation7 + $0x240] sm:$0xff]  ;;  %s10755_s11 = scalar_lea.vmem [#allocation8], %s5651_s9 }
  0x74   : > { %s5653_s10 = sshll.u32 %s11849_s26, 3  ;;  %6504 = vmatprep.subr.bf16.mxu1 %v6503_v9  ;;  %v6513_v18 = vpack.c.bf16 %v661_v16, %v657_v15  ;;  %v668_v22 = vld [vmem:[#allocation7 + $0x268] sm:$0xff]  ;;  %v667_v25 = vld [vmem:[#allocation7 + $0x260] sm:$0xff]  ;;  %v666_v26 = vld [vmem:[#allocation7 + $0x258] sm:$0xff]  ;;  %s5522_s14 = sshll.u32 %s10755_s11, 4  ;;  %s10765_s14 = int_to_ptr.vmem [resolvable:$true] %s5522_s14 }
  0x75   : > { %s7793_s24 = scalar_lea.vmem %s10815_s0, %s5653_s10  ;;  %6506 = vmatpush1.bf16.msra.mxu1 %v6505_v13  ;;  %6512 = vmatprep.subr.bf16.mxu0 %v6511_v14  ;;  %v6507_v23 = vpack.c.bf16 %v668_v22, %v664_v21  ;;  %v6509_v27 = vpack.c.bf16 %v667_v25, %v663_v24  ;;  %v670_v28 = vld [vmem:[#allocation7 + $0x278] sm:$0xff]  ;;  %v665_v29 = vld [vmem:[#allocation7 + $0x250] sm:$0xff]  ;;  %v6854_v33 = vld [vmem:[#allocation5 + $0x4] ss:$40 sps:$4 sm:$0xff]   ;;  %s10246_s8 = scalar_lea.vmem %s10817_s2, %s5653_s10 }
  0x76   : > { %v1766_v1 = vld [vmem:[%s7793_s24] sm:$0xff]  ;;  %v1767_v2 = vld [vmem:[%s7793_s24 + $0x8] sm:$0xff]  ;;  %v1768_v3 = vld [vmem:[%s7793_s24 + $0x10] sm:$0xff]  ;;  %v6515_v30 = vpack.c.bf16 %v670_v28, %v666_v26  ;;  %s5509_s26 = scalar_lea.sflag [#allocation4], %s7770_s17  ;;  %s7490_s10 = scalar_lea.vmem %s10765_s14, 1024 }
  0x77   : > { %6419 = vmatprep.mubr.msk.f32.mxu0 %vm1774_vm0, %v1766_v1  ;;  %v1769_v4 = vld [vmem:[%s7793_s24 + $0x18] sm:$0xff]  ;;  %v1770_v5 = vld [vmem:[%s7793_s24 + $0x20] sm:$0xff]  ;;  %v1771_v17 = vld [vmem:[%s7793_s24 + $0x28] sm:$0xff]  ;;  %6508 = vmatprep.subr.bf16.mxu1 %v6507_v23  ;;  %p7491_p2 = scmp.ne.s32.totalorder %s10765_s14, %s7490_s10  ;;  %s7573_s22 = smov [#allocation8]  }
  0x78   : > { %6420 = vmatmul.mubr.msk.f32.vlgmr.msra.gmra.mrb[0].mxu0 %vm1774_vm0, %v1767_v2  ;;  %v1772_v19 = vld [vmem:[%s7793_s24 + $0x30] sm:$0xff]  ;;  %v1773_v20 = vld [vmem:[%s7793_s24 + $0x38] sm:$0xff]  ;;  %v7813_v36 = vld [vmem:[#allocation7 + $0x2a0] ss:$0 sm:$0xff]  ;;  %s7494_s28 = sshll.u32 %s7573_s22, 4  ;;  %s7495_s28 = int_to_ptr.vmem [resolvable:$false] %s7494_s28 }
  0x79   : > { %6422 = vmatprep.mubr.msk.f32.mxu0 %vm1774_vm0, %v1768_v3  ;;  %6514 = vmatpush1.bf16.msra.mxu0 %v6513_v18  ;;  %v669_v31 = vld [vmem:[#allocation7 + $0x270] sm:$0xff]  ;;  %v6852_v40 = vld [vmem:[#allocation5] ss:$40 sps:$4 sm:$0xff]   ;;  %v6860_v50 = vld [vmem:[#allocation5 + $0xa4] ss:$40 sps:$4 sm:$0xff]   ;;  %p7492_p4 = pnand %p7491_p2, %p7721_p6  ;;  %s7496_s12 = scalar_lea.vmem %s7495_s28, 2048 }
  0x7a   : > { %6510 = vmatpush1.bf16.msra.mxu1 %v6509_v27  ;;  %v6517_v32 = vpack.c.bf16 %v669_v31, %v665_v29  ;;  %6516 = vmatprep.subr.bf16.mxu0 %v6515_v30  ;;  %v6955_v35 = vld [vmem:[#allocation5 + $0x50c] ss:$40 sps:$4 sm:$0xff]   ;;  %v6953_v46 = vld [vmem:[#allocation5 + $0x508] ss:$40 sps:$4 sm:$0xff]   ;;  %v6962_v53 = vld [vmem:[#allocation5 + $0x55c] ss:$40 sps:$4 sm:$0xff]   ;;  %p7497_p13 = scmp.lt.s32.totalorder %s10765_s14, %s7495_s28  ;;  %p7498_p3 = scmp.lt.s32.totalorder %s7496_s12, %s7490_s10 }
  0x7b   : > { %3560 = vmatprep.subr.bf16.mxu1 %v6854_v33  ;;  %v6857_v43 = vld [vmem:[#allocation5 + $0x54] ss:$40 sps:$4 sm:$0xff]   ;;  %v6855_v48 = vld [vmem:[#allocation5 + $0x50] ss:$40 sps:$4 sm:$0xff]   ;;  %v6858_v56 = vld [vmem:[#allocation5 + $0xa0] ss:$40 sps:$4 sm:$0xff]   ;;  %p7493_p8 = pneg %p7492_p4 }
  0x7c   : > { %6423 = vmatmul.mubr.msk.f32.gmra.mrb[2].mxu0 %vm1774_vm0, %v1769_v4  ;;  %v6863_v57 = vld [vmem:[#allocation5 + $0xf4] ss:$40 sps:$4 sm:$0xff]   ;;  %v6960_v60 = vld [vmem:[#allocation5 + $0x558] ss:$40 sps:$4 sm:$0xff]   ;;  %v6866_v0 = vld [vmem:[#allocation5 + $0x144] ss:$40 sps:$4 sm:$0xff]   ;;  %p7499_p7 = por %p7498_p3, %p7497_p13 }
  0x7d   : > { %6425 = vmatprep.mubr.msk.f32.mxu0 %vm1774_vm0, %v1770_v5  ;;  %6518 = vmatpush1.bf16.msra.mxu0 %v6517_v32  ;;  %v6861_v63 = vld [vmem:[#allocation5 + $0xf0] ss:$40 sps:$4 sm:$0xff]   ;;  %v6971_v1 = vld [vmem:[#allocation5 + $0x5ac] ss:$40 sps:$4 sm:$0xff]   ;;  %v6864_v4 = vld [vmem:[#allocation5 + $0x140] ss:$40 sps:$4 sm:$0xff]  }
  0x7e   : > { %3779 = vmatprep.subr.bf16.mxu0 %v6955_v35  ;;  %v6869_v5 = vld [vmem:[#allocation5 + $0x194] ss:$40 sps:$4 sm:$0xff]   ;;  %v6969_v6 = vld [vmem:[#allocation5 + $0x5a8] ss:$40 sps:$4 sm:$0xff]   ;;  %v6872_v10 = vld [vmem:[#allocation5 + $0x1e4] ss:$40 sps:$4 sm:$0xff]   ;;  %p7500_p9 = pnand %p7499_p7, %p7493_p8 }
  0x7f   : > { %v6867_v9 = vld [vmem:[#allocation5 + $0x190] ss:$40 sps:$4 sm:$0xff]   ;;  %v6977_v11 = vld [vmem:[#allocation5 + $0x5fc] ss:$40 sps:$4 sm:$0xff]   ;;  %v6870_v14 = vld [vmem:[#allocation5 + $0x1e0] ss:$40 sps:$4 sm:$0xff]  }
  0x80   : > { %6426 = vmatmul.mubr.msk.f32.gmra.mrb[4].mxu0 %vm1774_vm0, %v1771_v17  ;;  %v6875_v15 = vld [vmem:[#allocation5 + $0x234] ss:$40 sps:$4 sm:$0xff]   ;;  %v6975_v16 = vld [vmem:[#allocation5 + $0x5f8] ss:$40 sps:$4 sm:$0xff]   ;;  %v6983_v22 = vld [vmem:[#allocation5 + $0x648] ss:$40 sps:$4 sm:$0xff]  }
  0x81   : > { %6428 = vmatprep.mubr.msk.f32.mxu0 %vm1774_vm0, %v1772_v19  ;;  %v6873_v18 = vld [vmem:[#allocation5 + $0x230] ss:$40 sps:$4 sm:$0xff]   ;;  %v7851_v19 = vld [vmem:[%s7774_s6 + $0x4] ss:$16 sps:$4 sm:$0xff]   ;;  %v6876_v24 = vld [vmem:[#allocation5 + $0x280] ss:$40 sps:$4 sm:$0xff]  }
  0x82   : > { %v6985_v21 = vld [vmem:[#allocation5 + $0x64c] ss:$40 sps:$4 sm:$0xff]   ;;  %v6992_v23 = vld [vmem:[#allocation5 + $0x69c] ss:$40 sps:$4 sm:$0xff]   ;;  %v6990_v27 = vld [vmem:[#allocation5 + $0x698] ss:$40 sps:$4 sm:$0xff]  }
  0x83   : > { %v7858_v25 = vld [vmem:[%s7774_s6 + $0xc] ss:$16 sps:$4 sm:$0xff]   ;;  %v6879_v29 = vld [vmem:[#allocation5 + $0x2d0] ss:$40 sps:$4 sm:$0xff]   ;;  %v6882_v33 = vld [vmem:[#allocation5 + $0x320] ss:$40 sps:$4 sm:$0xff]  }
  0x84   : > { %6429 = vmatmul.mubr.msk.f32.gmra.mrb[6].mxu0 %vm1774_vm0, %v1773_v20  ;;  %v6878_v20 = vld [vmem:[#allocation5 + $0x284] ss:$40 sps:$4 sm:$0xff]   ;;  %v6881_v26 = vld [vmem:[#allocation5 + $0x2d4] ss:$40 sps:$4 sm:$0xff]   ;;  %v6998_v31 = vld [vmem:[#allocation5 + $0x6e8] ss:$40 sps:$4 sm:$0xff]  }
  0x85   : > { %2135 = vmatprep.mubr.f32.mxu0 %v10826_v34  ;;  %v7000_v28 = vld [vmem:[#allocation5 + $0x6ec] ss:$40 sps:$4 sm:$0xff]   ;;  %v7007_v32 = vld [vmem:[#allocation5 + $0x73c] ss:$40 sps:$4 sm:$0xff]  }
  0x86   : > { %v6884_v30 = vld [vmem:[#allocation5 + $0x324] ss:$40 sps:$4 sm:$0xff]   ;;  %v6887_v35 = vld [vmem:[#allocation5 + $0x374] ss:$40 sps:$4 sm:$0xff]  }
 0x14b   : > { %v6421_v37 = vpop.f32.mrb[0].mxu0 }
 0x14c   : > { %v1865_v38 = vpop.f32.mrb[1].mxu0  ;;  %v1871_v41 = vadd.f32 %v6421_v37, %v7813_v36  ;;  %v7015_v37 = vld [vmem:[#allocation5 + $0x78c] ss:$40 sps:$4 sm:$0xff]  }
 0x14d   : > { %v1866_v39 = vadd.f32 %v1865_v38, %v7813_v36  ;;  %v6885_v38 = vld [vmem:[#allocation5 + $0x370] ss:$40 sps:$4 sm:$0xff]  }
 0x14e   : > { %v1905_v49 = vmax.f32 %v1871_v41, 0.0  ;;  %v7022_v41 = vld [vmem:[#allocation5 + $0x7dc] ss:$40 sps:$4 sm:$0xff]  }
 0x14f   : > { %v1904_v42 = vmax.f32 %v1866_v39, 0.0  ;;  %v6424_v44 = vpop.f32.mrb[2].mxu0  ;;  %v6890_v39 = vld [vmem:[#allocation5 + $0x3c4] ss:$40 sps:$4 sm:$0xff]  }
 0x150   : > { %v1875_v45 = vpop.f32.mrb[3].mxu0  ;;  %v1881_v54 = vadd.f32 %v6424_v44, %v7813_v36  ;;  %v7020_v44 = vld [vmem:[#allocation5 + $0x7d8] ss:$40 sps:$4 sm:$0xff]  }
 0x151   : > { %5768 = vmatmul.mubr.msk.f32.vlgmr.msra.gmra.mrb[0].mxu1 %vm1933_vm1, %v1904_v42  ;;  %5776 = vmatmul.mubr.msk.f32.vlgmr.msra.gmra.mrb[8].mxu0 %vm1933_vm1, %v1904_v42  ;;  %v1876_v47 = vadd.f32 %v1875_v45, %v7813_v36  ;;  %v6888_v42 = vld [vmem:[#allocation5 + $0x3c0] ss:$40 sps:$4 sm:$0xff]   ;;  %v7028_v45 = vld [vmem:[#allocation5 + $0x82c] ss:$40 sps:$4 sm:$0xff]  }
 0x152   : > { %3561 = vmatpush1.bf16.msra.mxu1 %v6852_v40  ;;  %2028 = vmatprep.mubr.f32.mxu1 %v10826_v34  ;;  %v1907_v61 = vmax.f32 %v1881_v54, 0.0  ;;  %v7013_v40 = vld [vmem:[#allocation5 + $0x788] ss:$40 sps:$4 sm:$0xff]  }
 0x153   : > { %2141 = vmatprep.mubr.f32.mxu0 %v10826_v34  ;;  %3562 = vmatprep.subr.bf16.mxu1 %v6857_v43  ;;  %v6427_v51 = vpop.f32.mrb[4].mxu0  ;;  %v1906_v55 = vmax.f32 %v1876_v47, 0.0  ;;  %v6893_v43 = vld [vmem:[#allocation5 + $0x414] ss:$40 sps:$4 sm:$0xff]   ;;  %v6896_v47 = vld [vmem:[#allocation5 + $0x464] ss:$40 sps:$4 sm:$0xff]  }
 0x154   : > { %v1885_v52 = vpop.f32.mrb[5].mxu0  ;;  %3780 = vmatpush1.bf16.msra.mxu0 %v6953_v46  ;;  %v1891_v2 = vadd.f32 %v6427_v51, %v7813_v36  ;;  %v6891_v46 = vld [vmem:[#allocation5 + $0x410] ss:$40 sps:$4 sm:$0xff]   ;;  %v6899_v51 = vld [vmem:[#allocation5 + $0x4b4] ss:$40 sps:$4 sm:$0xff]  }
 0x155   : > { %5769 = vmatmul.mubr.msk.f32.gmra.mrb[2].mxu1 %vm1933_vm1, %v1905_v49  ;;  %5777 = vmatmul.mubr.msk.f32.gmra.mrb[10].mxu0 %vm1933_vm1, %v1905_v49  ;;  %v1886_v62 = vadd.f32 %v1885_v52, %v7813_v36  ;;  %v7034_v49 = vld [vmem:[#allocation5 + $0x87c] ss:$40 sps:$4 sm:$0xff]   ;;  %v7032_v52 = vld [vmem:[#allocation5 + $0x878] ss:$40 sps:$4 sm:$0xff]  }
 0x156   : > { %3563 = vmatpush1.bf16.msra.mxu1 %v6855_v48  ;;  %2034 = vmatprep.mubr.f32.mxu1 %v10826_v34  ;;  %v1909_v7 = vmax.f32 %v1891_v2, 0.0  ;;  %v7026_v48 = vld [vmem:[#allocation5 + $0x828] ss:$40 sps:$4 sm:$0xff]  }
 0x157   : > { %3564 = vmatprep.subr.bf16.mxu1 %v6860_v50  ;;  %2147 = vmatprep.mubr.f32.mxu0 %v10826_v34  ;;  %v6430_v58 = vpop.f32.mrb[6].mxu0  ;;  %v1908_v3 = vmax.f32 %v1886_v62, 0.0  ;;  %v6894_v50 = vld [vmem:[#allocation5 + $0x460] ss:$40 sps:$4 sm:$0xff]   ;;  %v6897_v54 = vld [vmem:[#allocation5 + $0x4b0] ss:$40 sps:$4 sm:$0xff]  }
 0x158   : > { %v1895_v59 = vpop.f32.mrb[7].mxu0  ;;  %3781 = vmatprep.subr.bf16.mxu0 %v6962_v53  ;;  %v1901_v12 = vadd.f32 %v6430_v58, %v7813_v36  ;;  %v7040_v53 = vld [vmem:[#allocation5 + $0x8cc] ss:$40 sps:$4 sm:$0xff]   ;;  %v7046_v58 = vld [vmem:[#allocation5 + $0x91c] ss:$40 sps:$4 sm:$0xff]  }
 0x159   : > { %5770 = vmatmul.mubr.msk.f32.gmra.mrb[4].mxu1 %vm1933_vm1, %v1906_v55  ;;  %5778 = vmatmul.mubr.msk.f32.gmra.mrb[12].mxu0 %vm1933_vm1, %v1906_v55  ;;  %v1896_v8 = vadd.f32 %v1895_v59, %v7813_v36  ;;  %v7005_v36 = vld [vmem:[#allocation5 + $0x738] ss:$40 sps:$4 sm:$0xff]   ;;  %v6905_v55 = vld [vmem:[#allocation5 + $0x504] ss:$40 sps:$4 sm:$0xff]   ;;  %v7050_v2 = vld [vmem:[#allocation5 + $0x968] ss:$40 sps:$4 sm:$0xff]  }
 0x15a   : > { %3565 = vmatpush1.bf16.msra.mxu1 %v6858_v56  ;;  %2040 = vmatprep.mubr.f32.mxu1 %v10826_v34  ;;  %v1911_v17 = vmax.f32 %v1901_v12, 0.0  ;;  %v7038_v56 = vld [vmem:[#allocation5 + $0x8c8] ss:$40 sps:$4 sm:$0xff]   ;;  %v7044_v62 = vld [vmem:[#allocation5 + $0x918] ss:$40 sps:$4 sm:$0xff]  }
 0x15b   : > { %3566 = vmatprep.subr.bf16.mxu1 %v6863_v57  ;;  %2153 = vmatprep.mubr.f32.mxu0 %v10826_v34  ;;  %v1910_v13 = vmax.f32 %v1896_v8, 0.0  ;;  %v7862_v57 = vld [vmem:[%s7774_s6] ss:$16 sps:$4 sm:$0xff]  }
 0x15c   : > { %3782 = vmatpush1.bf16.msra.mxu0 %v6960_v60  ;;  %v6903_v59 = vld [vmem:[#allocation5 + $0x500] ss:$40 sps:$4 sm:$0xff]   ;;  %v7865_v60 = vld [vmem:[%s7774_s6 + $0x24] ss:$16 sps:$4 sm:$0xff]  }
 0x15d   : > { %5771 = vmatmul.mubr.msk.f32.gmra.mrb[6].mxu1 %vm1933_vm1, %v1907_v61  ;;  %5779 = vmatmul.mubr.msk.f32.gmra.mrb[14].mxu0 %vm1933_vm1, %v1907_v61  ;;  %v6908_v61 = vld [vmem:[#allocation5 + $0x554] ss:$40 sps:$4 sm:$0xff]   ;;  %v7056_v8 = vld [vmem:[#allocation5 + $0x9b8] ss:$40 sps:$4 sm:$0xff]  }
 0x15e   : > { %3567 = vmatpush1.bf16.msra.mxu1 %v6861_v63  ;;  %2046 = vmatprep.mubr.f32.mxu1 %v10826_v34  ;;  %v7052_v63 = vld [vmem:[#allocation5 + $0x96c] ss:$40 sps:$4 sm:$0xff]   ;;  %v7062_v12 = vld [vmem:[#allocation5 + $0x18] ss:$40 sps:$4 sm:$0xff]  }
 0x15f   : > { %3568 = vmatprep.subr.bf16.mxu1 %v6866_v0  ;;  %2159 = vmatprep.mubr.f32.mxu0 %v10826_v34  ;;  %v6906_v0 = vld [vmem:[#allocation5 + $0x550] ss:$40 sps:$4 sm:$0xff]  }
 0x160   : > { %3783 = vmatprep.subr.bf16.mxu0 %v6971_v1  ;;  %v6911_v1 = vld [vmem:[#allocation5 + $0x5a4] ss:$40 sps:$4 sm:$0xff]  }
 0x161   : > { %5772 = vmatmul.mubr.msk.f32.gmra.mrb[8].mxu1 %vm1933_vm1, %v1908_v3  ;;  %5780 = vmatmul.mubr.msk.f32.gmra.mrb[16].mxu0 %vm1933_vm1, %v1908_v3  ;;  %v7870_v3 = vld [vmem:[%s7774_s6 + $0x20] ss:$16 sps:$4 sm:$0xff]  }
 0x162   : > { %3569 = vmatpush1.bf16.msra.mxu1 %v6864_v4  ;;  %2052 = vmatprep.mubr.f32.mxu1 %v10826_v34  ;;  %v7058_v4 = vld [vmem:[#allocation5 + $0x9bc] ss:$40 sps:$4 sm:$0xff]  }
 0x163   : > { %3570 = vmatprep.subr.bf16.mxu1 %v6869_v5  ;;  %2165 = vmatprep.mubr.f32.mxu0 %v10826_v34  ;;  %v6909_v5 = vld [vmem:[#allocation5 + $0x5a0] ss:$40 sps:$4 sm:$0xff]  }
 0x164   : > { %3784 = vmatpush1.bf16.msra.mxu0 %v6969_v6  ;;  %v7873_v6 = vld [vmem:[%s7774_s6 + $0x44] ss:$16 sps:$4 sm:$0xff]  }
 0x165   : > { %5773 = vmatmul.mubr.msk.f32.gmra.mrb[10].mxu1 %vm1933_vm1, %v1909_v7  ;;  %5781 = vmatmul.mubr.msk.f32.gmra.mrb[18].mxu0 %vm1933_vm1, %v1909_v7  ;;  %v6914_v7 = vld [vmem:[#allocation5 + $0x5f4] ss:$40 sps:$4 sm:$0xff]  }
 0x166   : > { %3571 = vmatpush1.bf16.msra.mxu1 %v6867_v9  ;;  %2058 = vmatprep.mubr.f32.mxu1 %v10826_v34  ;;  %v7064_v9 = vld [vmem:[#allocation5 + $0x1c] ss:$40 sps:$4 sm:$0xff]  }
 0x167   : > { %3572 = vmatprep.subr.bf16.mxu1 %v6872_v10  ;;  %2171 = vmatprep.mubr.f32.mxu0 %v10826_v34  ;;  %v6912_v10 = vld [vmem:[#allocation5 + $0x5f0] ss:$40 sps:$4 sm:$0xff]  }
 0x168   : > { %3785 = vmatprep.subr.bf16.mxu0 %v6977_v11  ;;  %v6917_v11 = vld [vmem:[#allocation5 + $0x644] ss:$40 sps:$4 sm:$0xff]  }
 0x169   : > { %5774 = vmatmul.mubr.msk.f32.gmra.mrb[12].mxu1 %vm1933_vm1, %v1910_v13  ;;  %5782 = vmatmul.mubr.msk.f32.gmra.mrb[20].mxu0 %vm1933_vm1, %v1910_v13  ;;  %v7878_v13 = vld [vmem:[%s7774_s6 + $0x40] ss:$16 sps:$4 sm:$0xff]  }
 0x16a   : > { %3573 = vmatpush1.bf16.msra.mxu1 %v6870_v14  ;;  %2064 = vmatprep.mubr.f32.mxu1 %v10826_v34  ;;  %v7881_v14 = vld [vmem:[%s7774_s6 + $0x8] ss:$16 sps:$4 sm:$0xff]  }
 0x16b   : > { %3574 = vmatprep.subr.bf16.mxu1 %v6875_v15  ;;  %2177 = vmatprep.mubr.f32.mxu0 %v10826_v34  ;;  %v7070_v15 = vld [vmem:[#allocation5 + $0x6c] ss:$40 sps:$4 sm:$0xff]  }
 0x16c   : > { %3786 = vmatpush1.bf16.msra.mxu0 %v6975_v16  ;;  %v6915_v16 = vld [vmem:[#allocation5 + $0x640] ss:$40 sps:$4 sm:$0xff]  }
 0x16d   : > { %5775 = vmatmul.mubr.msk.f32.gmra.mrb[14].mxu1 %vm1933_vm1, %v1911_v17  ;;  %5783 = vmatmul.mubr.msk.f32.gmra.mrb[22].mxu0 %vm1933_vm1, %v1911_v17  ;;  %v7884_v17 = vld [vmem:[%s7774_s6 + $0x64] ss:$16 sps:$4 sm:$0xff]  }
 0x16e   : > { %3575 = vmatpush1.bf16.msra.mxu1 %v6873_v18  ;;  %3592 = vmatprep.mubr.bf16.mxu1 %v7851_v19  ;;  %v7887_v18 = vld [vmem:[%s7774_s6 + $0x2c] ss:$16 sps:$4 sm:$0xff]  }
 0x16f   : > { %3576 = vmatprep.subr.bf16.mxu1 %v6878_v20  ;;  %3787 = vmatprep.subr.bf16.mxu0 %v6985_v21  ;;  %v6920_v20 = vld [vmem:[#allocation5 + $0x694] ss:$40 sps:$4 sm:$0xff]   ;;  %v7068_v21 = vld [vmem:[#allocation5 + $0x68] ss:$40 sps:$4 sm:$0xff]  }
 0x170   : > { %3788 = vmatpush1.bf16.msra.mxu0 %v6983_v22  ;;  %3811 = vmatprep.mubr.bf16.mxu0 %v7858_v25  ;;  %v7076_v22 = vld [vmem:[#allocation5 + $0xbc] ss:$40 sps:$4 sm:$0xff]  }
 0x171   : > { %3789 = vmatprep.subr.bf16.mxu0 %v6992_v23  ;;  %v6918_v23 = vld [vmem:[#allocation5 + $0x690] ss:$40 sps:$4 sm:$0xff]  }
 0x172   : > { %3577 = vmatpush1.bf16.msra.mxu1 %v6876_v24  ;;  %v6923_v24 = vld [vmem:[#allocation5 + $0x6e4] ss:$40 sps:$4 sm:$0xff]  }
 0x173   : > { %3578 = vmatprep.subr.bf16.mxu1 %v6881_v26  ;;  %v7074_v26 = vld [vmem:[#allocation5 + $0xb8] ss:$40 sps:$4 sm:$0xff]  }
 0x174   : > { %3790 = vmatpush1.bf16.msra.mxu0 %v6990_v27  ;;  %v7894_v27 = vld [vmem:[%s7774_s6 + $0x60] ss:$16 sps:$4 sm:$0xff]  }
 0x175   : > { %3791 = vmatprep.subr.bf16.mxu0 %v7000_v28  ;;  %v7897_v28 = vld [vmem:[%s7774_s6 + $0x28] ss:$16 sps:$4 sm:$0xff]  }
 0x176   : > { %3579 = vmatpush1.bf16.msra.mxu1 %v6879_v29  ;;  %v7082_v29 = vld [vmem:[#allocation5 + $0x10c] ss:$40 sps:$4 sm:$0xff]  }
 0x177   : > { %3580 = vmatprep.subr.bf16.mxu1 %v6884_v30  ;;  %v6921_v30 = vld [vmem:[#allocation5 + $0x6e0] ss:$40 sps:$4 sm:$0xff]  }
 0x178   : > { %3792 = vmatpush1.bf16.msra.mxu0 %v6998_v31  ;;  %v7900_v31 = vld [vmem:[%s7774_s6 + $0x4c] ss:$16 sps:$4 sm:$0xff]  }
 0x179   : > { %3793 = vmatprep.subr.bf16.mxu0 %v7007_v32  ;;  %v6926_v32 = vld [vmem:[#allocation5 + $0x734] ss:$40 sps:$4 sm:$0xff]  }
 0x17a   : > { %3581 = vmatpush1.bf16.msra.mxu1 %v6882_v33  ;;  %v7080_v33 = vld [vmem:[#allocation5 + $0x108] ss:$40 sps:$4 sm:$0xff]  }
 0x17b   : > { %3582 = vmatprep.subr.bf16.mxu1 %v6887_v35  ;;  %v7088_v35 = vld [vmem:[#allocation5 + $0x15c] ss:$40 sps:$4 sm:$0xff]  }
 0x17c   : > { %3794 = vmatpush1.bf16.msra.mxu0 %v7005_v36  ;;  %v6924_v36 = vld [vmem:[#allocation5 + $0x730] ss:$40 sps:$4 sm:$0xff]  }
 0x17d   : > { %3795 = vmatprep.subr.bf16.mxu0 %v7015_v37  ;;  %v6929_v37 = vld [vmem:[#allocation5 + $0x784] ss:$40 sps:$4 sm:$0xff]  }
 0x17e   : > { %3583 = vmatpush1.bf16.msra.mxu1 %v6885_v38  ;;  %v7086_v38 = vld [vmem:[#allocation5 + $0x158] ss:$40 sps:$4 sm:$0xff]  }
 0x17f   : > { %3584 = vmatprep.subr.bf16.mxu1 %v6890_v39  ;;  %v7907_v39 = vld [vmem:[%s7774_s6 + $0x48] ss:$16 sps:$4 sm:$0xff]  }
 0x180   : > { %3796 = vmatpush1.bf16.msra.mxu0 %v7013_v40  ;;  %v7094_v40 = vld [vmem:[#allocation5 + $0x1ac] ss:$40 sps:$4 sm:$0xff]  }
 0x181   : > { %3797 = vmatprep.subr.bf16.mxu0 %v7022_v41  ;;  %v6927_v41 = vld [vmem:[#allocation5 + $0x780] ss:$40 sps:$4 sm:$0xff]  }
 0x182   : > { %3585 = vmatpush1.bf16.msra.mxu1 %v6888_v42  ;;  %v7910_v42 = vld [vmem:[%s7774_s6 + $0x6c] ss:$16 sps:$4 sm:$0xff]  }
 0x183   : > { %3586 = vmatprep.subr.bf16.mxu1 %v6893_v43  ;;  %v6932_v43 = vld [vmem:[#allocation5 + $0x7d4] ss:$40 sps:$4 sm:$0xff]  }
 0x184   : > { %3798 = vmatpush1.bf16.msra.mxu0 %v7020_v44  ;;  %v7092_v44 = vld [vmem:[#allocation5 + $0x1a8] ss:$40 sps:$4 sm:$0xff]  }
 0x185   : > { %3799 = vmatprep.subr.bf16.mxu0 %v7028_v45  ;;  %v7100_v45 = vld [vmem:[#allocation5 + $0x1fc] ss:$40 sps:$4 sm:$0xff]  }
 0x186   : > { %3587 = vmatpush1.bf16.msra.mxu1 %v6891_v46  ;;  %v6930_v46 = vld [vmem:[#allocation5 + $0x7d0] ss:$40 sps:$4 sm:$0xff]  }
 0x187   : > { %3588 = vmatprep.subr.bf16.mxu1 %v6896_v47  ;;  %v6938_v47 = vld [vmem:[#allocation5 + $0x824] ss:$40 sps:$4 sm:$0xff]  }
 0x188   : > { %3800 = vmatpush1.bf16.msra.mxu0 %v7026_v48  ;;  %v7098_v48 = vld [vmem:[#allocation5 + $0x1f8] ss:$40 sps:$4 sm:$0xff]  }
 0x189   : > { %3801 = vmatprep.subr.bf16.mxu0 %v7034_v49  ;;  %v7915_v49 = vld [vmem:[%s7774_s6 + $0x68] ss:$16 sps:$4 sm:$0xff]  }
 0x18a   : > { %3589 = vmatpush1.bf16.msra.mxu1 %v6894_v50  ;;  %v7106_v50 = vld [vmem:[#allocation5 + $0x24c] ss:$40 sps:$4 sm:$0xff]  }
 0x18b   : > { %3590 = vmatprep.subr.bf16.mxu1 %v6899_v51  ;;  %v6936_v51 = vld [vmem:[#allocation5 + $0x820] ss:$40 sps:$4 sm:$0xff]  }
 0x18c   : > { %3802 = vmatpush1.bf16.msra.mxu0 %v7032_v52  ;;  %v6941_v52 = vld [vmem:[#allocation5 + $0x874] ss:$40 sps:$4 sm:$0xff]  }
 0x18d   : > { %3803 = vmatprep.subr.bf16.mxu0 %v7040_v53  ;;  %v7104_v53 = vld [vmem:[#allocation5 + $0x248] ss:$40 sps:$4 sm:$0xff]  }
 0x18e   : > { %3591 = vmatpush1.bf16.msra.mxu1 %v6897_v54  ;;  %v7112_v54 = vld [vmem:[#allocation5 + $0x29c] ss:$40 sps:$4 sm:$0xff]  }
 0x18f   : > { %3633 = vmatprep.subr.bf16.mxu1 %v6905_v55  ;;  %v6939_v55 = vld [vmem:[#allocation5 + $0x870] ss:$40 sps:$4 sm:$0xff]  }
 0x190   : > { %3804 = vmatpush1.bf16.msra.mxu0 %v7038_v56  ;;  %v6947_v56 = vld [vmem:[#allocation5 + $0x8c4] ss:$40 sps:$4 sm:$0xff]  }
 0x191   : > { %3593 = vmatmul.mubr.bf16.vlgmr.msra.gmra.mrb[16].mxu1 %v7862_v57  ;;  %3805 = vmatprep.subr.bf16.mxu0 %v7046_v58  ;;  %v7110_v58 = vld [vmem:[#allocation5 + $0x298] ss:$40 sps:$4 sm:$0xff]  }
 0x192   : > { %3634 = vmatpush1.bf16.msra.mxu1 %v6903_v59  ;;  %3602 = vmatprep.mubr.bf16.mxu1 %v7865_v60  ;;  %v7118_v59 = vld [vmem:[#allocation5 + $0x2ec] ss:$40 sps:$4 sm:$0xff]  }
 0x193   : > { %3635 = vmatprep.subr.bf16.mxu1 %v6908_v61  ;;  %v6945_v61 = vld [vmem:[#allocation5 + $0x8c0] ss:$40 sps:$4 sm:$0xff]  }
 0x194   : > { %3806 = vmatpush1.bf16.msra.mxu0 %v7044_v62  ;;  %v6950_v62 = vld [vmem:[#allocation5 + $0x914] ss:$40 sps:$4 sm:$0xff]  }
 0x195   : > { %3807 = vmatprep.subr.bf16.mxu0 %v7052_v63  ;;  %v7116_v63 = vld [vmem:[#allocation5 + $0x2e8] ss:$40 sps:$4 sm:$0xff]  }
 0x196   : > { %3636 = vmatpush1.bf16.msra.mxu1 %v6906_v0  ;;  %v7124_v0 = vld [vmem:[#allocation5 + $0x33c] ss:$40 sps:$4 sm:$0xff]  }
 0x197   : > { %3637 = vmatprep.subr.bf16.mxu1 %v6911_v1  ;;  %v6948_v1 = vld [vmem:[#allocation5 + $0x910] ss:$40 sps:$4 sm:$0xff]  }
 0x198   : > { %3808 = vmatpush1.bf16.msra.mxu0 %v7050_v2  ;;  %v6959_v2 = vld [vmem:[#allocation5 + $0x964] ss:$40 sps:$4 sm:$0xff]  }
 0x199   : > { %3603 = vmatmul.mubr.bf16.gmra.mrb[20].mxu1 %v7870_v3  ;;  %3809 = vmatprep.subr.bf16.mxu0 %v7058_v4  ;;  %v7122_v4 = vld [vmem:[#allocation5 + $0x338] ss:$40 sps:$4 sm:$0xff]  }
 0x19a   : > { %3638 = vmatpush1.bf16.msra.mxu1 %v6909_v5  ;;  %3612 = vmatprep.mubr.bf16.mxu1 %v7873_v6  ;;  %v7130_v5 = vld [vmem:[#allocation5 + $0x38c] ss:$40 sps:$4 sm:$0xff]  }
 0x19b   : > { %3639 = vmatprep.subr.bf16.mxu1 %v6914_v7  ;;  %v6957_v7 = vld [vmem:[#allocation5 + $0x960] ss:$40 sps:$4 sm:$0xff]  }
 0x19c   : > { %3810 = vmatpush1.bf16.msra.mxu0 %v7056_v8  ;;  %v6965_v8 = vld [vmem:[#allocation5 + $0x9b4] ss:$40 sps:$4 sm:$0xff]  }
 0x19d   : > { %3998 = vmatprep.subr.bf16.mxu0 %v7064_v9  ;;  %v7128_v9 = vld [vmem:[#allocation5 + $0x388] ss:$40 sps:$4 sm:$0xff]  }
 0x19e   : > { %3640 = vmatpush1.bf16.msra.mxu1 %v6912_v10  ;;  %v7136_v10 = vld [vmem:[#allocation5 + $0x3dc] ss:$40 sps:$4 sm:$0xff]  }
 0x19f   : > { %3641 = vmatprep.subr.bf16.mxu1 %v6917_v11  ;;  %3812 = vmatmul.mubr.bf16.vlgmr.msra.gmra.mrb[24].mxu0 %v7881_v14  ;;  %v6963_v11 = vld [vmem:[#allocation5 + $0x9b0] ss:$40 sps:$4 sm:$0xff]  }
 0x1a0   : > { %3999 = vmatpush1.bf16.msra.mxu0 %v7062_v12  ;;  %3821 = vmatprep.mubr.bf16.mxu0 %v7887_v18  ;;  %v6974_v12 = vld [vmem:[#allocation5 + $0xc] ss:$40 sps:$4 sm:$0xff]  }
 0x1a1   : > { %3613 = vmatmul.mubr.bf16.gmra.mrb[24].mxu1 %v7878_v13  ;;  %4000 = vmatprep.subr.bf16.mxu0 %v7070_v15  ;;  %v7134_v15 = vld [vmem:[#allocation5 + $0x3d8] ss:$40 sps:$4 sm:$0xff]  }
 0x1a2   : > { %3642 = vmatpush1.bf16.msra.mxu1 %v6915_v16  ;;  %3622 = vmatprep.mubr.bf16.mxu1 %v7884_v17  ;;  %v7142_v16 = vld [vmem:[#allocation5 + $0x42c] ss:$40 sps:$4 sm:$0xff]  }
 0x1a3   : > { %3643 = vmatprep.subr.bf16.mxu1 %v6920_v20  ;;  %v6972_v20 = vld [vmem:[#allocation5 + $0x8] ss:$40 sps:$4 sm:$0xff]  }
 0x1a4   : > { %4001 = vmatpush1.bf16.msra.mxu0 %v7068_v21  ;;  %v6980_v21 = vld [vmem:[#allocation5 + $0x5c] ss:$40 sps:$4 sm:$0xff]  }
 0x1a5   : > { %4002 = vmatprep.subr.bf16.mxu0 %v7076_v22  ;;  %v7140_v22 = vld [vmem:[#allocation5 + $0x428] ss:$40 sps:$4 sm:$0xff]  }
 0x1a6   : > { %3644 = vmatpush1.bf16.msra.mxu1 %v6918_v23  ;;  %v7148_v23 = vld [vmem:[#allocation5 + $0x47c] ss:$40 sps:$4 sm:$0xff]  }
 0x1a7   : > { %3645 = vmatprep.subr.bf16.mxu1 %v6923_v24  ;;  %3822 = vmatmul.mubr.bf16.gmra.mrb[28].mxu0 %v7897_v28  ;;  %v6978_v24 = vld [vmem:[#allocation5 + $0x58] ss:$40 sps:$4 sm:$0xff]  }
 0x1a8   : > { %4003 = vmatpush1.bf16.msra.mxu0 %v7074_v26  ;;  %3831 = vmatprep.mubr.bf16.mxu0 %v7900_v31  ;;  %v6989_v26 = vld [vmem:[#allocation5 + $0xac] ss:$40 sps:$4 sm:$0xff]  }
 0x1a9   : > { %3623 = vmatmul.mubr.bf16.gmra.mrb[28].mxu1 %v7894_v27  ;;  %4004 = vmatprep.subr.bf16.mxu0 %v7082_v29  ;;  %v7146_v29 = vld [vmem:[#allocation5 + $0x478] ss:$40 sps:$4 sm:$0xff]  }
 0x1aa   : > { %3646 = vmatpush1.bf16.msra.mxu1 %v6921_v30  ;;  %3665 = vmatprep.mubr.bf16.mxu1 %v7858_v25  ;;  %v7154_v30 = vld [vmem:[#allocation5 + $0x4cc] ss:$40 sps:$4 sm:$0xff]  }
 0x1ab   : > { %3647 = vmatprep.subr.bf16.mxu1 %v6926_v32  ;;  %v6987_v32 = vld [vmem:[#allocation5 + $0xa8] ss:$40 sps:$4 sm:$0xff]  }
 0x1ac   : > { %4005 = vmatpush1.bf16.msra.mxu0 %v7080_v33  ;;  %v6995_v33 = vld [vmem:[#allocation5 + $0xfc] ss:$40 sps:$4 sm:$0xff]  }
 0x1ad   : > { %4006 = vmatprep.subr.bf16.mxu0 %v7088_v35  ;;  %v7152_v35 = vld [vmem:[#allocation5 + $0x4c8] ss:$40 sps:$4 sm:$0xff]  }
 0x1ae   : > { %3648 = vmatpush1.bf16.msra.mxu1 %v6924_v36  ;;  %v7160_v36 = vld [vmem:[#allocation5 + $0x51c] ss:$40 sps:$4 sm:$0xff]  }
 0x1af   : > { %3649 = vmatprep.subr.bf16.mxu1 %v6929_v37  ;;  %3832 = vmatmul.mubr.bf16.gmra.mrb[32].mxu0 %v7907_v39  ;;  %v6993_v37 = vld [vmem:[#allocation5 + $0xf8] ss:$40 sps:$4 sm:$0xff]  }
 0x1b0   : > { %4007 = vmatpush1.bf16.msra.mxu0 %v7086_v38  ;;  %3841 = vmatprep.mubr.bf16.mxu0 %v7910_v42  ;;  %v7004_v38 = vld [vmem:[#allocation5 + $0x14c] ss:$40 sps:$4 sm:$0xff]  }
 0x1b1   : > { %4008 = vmatprep.subr.bf16.mxu0 %v7094_v40  ;;  %v7158_v40 = vld [vmem:[#allocation5 + $0x518] ss:$40 sps:$4 sm:$0xff]  }
 0x1b2   : > { %3650 = vmatpush1.bf16.msra.mxu1 %v6927_v41  ;;  %v7166_v41 = vld [vmem:[#allocation5 + $0x56c] ss:$40 sps:$4 sm:$0xff]  }
 0x1b3   : > { %3651 = vmatprep.subr.bf16.mxu1 %v6932_v43  ;;  %v7002_v43 = vld [vmem:[#allocation5 + $0x148] ss:$40 sps:$4 sm:$0xff]  }
 0x1b4   : > { %4009 = vmatpush1.bf16.msra.mxu0 %v7092_v44  ;;  %v7010_v44 = vld [vmem:[#allocation5 + $0x19c] ss:$40 sps:$4 sm:$0xff]  }
 0x1b5   : > { %4010 = vmatprep.subr.bf16.mxu0 %v7100_v45  ;;  %v7164_v45 = vld [vmem:[#allocation5 + $0x568] ss:$40 sps:$4 sm:$0xff]  }
 0x1b6   : > { %3652 = vmatpush1.bf16.msra.mxu1 %v6930_v46  ;;  %v7172_v46 = vld [vmem:[#allocation5 + $0x5bc] ss:$40 sps:$4 sm:$0xff]  }
 0x1b7   : > { %3653 = vmatprep.subr.bf16.mxu1 %v6938_v47  ;;  %3842 = vmatmul.mubr.bf16.gmra.mrb[36].mxu0 %v7915_v49  ;;  %v7008_v47 = vld [vmem:[#allocation5 + $0x198] ss:$40 sps:$4 sm:$0xff]  }
 0x1b8   : > { %4011 = vmatpush1.bf16.msra.mxu0 %v7098_v48  ;;  %4030 = vmatprep.mubr.bf16.mxu0 %v7851_v19  ;;  %v7019_v48 = vld [vmem:[#allocation5 + $0x1ec] ss:$40 sps:$4 sm:$0xff]  }
 0x1b9   : > { %4012 = vmatprep.subr.bf16.mxu0 %v7106_v50  ;;  %v7170_v50 = vld [vmem:[#allocation5 + $0x5b8] ss:$40 sps:$4 sm:$0xff]  }
 0x1ba   : > { %3654 = vmatpush1.bf16.msra.mxu1 %v6936_v51  ;;  %v7178_v51 = vld [vmem:[#allocation5 + $0x60c] ss:$40 sps:$4 sm:$0xff]  }
 0x1bb   : > { %3655 = vmatprep.subr.bf16.mxu1 %v6941_v52  ;;  %v7017_v52 = vld [vmem:[#allocation5 + $0x1e8] ss:$40 sps:$4 sm:$0xff]  }
 0x1bc   : > { %4013 = vmatpush1.bf16.msra.mxu0 %v7104_v53  ;;  %v7025_v53 = vld [vmem:[#allocation5 + $0x23c] ss:$40 sps:$4 sm:$0xff]  }
 0x1bd   : > { %4014 = vmatprep.subr.bf16.mxu0 %v7112_v54  ;;  %v7176_v54 = vld [vmem:[#allocation5 + $0x608] ss:$40 sps:$4 sm:$0xff]  }
 0x1be   : > { %3656 = vmatpush1.bf16.msra.mxu1 %v6939_v55  ;;  %v7184_v55 = vld [vmem:[#allocation5 + $0x65c] ss:$40 sps:$4 sm:$0xff]  }
 0x1bf   : > { %3657 = vmatprep.subr.bf16.mxu1 %v6947_v56  ;;  %v7023_v56 = vld [vmem:[#allocation5 + $0x238] ss:$40 sps:$4 sm:$0xff]  }
 0x1c0   : > { %4015 = vmatpush1.bf16.msra.mxu0 %v7110_v58  ;;  %v7031_v58 = vld [vmem:[#allocation5 + $0x28c] ss:$40 sps:$4 sm:$0xff]  }
 0x1c1   : > { %4016 = vmatprep.subr.bf16.mxu0 %v7118_v59  ;;  %v7182_v59 = vld [vmem:[#allocation5 + $0x658] ss:$40 sps:$4 sm:$0xff]  }
 0x1c2   : > { %3658 = vmatpush1.bf16.msra.mxu1 %v6945_v61  ;;  %v7190_v61 = vld [vmem:[#allocation5 + $0x6ac] ss:$40 sps:$4 sm:$0xff]  }
 0x1c3   : > { %3659 = vmatprep.subr.bf16.mxu1 %v6950_v62  ;;  %v7029_v62 = vld [vmem:[#allocation5 + $0x288] ss:$40 sps:$4 sm:$0xff]  }
 0x1c4   : > { %4017 = vmatpush1.bf16.msra.mxu0 %v7116_v63  ;;  %v7037_v63 = vld [vmem:[#allocation5 + $0x2dc] ss:$40 sps:$4 sm:$0xff]  }
 0x1c5   : > { %4018 = vmatprep.subr.bf16.mxu0 %v7124_v0  ;;  %v7188_v0 = vld [vmem:[#allocation5 + $0x6a8] ss:$40 sps:$4 sm:$0xff]  }
 0x1c6   : > { %3660 = vmatpush1.bf16.msra.mxu1 %v6948_v1  ;;  %v7196_v1 = vld [vmem:[#allocation5 + $0x6fc] ss:$40 sps:$4 sm:$0xff]  }
 0x1c7   : > { %3661 = vmatprep.subr.bf16.mxu1 %v6959_v2  ;;  %v7043_v2 = vld [vmem:[#allocation5 + $0x32c] ss:$40 sps:$4 sm:$0xff]  }
 0x1c8   : > { %4019 = vmatpush1.bf16.msra.mxu0 %v7122_v4  ;;  %v7194_v4 = vld [vmem:[#allocation5 + $0x6f8] ss:$40 sps:$4 sm:$0xff]  }
 0x1c9   : > { %4020 = vmatprep.subr.bf16.mxu0 %v7130_v5  ;;  %v7202_v5 = vld [vmem:[#allocation5 + $0x74c] ss:$40 sps:$4 sm:$0xff]  }
 0x1ca   : > { %3662 = vmatpush1.bf16.msra.mxu1 %v6957_v7  ;;  %v7041_v7 = vld [vmem:[#allocation5 + $0x328] ss:$40 sps:$4 sm:$0xff]  }
 0x1cb   : > { %3663 = vmatprep.subr.bf16.mxu1 %v6965_v8  ;;  %v7049_v8 = vld [vmem:[#allocation5 + $0x37c] ss:$40 sps:$4 sm:$0xff]  }
 0x1cc   : > { %4021 = vmatpush1.bf16.msra.mxu0 %v7128_v9  ;;  %v7200_v9 = vld [vmem:[#allocation5 + $0x748] ss:$40 sps:$4 sm:$0xff]  }
 0x1cd   : > { %4022 = vmatprep.subr.bf16.mxu0 %v7136_v10  ;;  %v7208_v10 = vld [vmem:[#allocation5 + $0x79c] ss:$40 sps:$4 sm:$0xff]  }
 0x1ce   : > { %3664 = vmatpush1.bf16.msra.mxu1 %v6963_v11  ;;  %v7047_v11 = vld [vmem:[#allocation5 + $0x378] ss:$40 sps:$4 sm:$0xff]  }
 0x1cf   : > { %3706 = vmatprep.subr.bf16.mxu1 %v6974_v12  ;;  %v7055_v12 = vld [vmem:[#allocation5 + $0x3cc] ss:$40 sps:$4 sm:$0xff]  }
 0x1d0   : > { %4023 = vmatpush1.bf16.msra.mxu0 %v7134_v15  ;;  %v7206_v15 = vld [vmem:[#allocation5 + $0x798] ss:$40 sps:$4 sm:$0xff]  }
 0x1d1   : > { %3666 = vmatmul.mubr.bf16.vlgmr.msra.gmra.mrb[16].mxu1 %v7881_v14  ;;  %4024 = vmatprep.subr.bf16.mxu0 %v7142_v16  ;;  %v7214_v16 = vld [vmem:[#allocation5 + $0x7ec] ss:$40 sps:$4 sm:$0xff]  }
 0x1d2   : > { %3707 = vmatpush1.bf16.msra.mxu1 %v6972_v20  ;;  %3675 = vmatprep.mubr.bf16.mxu1 %v7887_v18  ;;  %v7053_v20 = vld [vmem:[#allocation5 + $0x3c8] ss:$40 sps:$4 sm:$0xff]  }
 0x1d3   : > { %3708 = vmatprep.subr.bf16.mxu1 %v6980_v21  ;;  %v7061_v21 = vld [vmem:[#allocation5 + $0x41c] ss:$40 sps:$4 sm:$0xff]  }
 0x1d4   : > { %4025 = vmatpush1.bf16.msra.mxu0 %v7140_v22  ;;  %v7212_v22 = vld [vmem:[#allocation5 + $0x7e8] ss:$40 sps:$4 sm:$0xff]  }
 0x1d5   : > { %4026 = vmatprep.subr.bf16.mxu0 %v7148_v23  ;;  %v7220_v23 = vld [vmem:[#allocation5 + $0x83c] ss:$40 sps:$4 sm:$0xff]  }
 0x1d6   : > { %3709 = vmatpush1.bf16.msra.mxu1 %v6978_v24  ;;  %v7067_v24 = vld [vmem:[#allocation5 + $0x46c] ss:$40 sps:$4 sm:$0xff]  }
 0x1d7   : > { %3710 = vmatprep.subr.bf16.mxu1 %v6989_v26  ;;  %v677_v26 = vlaneseq }
 0x1d8   : > { %4027 = vmatpush1.bf16.msra.mxu0 %v7146_v29  ;;  %v7218_v29 = vld [vmem:[#allocation5 + $0x838] ss:$40 sps:$4 sm:$0xff]  }
 0x1d9   : > { %3676 = vmatmul.mubr.bf16.gmra.mrb[20].mxu1 %v7897_v28  ;;  %4028 = vmatprep.subr.bf16.mxu0 %v7154_v30  ;;  %v7226_v30 = vld [vmem:[#allocation5 + $0x88c] ss:$40 sps:$4 sm:$0xff]  }
 0x1da   : > { %3711 = vmatpush1.bf16.msra.mxu1 %v6987_v32  ;;  %3685 = vmatprep.mubr.bf16.mxu1 %v7900_v31  ;;  %v7065_v32 = vld [vmem:[#allocation5 + $0x468] ss:$40 sps:$4 sm:$0xff]  }
 0x1db   : > { %3712 = vmatprep.subr.bf16.mxu1 %v6995_v33  ;;  %v7073_v33 = vld [vmem:[#allocation5 + $0x4bc] ss:$40 sps:$4 sm:$0xff]  }
 0x1dc   : > { %4029 = vmatpush1.bf16.msra.mxu0 %v7152_v35  ;;  %v7935_v35 = vshrl.u32 %v677_v26, 7 }
 0x1dd   : > { %4071 = vmatprep.subr.bf16.mxu0 %v7160_v36  ;;  %v7224_v36 = vld [vmem:[#allocation5 + $0x888] ss:$40 sps:$4 sm:$0xff]  }
 0x1de   : > { %3713 = vmatpush1.bf16.msra.mxu1 %v6993_v37  ;;  %11010 = vst [vmem:[#allocation12_spill] sm:$0xff] %v7935_v35  ;;  %v7232_v37 = vld [vmem:[#allocation5 + $0x8dc] ss:$40 sps:$4 sm:$0xff]  }
 0x1df   : > { %3714 = vmatprep.subr.bf16.mxu1 %v7004_v38  ;;  %4031 = vmatmul.mubr.bf16.vlgmr.msra.gmra.mrb[40].mxu0 %v7862_v57  ;;  %v7071_v38 = vld [vmem:[#allocation5 + $0x4b8] ss:$40 sps:$4 sm:$0xff]  }
 0x1e0   : > { %4072 = vmatpush1.bf16.msra.mxu0 %v7158_v40  ;;  %4040 = vmatprep.mubr.bf16.mxu0 %v7865_v60  ;;  %v7938_v40 = vadd.s32 128, %v7935_v35 }
 0x1e1   : > { %3686 = vmatmul.mubr.bf16.gmra.mrb[24].mxu1 %v7907_v39  ;;  %4073 = vmatprep.subr.bf16.mxu0 %v7166_v41  ;;  %v7079_v41 = vld [vmem:[#allocation5 + $0x14] ss:$40 sps:$4 sm:$0xff]  }
 0x1e2   : > { %3715 = vmatpush1.bf16.msra.mxu1 %v7002_v43  ;;  %3695 = vmatprep.mubr.bf16.mxu1 %v7910_v42  ;;  %v7941_v43 = vadd.s32 136, %v7935_v35 }
 0x1e3   : > { %3716 = vmatprep.subr.bf16.mxu1 %v7010_v44  ;;  %v7230_v44 = vld [vmem:[#allocation5 + $0x8d8] ss:$40 sps:$4 sm:$0xff]  }
 0x1e4   : > { %4074 = vmatpush1.bf16.msra.mxu0 %v7164_v45  ;;  %v7238_v45 = vld [vmem:[#allocation5 + $0x92c] ss:$40 sps:$4 sm:$0xff]  }
 0x1e5   : > { %4075 = vmatprep.subr.bf16.mxu0 %v7172_v46  ;;  %v7077_v46 = vld [vmem:[#allocation5 + $0x10] ss:$40 sps:$4 sm:$0xff]  }
 0x1e6   : > { %3717 = vmatpush1.bf16.msra.mxu1 %v7008_v47  ;;  %v758_v47 = vcvt.s32.f32 %v7938_v40 }
 0x1e7   : > { %3718 = vmatprep.subr.bf16.mxu1 %v7019_v48  ;;  %4041 = vmatmul.mubr.bf16.gmra.mrb[44].mxu0 %v7870_v3  ;;  %v679_v48 = vadd.s32 8, %v7935_v35 }
 0x1e8   : > { %4076 = vmatpush1.bf16.msra.mxu0 %v7170_v50  ;;  %4050 = vmatprep.mubr.bf16.mxu0 %v7873_v6  ;;  %v7085_v50 = vld [vmem:[#allocation5 + $0x64] ss:$40 sps:$4 sm:$0xff]  }
 0x1e9   : > { %3696 = vmatmul.mubr.bf16.gmra.mrb[28].mxu1 %v7915_v49  ;;  %4077 = vmatprep.subr.bf16.mxu0 %v7178_v51  ;;  %v759_v51 = vcvt.s32.f32 %v7941_v43 }
 0x1ea   : > { %3719 = vmatpush1.bf16.msra.mxu1 %v7017_v52  ;;  %3738 = vmatprep.mubr.bf16.mxu1 %v7851_v19  ;;  %v7035_v19 = vld [vmem:[#allocation5 + $0x2d8] ss:$40 sps:$4 sm:$0xff]   ;;  %v7236_v52 = vld [vmem:[#allocation5 + $0x928] ss:$40 sps:$4 sm:$0xff]  }
 0x1eb   : > { %3720 = vmatprep.subr.bf16.mxu1 %v7025_v53  ;;  %v7947_v53 = vadd.s32 144, %v7935_v35 }
 0x1ec   : > { %4078 = vmatpush1.bf16.msra.mxu0 %v7176_v54  ;;  %v7950_v54 = vadd.s32 152, %v7935_v35 }
 0x1ed   : > { %4079 = vmatprep.subr.bf16.mxu0 %v7184_v55  ;;  %v7244_v55 = vld [vmem:[#allocation5 + $0x97c] ss:$40 sps:$4 sm:$0xff]  }
 0x1ee   : > { %3721 = vmatpush1.bf16.msra.mxu1 %v7023_v56  ;;  %v7083_v56 = vld [vmem:[#allocation5 + $0x60] ss:$40 sps:$4 sm:$0xff]  }
 0x1ef   : > { %3722 = vmatprep.subr.bf16.mxu1 %v7031_v58  ;;  %4051 = vmatmul.mubr.bf16.gmra.mrb[48].mxu0 %v7878_v13  ;;  %v7956_v58 = vmul.f32 0.03125, %v758_v47 }
 0x1f0   : > { %4080 = vmatpush1.bf16.msra.mxu0 %v7182_v59  ;;  %4060 = vmatprep.mubr.bf16.mxu0 %v7884_v17  ;;  %v7959_v59 = vcvt.s32.f32 %v7935_v35 }
 0x1f1   : > { %4081 = vmatprep.subr.bf16.mxu0 %v7190_v61  ;;  %v7961_v61 = vcvt.s32.f32 %v679_v48 }
 0x1f2   : > { %3723 = vmatpush1.bf16.msra.mxu1 %v7029_v62  ;;  %11011 = vst [vmem:[#allocation13_spill] sm:$0xff] %v7959_v59  ;;  %v7091_v62 = vld [vmem:[#allocation5 + $0xb4] ss:$40 sps:$4 sm:$0xff]  }
 0x1f3   : > { %3724 = vmatprep.subr.bf16.mxu1 %v7037_v63  ;;  %11012 = vst [vmem:[#allocation14_spill] sm:$0xff] %v7961_v61  ;;  %v7963_v63 = vand.u32 127, %v677_v26  ;;  %v10824_v26 = vsub.s32 1, %v7935_v35 }
 0x1f4   : > { %4082 = vmatpush1.bf16.msra.mxu0 %v7188_v0  ;;  %v7242_v0 = vld [vmem:[#allocation5 + $0x978] ss:$40 sps:$4 sm:$0xff]  }
 0x1f5   : > { %4083 = vmatprep.subr.bf16.mxu0 %v7196_v1  ;;  %11013 = vst [vmem:[#allocation15_spill] sm:$0xff] %v7963_v63  ;;  %v761_v1 = vcvt.s32.f32 %v7950_v54 }
 0x1f6   : > { %3725 = vmatpush1.bf16.msra.mxu1 %v7035_v19  ;;  %v680_v19 = vadd.s32 16, %v7935_v35 }
 0x1f7   : > { %3726 = vmatprep.subr.bf16.mxu1 %v7043_v2  ;;  %4061 = vmatmul.mubr.bf16.gmra.mrb[52].mxu0 %v7894_v27  ;;  %v681_v2 = vadd.s32 24, %v7935_v35 }
 0x1f8   : > { %4084 = vmatpush1.bf16.msra.mxu0 %v7194_v4  ;;  %4103 = vmatprep.mubr.bf16.mxu0 %v7858_v25  ;;  %v7059_v25 = vld [vmem:[#allocation5 + $0x418] ss:$40 sps:$4 sm:$0xff]   ;;  %v7250_v4 = vld [vmem:[#allocation5 + $0x9cc] ss:$40 sps:$4 sm:$0xff]  }
 0x1f9   : > { %4085 = vmatprep.subr.bf16.mxu0 %v7202_v5  ;;  %v7089_v5 = vld [vmem:[#allocation5 + $0xb0] ss:$40 sps:$4 sm:$0xff]  }
 0x1fa   : > { %3727 = vmatpush1.bf16.msra.mxu1 %v7041_v7  ;;  %v10835_v7 = vfloor.f32 %v7956_v58 }
 0x1fb   : > { %3728 = vmatprep.subr.bf16.mxu1 %v7049_v8  ;;  %v7975_v8 = vmul.f32 0.03125, %v7959_v59 }
 0x1fc   : > { %4086 = vmatpush1.bf16.msra.mxu0 %v7200_v9  ;;  %v7978_v9 = vmul.f32 0.03125, %v7961_v61 }
 0x1fd   : > { %4087 = vmatprep.subr.bf16.mxu0 %v7208_v10  ;;  %v7097_v10 = vld [vmem:[#allocation5 + $0x104] ss:$40 sps:$4 sm:$0xff]  }
 0x1fe   : > { %3729 = vmatpush1.bf16.msra.mxu1 %v7047_v11  ;;  %v674_v11 = vld [vmem:[#allocation7 + $0x2c0] ss:$8 sm:$0xf] }
 0x1ff   : > { %3730 = vmatprep.subr.bf16.mxu1 %v7055_v12  ;;  %v10825_v12 = vsub.s32 0, %v7935_v35 }
 0x200   : > { %4088 = vmatpush1.bf16.msra.mxu0 %v7206_v15  ;;  %v7982_v15 = vcvt.s32.f32 %v7963_v63 }
 0x201   : > { %4089 = vmatprep.subr.bf16.mxu0 %v7214_v16 }
 0x202   : > { %3731 = vmatpush1.bf16.msra.mxu1 %v7053_v20  ;;  %11014 = vst [vmem:[#allocation16_spill] sm:$0xff] %v7982_v15  ;;  %v7248_v20 = vld [vmem:[#allocation5 + $0x9c8] ss:$40 sps:$4 sm:$0xff]  }
 0x203   : > { %3732 = vmatprep.subr.bf16.mxu1 %v7061_v21 }
 0x204   : > { %4090 = vmatpush1.bf16.msra.mxu0 %v7212_v22  ;;  %v7991_v22 = vmul.f32 0.03125, %v761_v1 }
 0x205   : > { %4091 = vmatprep.subr.bf16.mxu0 %v7220_v23  ;;  %v7993_v23 = vcvt.s32.f32 %v680_v19 }
 0x206   : > { %3733 = vmatpush1.bf16.msra.mxu1 %v7059_v25  ;;  %v7995_v25 = vcvt.s32.f32 %v681_v2 }
 0x207   : > { %3734 = vmatprep.subr.bf16.mxu1 %v7067_v24  ;;  %11015 = vst [vmem:[#allocation17_spill] sm:$0xff] %v7993_v23  ;;  %v1923_v24 = vsub.s32 2, %v7935_v35  ;;  %v8022_v48 = vmul.f32 0.03125, %v7993_v23 }
 0x208   : > { %4092 = vmatpush1.bf16.msra.mxu0 %v7218_v29  ;;  %11016 = vst [vmem:[#allocation18_spill] sm:$0xff] %v7995_v25  ;;  %v8001_v29 = vadd.s32 160, %v7935_v35 }
 0x209   : > { %4093 = vmatprep.subr.bf16.mxu0 %v7226_v30  ;;  %v7095_v30 = vld [vmem:[#allocation5 + $0x100] ss:$40 sps:$4 sm:$0xff]  }
 0x20a   : > { %3735 = vmatpush1.bf16.msra.mxu1 %v7065_v32  ;;  %v954_v32 = vmul.f32 32.0, %v10835_v7 }
 0x20b   : > { %3736 = vmatprep.subr.bf16.mxu1 %v7073_v33  ;;  %v10831_v33 = vfloor.f32 %v7975_v8 }
 0x20c   : > { %4094 = vmatpush1.bf16.msra.mxu0 %v7224_v36  ;;  %v10830_v36 = vfloor.f32 %v7978_v9  ;;  %v1018_v19 = vsub.f32 %v758_v47, %v954_v32 }
 0x20d   : > { %4095 = vmatprep.subr.bf16.mxu0 %v7232_v37  ;;  %v7103_v37 = vld [vmem:[#allocation5 + $0x154] ss:$40 sps:$4 sm:$0xff]   ;;  %v938_v2 = vmul.f32 32.0, %v10831_v33 }
 0x20e   : > { %3737 = vmatpush1.bf16.msra.mxu1 %v7071_v38  ;;  %v8013_v38 = vrot.slane %v674_v11, %v10825_v12 }
 0x20f   : > { %3852 = vmatprep.subr.bf16.mxu1 %v7079_v41 }
 0x210   : > { %4096 = vmatpush1.bf16.msra.mxu0 %v7230_v44  ;;  %11017 = vst [vmem:[#allocation19_spill] sm:$0xff] %v8013_v38  ;;  %v682_v44 = vadd.s32 32, %v7935_v35 }
 0x211   : > { %3739 = vmatmul.mubr.bf16.vlgmr.msra.gmra.mrb[32].mxu1 %v7862_v57  ;;  %4097 = vmatprep.subr.bf16.mxu0 %v7238_v45  ;;  %v7967_v57 = vmul.f32 0.03125, %v759_v51 }
 0x212   : > { %3853 = vmatpush1.bf16.msra.mxu1 %v7077_v46  ;;  %3748 = vmatprep.mubr.bf16.mxu1 %v7865_v60  ;;  %v760_v60 = vcvt.s32.f32 %v7947_v53  ;;  %v10828_v46 = vfloor.f32 %v7991_v22 }
 0x213   : > { %3854 = vmatprep.subr.bf16.mxu1 %v7085_v50  ;;  %v10834_v16 = vfloor.f32 %v7967_v57  ;;  %v8025_v50 = vmul.f32 0.03125, %v7995_v25 }
 0x214   : > { %4098 = vmatpush1.bf16.msra.mxu0 %v7236_v52  ;;  %v7987_v21 = vmul.f32 0.03125, %v760_v60  ;;  %v8027_v52 = vrot.slane %v674_v11, %v1923_v24  ;;  %v8048_v24 = vcvt.s32.f32 %v682_v44  ;;  %v957_v32 = vmul.f32 32.0, %v10828_v46 }
 0x215   : > { %4099 = vmatprep.subr.bf16.mxu0 %v7244_v55  ;;  %v955_v41 = vmul.f32 32.0, %v10834_v16  ;;  %v1927_v55 = vsub.s32 3, %v7935_v35  ;;  %v8070_v44 = vmul.f32 0.125, %v1018_v19 }
 0x216   : > { %3855 = vmatpush1.bf16.msra.mxu1 %v7083_v56  ;;  %v10829_v45 = vfloor.f32 %v7987_v21  ;;  %v10837_v56 = vcvt.s32.f32 %v8001_v29  ;;  %11019 = vst [vmem:[#allocation21_spill] sm:$0xff] %v8048_v24 }
 0x217   : > { %3856 = vmatprep.subr.bf16.mxu1 %v7091_v62  ;;  %v683_v62 = vadd.s32 40, %v7935_v35  ;;  %v1019_v40 = vsub.f32 %v759_v51, %v955_v41  ;;  %v8067_v41 = vadd.s32 176, %v7935_v35 }
 0x218   : > { %4100 = vmatpush1.bf16.msra.mxu0 %v7242_v0  ;;  %v7101_v0 = vld [vmem:[#allocation5 + $0x150] ss:$40 sps:$4 sm:$0xff]   ;;  %v8062_v43 = vmul.f32 0.03125, %v10837_v56 }
 0x219   : > { %3749 = vmatmul.mubr.bf16.gmra.mrb[36].mxu1 %v7870_v3  ;;  %4101 = vmatprep.subr.bf16.mxu0 %v7250_v4  ;;  %v8009_v3 = vadd.s32 168, %v7935_v35  ;;  %v939_v4 = vmul.f32 32.0, %v10830_v36  ;;  %v8064_v51 = vcvt.s32.f32 %v683_v62  ;;  %v8078_v62 = vmul.f32 0.125, %v1019_v40 }
 0x21a   : > { %3857 = vmatpush1.bf16.msra.mxu1 %v7089_v5  ;;  %3758 = vmatprep.mubr.bf16.mxu1 %v7873_v6  ;;  %v1196_v6 = vmul.f32 0.0625, %v7982_v15  ;;  %v10838_v33 = vfloor.f32 %v8062_v43  ;;  %v10839_v54 = vcvt.s32.f32 %v8067_v41 }
 0x21b   : > { %3858 = vmatprep.subr.bf16.mxu1 %v7097_v10  ;;  %v10836_v5 = vcvt.s32.f32 %v8009_v3  ;;  %v7109_v10 = vld [vmem:[#allocation5 + $0x1a4] ss:$40 sps:$4 sm:$0xff]   ;;  %11020 = vst [vmem:[#allocation22_spill] sm:$0xff] %v8064_v51  ;;  %v8104_v53 = vmul.f32 0.03125, %v8064_v51 }
 0x21c   : > { %4102 = vmatpush1.bf16.msra.mxu0 %v7248_v20  ;;  %v8041_v20 = vrot.slane %v674_v11, %v10824_v26  ;;  %v8046_v47 = vfloor.f32 %v1196_v6  ;;  %v10832_v26 = vfloor.f32 %v8025_v50  ;;  %v7107_v6 = vld [vmem:[#allocation5 + $0x1a0] ss:$40 sps:$4 sm:$0xff]  }
 0x21d   : > { %11023 = vst [vmem:[#allocation25_spill] sm:$0xff] %v8104_v53 }
 0x21e   : > { %3859 = vmatpush1.bf16.msra.mxu1 %v7095_v30  ;;  %11018 = vst [vmem:[#allocation20_spill] sm:$0xff] %v8041_v20  ;;  %v956_v30 = vmul.f32 32.0, %v10829_v45  ;;  %v1198_v12 = vmul.f32 16.0, %v8046_v47  ;;  %v941_v34 = vmul.f32 32.0, %v10832_v26  ;;  %v7121_v26 = vld [vmem:[#allocation5 + $0x244] ss:$40 sps:$4 sm:$0xff]  }
 0x21f   : > { %3860 = vmatprep.subr.bf16.mxu1 %v7103_v37  ;;  %4104 = vmatmul.mubr.bf16.vlgmr.msra.gmra.mrb[40].mxu0 %v7881_v14  ;;  %v10833_v37 = vfloor.f32 %v8022_v48  ;;  %v8058_v14 = vrot.slane %v674_v11, %v1927_v55  ;;  %v8076_v11 = vmul.f32 0.03125, %v10836_v5  ;;  %v7115_v55 = vld [vmem:[#allocation5 + $0x1f4] ss:$40 sps:$4 sm:$0xff]   ;;  %v7125_v5 = vld [vmem:[#allocation5 + $0x290] ss:$40 sps:$4 sm:$0xff]  }
 0x220   : > { %4113 = vmatprep.mubr.bf16.mxu0 %v7887_v18  ;;  %v1002_v18 = vsub.f32 %v7959_v59, %v938_v2 }
 0x221   : > { %3759 = vmatmul.mubr.bf16.gmra.mrb[40].mxu1 %v7878_v13  ;;  %v1003_v13 = vsub.f32 %v7961_v61, %v939_v4  ;;  %v1020_v4 = vsub.f32 %v760_v60, %v956_v30  ;;  %v940_v40 = vmul.f32 32.0, %v10833_v37  ;;  %v1005_v37 = vsub.f32 %v7995_v25, %v941_v34 }
 0x222   : > { %3861 = vmatpush1.bf16.msra.mxu1 %v7101_v0  ;;  %3768 = vmatprep.mubr.bf16.mxu1 %v7884_v17  ;;  %v8082_v0 = vmul.f32 0.03125, %v8048_v24  ;;  %v8085_v17 = vadd.s32 184, %v7935_v35  ;;  %v8110_v30 = vmul.f32 0.125, %v1002_v18  ;;  %v11035_v61 = vfloor.f32 %v8104_v53 }
 0x223   : > { %3862 = vmatprep.subr.bf16.mxu1 %v7109_v10  ;;  %v1021_v10 = vsub.f32 %v761_v1, %v957_v32  ;;  %v7113_v1 = vld [vmem:[#allocation5 + $0x1f0] ss:$40 sps:$4 sm:$0xff]   ;;  %v8112_v32 = vmul.f32 0.125, %v1003_v13  ;;  %v8122_v18 = vmul.f32 0.125, %v1020_v4  ;;  %v958_v4 = vmul.f32 32.0, %v10838_v33 }
 0x224   : > { %11021 = vst [vmem:[#allocation23_spill] sm:$0xff] %v8082_v0  ;;  %v8087_v19 = vpop.f32.mrb[0].mxu1  ;;  %v2137_v2 = vpop.f32.mrb[8].mxu0  ;;  %v10847_v7 = vfloor.f32 %v8082_v0  ;;  %v943_v59 = vmul.f32 32.0, %v11035_v61 }
 0x225   : > { %v8098_v46 = vadd.f32 %v2137_v2, %v8027_v52  ;;  %v8100_v45 = vpop.f32.mrb[1].mxu1  ;;  %v2139_v36 = vpop.f32.mrb[9].mxu0  ;;  %v10846_v2 = vfloor.f32 %v8076_v11  ;;  %v8124_v13 = vmul.f32 0.125, %v1021_v10  ;;  %v7127_v10 = vld [vmem:[#allocation5 + $0x294] ss:$40 sps:$4 sm:$0xff]  }
 0x226   : > { %v8108_v60 = vadd.f32 %v2139_v36, %v8058_v14  ;;  %3863 = vmatpush1.bf16.msra.mxu1 %v7107_v6 }
 0x227   : > { %11022 = vst [vmem:[#allocation24_spill] sm:$0xff] %v8098_v46  ;;  %3864 = vmatprep.subr.bf16.mxu1 %v7115_v55  ;;  %4114 = vmatmul.mubr.bf16.gmra.mrb[44].mxu0 %v7897_v28  ;;  %v1004_v55 = vsub.f32 %v7993_v23, %v940_v40  ;;  %v8140_v40 = vmul.f32 0.03125, %v10839_v54  ;;  %v959_v33 = vmul.f32 32.0, %v10846_v2 }
 0x228   : > { %11024 = vst [vmem:[#allocation26_spill] sm:$0xff] %v8108_v60  ;;  %v8120_v36 = vpop.f32.mrb[2].mxu1  ;;  %v2143_v6 = vpop.f32.mrb[10].mxu0  ;;  %4123 = vmatprep.mubr.bf16.mxu0 %v7900_v31  ;;  %v7119_v31 = vld [vmem:[#allocation5 + $0x240] ss:$40 sps:$4 sm:$0xff]  }
 0x229   : > { %v8130_v16 = vadd.f32 %v2143_v6, %v8027_v52  ;;  %3769 = vmatmul.mubr.bf16.gmra.mrb[44].mxu1 %v7894_v27  ;;  %v8133_v28 = vpop.f32.mrb[3].mxu1  ;;  %v2145_v56 = vpop.f32.mrb[11].mxu0  ;;  %11027 = vst [vmem:[#allocation29_spill] sm:$0xff] %v8140_v40  ;;  %v7388_v6 = vld [vmem:[%s7774_s6 + $0x4] ss:$16 sps:$4 sm:$0xff]   ;;  %v8147_v27 = vsub.f32 %v7982_v15, %v1198_v12  ;;  %v8163_v25 = vmul.f32 0.125, %v1004_v55 }
 0x22a   : > { %11026 = vst [vmem:[#allocation28_spill] sm:$0xff] %v8133_v28  ;;  %v8143_v34 = vadd.f32 %v2145_v56, %v8058_v14  ;;  %3865 = vmatpush1.bf16.msra.mxu1 %v7113_v1  ;;  %3884 = vmatprep.mubr.bf16.mxu1 %v7388_v6  ;;  %v942_v56 = vmul.f32 32.0, %v10847_v7  ;;  %v11029_v1 = vcvt.s32.f32 %v8085_v17 }
 0x22b   : > { %11025 = vst [vmem:[#allocation27_spill] sm:$0xff] %v8130_v16  ;;  %3866 = vmatprep.subr.bf16.mxu1 %v7121_v26  ;;  %v8165_v26 = vmul.f32 0.125, %v1005_v37  ;;  %v11037_v37 = vcvt.s32.f32 %v8009_v3  ;;  %v1007_v3 = vsub.f32 %v8064_v51, %v943_v59  ;;  %v7131_v16 = vld [vmem:[#allocation5 + $0x2e0] ss:$40 sps:$4 sm:$0xff]  }
 0x22c   : > { %11028 = vst [vmem:[#allocation30_spill] sm:$0xff] %v8143_v34  ;;  %v8157_v63 = vmul.f32 0.03125, %v11029_v1  ;;  %v8159_v6 = vpop.f32.mrb[4].mxu1  ;;  %v2149_v12 = vpop.f32.mrb[12].mxu0  ;;  %v11034_v1 = vcvt.s32.f32 %v8001_v29  ;;  %v685_v34 = vadd.s32 56, %v7935_v35 }
 0x22d   : > { %11031 = vst [vmem:[#allocation32_spill] sm:$0xff] %v8159_v6  ;;  %v8168_v2 = vadd.f32 %v2149_v12, %v8027_v52  ;;  %v8170_v54 = vpop.f32.mrb[5].mxu1  ;;  %v2151_v7 = vpop.f32.mrb[13].mxu0  ;;  %v1023_v12 = vsub.f32 %v11037_v37, %v959_v33  ;;  %v7133_v29 = vld [vmem:[#allocation5 + $0x2e4] ss:$40 sps:$4 sm:$0xff]   ;;  %v8198_v37 = vadd.s32 64, %v7935_v35 }
 0x22e   : > { %11030 = vst [vmem:[#allocation31_spill] sm:$0xff] %v8157_v63  ;;  %11033 = vst [vmem:[#allocation34_spill] sm:$0xff] %v8170_v54  ;;  %v1022_v23 = vsub.f32 %v11034_v1, %v958_v4  ;;  %3867 = vmatpush1.bf16.msra.mxu1 %v7119_v31  ;;  %v8178_v55 = vadd.f32 %v2151_v7, %v8058_v14  ;;  %v1006_v4 = vsub.f32 %v8048_v24, %v942_v56 }
 0x22f   : > { %11032 = vst [vmem:[#allocation33_spill] sm:$0xff] %v8168_v2  ;;  %v684_v2 = vadd.s32 48, %v7935_v35  ;;  %3868 = vmatprep.subr.bf16.mxu1 %v7127_v10  ;;  %v8187_v1 = vadd.s32 192, %v7935_v35  ;;  %v8190_v31 = vadd.s32 200, %v7935_v35  ;;  %4124 = vmatmul.mubr.bf16.gmra.mrb[48].mxu0 %v7907_v39  ;;  %v8201_v56 = vadd.s32 72, %v7935_v35 }
 0x230   : > { %11036 = vst [vmem:[#allocation35_spill] sm:$0xff] %v8178_v55  ;;  %v8193_v7 = vpop.f32.mrb[6].mxu1  ;;  %v2155_v33 = vpop.f32.mrb[14].mxu0  ;;  %4133 = vmatprep.mubr.bf16.mxu0 %v7910_v42  ;;  %v8209_v24 = vmul.f32 0.125, %v1022_v23  ;;  %v11041_v10 = vfloor.f32 %v8140_v40  ;;  %v8217_v46 = vmul.f32 0.125, %v1023_v12  ;;  %v8223_v23 = vmul.f32 0.125, %v1006_v4 }
 0x231   : > { %11038 = vst [vmem:[#allocation36_spill] sm:$0xff] %v8193_v7  ;;  %v8205_v61 = vadd.f32 %v2155_v33, %v8027_v52  ;;  %v8207_v15 = vpop.f32.mrb[7].mxu1  ;;  %v2157_v39 = vpop.f32.mrb[15].mxu0  ;;  %v8219_v42 = vcvt.s32.f32 %v684_v2  ;;  %v8221_v33 = vcvt.s32.f32 %v685_v34  ;;  %v11046_v59 = vfloor.f32 %v8157_v63  ;;  %v7137_v2 = vld [vmem:[#allocation5 + $0x330] ss:$40 sps:$4 sm:$0xff]  }
 0x232   : > { %11040 = vst [vmem:[#allocation38_spill] sm:$0xff] %v8207_v15  ;;  %v960_v55 = vmul.f32 32.0, %v11041_v10  ;;  %3869 = vmatpush1.bf16.msra.mxu1 %v7125_v5  ;;  %v8215_v60 = vadd.f32 %v2157_v39, %v8058_v14  ;;  %11045 = vst [vmem:[#allocation42_spill] sm:$0xff] %v8223_v23  ;;  %v8234_v34 = vadd.s32 208, %v7935_v35  ;;  %v11051_v12 = vcvt.s32.f32 %v8067_v41  ;;  %v7145_v5 = vld [vmem:[#allocation5 + $0x384] ss:$40 sps:$4 sm:$0xff]  }
 0x233   : > { %11039 = vst [vmem:[#allocation37_spill] sm:$0xff] %v8205_v61  ;;  %11043 = vst [vmem:[#allocation40_spill] sm:$0xff] %v8219_v42  ;;  %3870 = vmatprep.subr.bf16.mxu1 %v7133_v29  ;;  %v7139_v61 = vld [vmem:[#allocation5 + $0x334] ss:$40 sps:$4 sm:$0xff]   ;;  %v961_v51 = vmul.f32 32.0, %v11046_v59  ;;  %v8237_v29 = vadd.s32 216, %v7935_v35  ;;  %v11055_v41 = vcvt.s32.f32 %v8085_v17  ;;  %v11062_v17 = vcvt.s32.f32 %v8201_v56 }
 0x234   : > { %11042 = vst [vmem:[#allocation39_spill] sm:$0xff] %v8215_v60  ;;  %11044 = vst [vmem:[#allocation41_spill] sm:$0xff] %v8221_v33  ;;  %v8229_v15 = vpop.f32.mrb[8].mxu1  ;;  %v2161_v39 = vpop.f32.mrb[16].mxu0  ;;  %v8245_v60 = vmul.f32 0.125, %v1007_v3 }
 0x235   : > { %11047 = vst [vmem:[#allocation43_spill] sm:$0xff] %v8229_v15  ;;  %v8240_v4 = vadd.f32 %v2161_v39, %v8027_v52  ;;  %v8242_v59 = vpop.f32.mrb[9].mxu1  ;;  %v2163_v10 = vpop.f32.mrb[17].mxu0  ;;  %v1024_v15 = vsub.f32 %v11051_v12, %v960_v55  ;;  %v8254_v39 = vmul.f32 0.03125, %v8219_v42  ;;  %v1025_v55 = vsub.f32 %v11055_v41, %v961_v51 }
 0x236   : > { %11049 = vst [vmem:[#allocation45_spill] sm:$0xff] %v8242_v59  ;;  %11050 = vst [vmem:[#allocation46_spill] sm:$0xff] %v8245_v60  ;;  %3871 = vmatpush1.bf16.msra.mxu1 %v7131_v16  ;;  %v8250_v7 = vadd.f32 %v2163_v10, %v8058_v14  ;;  %v11056_v16 = vcvt.s32.f32 %v8187_v1  ;;  %v11058_v10 = vcvt.s32.f32 %v8190_v31  ;;  %v8279_v51 = vmul.f32 0.03125, %v11062_v17  ;;  %v7143_v17 = vld [vmem:[#allocation5 + $0x380] ss:$40 sps:$4 sm:$0xff]  }
 0x237   : > { %11048 = vst [vmem:[#allocation44_spill] sm:$0xff] %v8240_v4  ;;  %11053 = vst [vmem:[#allocation48_spill] sm:$0xff] %v8254_v39  ;;  %v8257_v4 = vmul.f32 0.03125, %v8221_v33  ;;  %3872 = vmatprep.subr.bf16.mxu1 %v7139_v61  ;;  %4134 = vmatmul.mubr.bf16.gmra.mrb[52].mxu0 %v7915_v49  ;;  %v11061_v61 = vcvt.s32.f32 %v8198_v37  ;;  %v8293_v28 = vmul.f32 0.125, %v1024_v15  ;;  %v8322_v15 = vadd.s32 88, %v7935_v35 }
 0x238   : > { %11052 = vst [vmem:[#allocation47_spill] sm:$0xff] %v8250_v7  ;;  %v8264_v12 = vmul.f32 0.03125, %v11056_v16  ;;  %v8268_v54 = vmul.f32 0.03125, %v11058_v10  ;;  %v8271_v7 = vpop.f32.mrb[10].mxu1  ;;  %v2167_v59 = vpop.f32.mrb[18].mxu0  ;;  %11063 = vst [vmem:[#allocation53_spill] sm:$0xff] %v8279_v51  ;;  %v8285_v10 = vadd.f32 %v8087_v19, %v8013_v38  ;;  %v8315_v19 = vadd.f32 %v8100_v45, %v8041_v20 }
 0x239   : > { %11054 = vst [vmem:[#allocation49_spill] sm:$0xff] %v8257_v4  ;;  %11060 = vst [vmem:[#allocation52_spill] sm:$0xff] %v8271_v7  ;;  %v8275_v6 = vmul.f32 0.03125, %v11061_v61  ;;  %v8288_v49 = vadd.f32 %v2167_v59, %v8027_v52  ;;  %v8290_v3 = vpop.f32.mrb[11].mxu1  ;;  %v2169_v7 = vpop.f32.mrb[19].mxu0  ;;  %v8329_v40 = vmul.f32 0.125, %v1025_v55 }
 0x23a   : > { %11057 = vst [vmem:[#allocation50_spill] sm:$0xff] %v8264_v12  ;;  %11059 = vst [vmem:[#allocation51_spill] sm:$0xff] %v8268_v54  ;;  %3873 = vmatpush1.bf16.msra.mxu1 %v7137_v2  ;;  %v8296_v41 = vadd.f32 %v2169_v7, %v8058_v14  ;;  %v11070_v2 = vcvt.s32.f32 %v8237_v29  ;;  %v8311_v7 = vadd.s32 80, %v7935_v35  ;;  %v7157_v55 = vld [vmem:[#allocation5 + $0x424] ss:$40 sps:$4 sm:$0xff]   ;;  %v11079_v45 = vfloor.f32 %v8264_v12 }
 0x23b   : > { %11064 = vst [vmem:[#allocation54_spill] sm:$0xff] %v8285_v10  ;;  %11065 = vst [vmem:[#allocation55_spill] sm:$0xff] %v8288_v49  ;;  %v11068_v10 = vcvt.s32.f32 %v8234_v34  ;;  %3874 = vmatprep.subr.bf16.mxu1 %v7145_v5  ;;  %v7151_v49 = vld [vmem:[#allocation5 + $0x3d4] ss:$40 sps:$4 sm:$0xff]   ;;  %v7149_v5 = vld [vmem:[#allocation5 + $0x3d0] ss:$40 sps:$4 sm:$0xff]  }
 0x23c   : > { %11066 = vst [vmem:[#allocation56_spill] sm:$0xff] %v8290_v3  ;;  %11067 = vst [vmem:[#allocation57_spill] sm:$0xff] %v8296_v41  ;;  %v8308_v61 = vmul.f32 0.03125, %v11070_v2  ;;  %v8317_v16 = vpop.f32.mrb[12].mxu1  ;;  %v962_v60 = vmul.f32 32.0, %v11079_v45  ;;  %v11087_v12 = vcvt.s32.f32 %v8311_v7 }
 0x23d   : > { %v8302_v59 = vmul.f32 0.03125, %v11068_v10  ;;  %11072 = vst [vmem:[#allocation60_spill] sm:$0xff] %v8315_v19  ;;  %11073 = vst [vmem:[#allocation61_spill] sm:$0xff] %v8317_v16  ;;  %v2173_v10 = vpop.f32.mrb[20].mxu0  ;;  %v8327_v41 = vpop.f32.mrb[13].mxu1  ;;  %v8333_v16 = vadd.s32 224, %v7935_v35  ;;  %v11077_v19 = vfloor.f32 %v8254_v39 }
 0x23e   : > { %11071 = vst [vmem:[#allocation59_spill] sm:$0xff] %v8308_v61  ;;  %v8325_v2 = vadd.f32 %v2173_v10, %v8027_v52  ;;  %11075 = vst [vmem:[#allocation63_spill] sm:$0xff] %v8327_v41  ;;  %v2175_v63 = vpop.f32.mrb[21].mxu0  ;;  %3875 = vmatpush1.bf16.msra.mxu1 %v7143_v17  ;;  %v11078_v10 = vfloor.f32 %v8257_v4  ;;  %v8343_v41 = vadd.s32 232, %v7935_v35  ;;  %v11080_v17 = vfloor.f32 %v8268_v54 }
 0x23f   : > { %11069 = vst [vmem:[#allocation58_spill] sm:$0xff] %v8302_v59  ;;  %v8336_v3 = vadd.f32 %v2175_v63, %v8058_v14  ;;  %v944_v20 = vmul.f32 32.0, %v11077_v19  ;;  %3876 = vmatprep.subr.bf16.mxu1 %v7151_v49  ;;  %v11082_v4 = vfloor.f32 %v8275_v6  ;;  %v11083_v49 = vfloor.f32 %v8279_v51  ;;  %v7155_v51 = vld [vmem:[#allocation5 + $0x420] ss:$40 sps:$4 sm:$0xff]  }
 0x240   : > { %11074 = vst [vmem:[#allocation62_spill] sm:$0xff] %v8325_v2  ;;  %v945_v2 = vmul.f32 32.0, %v11078_v10  ;;  %v963_v23 = vmul.f32 32.0, %v11080_v17  ;;  %v8351_v39 = vpop.f32.mrb[14].mxu1  ;;  %v2179_v19 = vpop.f32.mrb[22].mxu0  ;;  %v8368_v10 = vmul.f32 0.03125, %v11087_v12  ;;  %v11091_v12 = vcvt.s32.f32 %v8190_v31 }
 0x241   : > { %11076 = vst [vmem:[#allocation64_spill] sm:$0xff] %v8336_v3  ;;  %11081 = vst [vmem:[#allocation65_spill] sm:$0xff] %v8351_v39  ;;  %v946_v53 = vmul.f32 32.0, %v11082_v4  ;;  %v947_v0 = vmul.f32 32.0, %v11083_v49  ;;  %v8360_v54 = vadd.f32 %v2179_v19, %v8027_v52  ;;  %v8362_v17 = vpop.f32.mrb[15].mxu1  ;;  %v2181_v63 = vpop.f32.mrb[23].mxu0  ;;  %v11086_v3 = vfloor.f32 %v8302_v59 }
 0x242   : > { %11085 = vst [vmem:[#allocation67_spill] sm:$0xff] %v8362_v17  ;;  %11088 = vst [vmem:[#allocation68_spill] sm:$0xff] %v8368_v10  ;;  %3877 = vmatpush1.bf16.msra.mxu1 %v7149_v5  ;;  %v8372_v49 = vadd.f32 %v2181_v63, %v8058_v14  ;;  %v1008_v52 = vsub.f32 %v8219_v42, %v944_v20  ;;  %v1009_v19 = vsub.f32 %v8221_v33, %v945_v2 }
 0x243   : > { %11084 = vst [vmem:[#allocation66_spill] sm:$0xff] %v8360_v54  ;;  %v964_v39 = vmul.f32 32.0, %v11086_v3  ;;  %3878 = vmatprep.subr.bf16.mxu1 %v7157_v55  ;;  %v7163_v54 = vld [vmem:[#allocation5 + $0x474] ss:$40 sps:$4 sm:$0xff]   ;;  %v11090_v3 = vcvt.s32.f32 %v8187_v1  ;;  %v1027_v59 = vsub.f32 %v11091_v12, %v963_v23  ;;  %v11092_v5 = vfloor.f32 %v8308_v61 }
 0x244   : > { %11089 = vst [vmem:[#allocation69_spill] sm:$0xff] %v8372_v49  ;;  %v11093_v14 = vcvt.s32.f32 %v8322_v15  ;;  %v11095_v20 = vcvt.s32.f32 %v8198_v37  ;;  %v8391_v55 = vadd.s32 96, %v7935_v35  ;;  %v11096_v31 = vcvt.s32.f32 %v8201_v56  ;;  %v7169_v56 = vld [vmem:[#allocation5 + $0x4c4] ss:$40 sps:$4 sm:$0xff]  }
 0x245   : > { %v1026_v17 = vsub.f32 %v11090_v3, %v962_v60  ;;  %v965_v4 = vmul.f32 32.0, %v11092_v5  ;;  %v8394_v60 = vadd.s32 104, %v7935_v35  ;;  %v11097_v3 = vcvt.s32.f32 %v8234_v34 }
 0x246   : > { %v8385_v63 = vmul.f32 0.03125, %v11093_v14  ;;  %v1010_v2 = vsub.f32 %v11095_v20, %v946_v53  ;;  %v1011_v23 = vsub.f32 %v11096_v31, %v947_v0  ;;  %v11098_v5 = vcvt.s32.f32 %v8333_v16  ;;  %3879 = vmatpush1.bf16.msra.mxu1 %v7155_v51  ;;  %v7161_v14 = vld [vmem:[#allocation5 + $0x470] ss:$40 sps:$4 sm:$0xff]  }
 0x247   : > { %v1028_v12 = vsub.f32 %v11097_v3, %v964_v39  ;;  %v8407_v53 = vadd.f32 %v8120_v36, %v8013_v38  ;;  %v8409_v20 = vmul.f32 0.125, %v1008_v52  ;;  %v11101_v1 = vcvt.s32.f32 %v8343_v41  ;;  %3880 = vmatprep.subr.bf16.mxu1 %v7163_v54 }
 0x248   : > { %11094 = vst [vmem:[#allocation70_spill] sm:$0xff] %v8385_v63  ;;  %v8403_v37 = vmul.f32 0.03125, %v11098_v5  ;;  %v8416_v34 = vmul.f32 0.125, %v1009_v19  ;;  %v8418_v39 = vmul.f32 0.125, %v1026_v17  ;;  %v11103_v31 = vcvt.s32.f32 %v8237_v29 }
 0x249   : > { %11100 = vst [vmem:[#allocation72_spill] sm:$0xff] %v8407_v53  ;;  %v8413_v45 = vmul.f32 0.03125, %v11101_v1  ;;  %v10879_v51 = vfloor.f32 %v8385_v63  ;;  %v8423_v3 = vmul.f32 0.125, %v1027_v59  ;;  %v8425_v52 = vmul.f32 0.125, %v1010_v2  ;;  %v7167_v59 = vld [vmem:[#allocation5 + $0x4c0] ss:$40 sps:$4 sm:$0xff]  }
 0x24a   : > { %11099 = vst [vmem:[#allocation71_spill] sm:$0xff] %v8403_v37  ;;  %v1029_v36 = vsub.f32 %v11103_v31, %v965_v4  ;;  %v11104_v1 = vfloor.f32 %v8368_v10  ;;  %v755_v0 = vcvt.s32.f32 %v8394_v60  ;;  %v8430_v54 = vmul.f32 0.125, %v1011_v23  ;;  %3881 = vmatpush1.bf16.msra.mxu1 %v7161_v14  ;;  %v7175_v23 = vld [vmem:[#allocation5 + $0x514] ss:$40 sps:$4 sm:$0xff]  }
 0x24b   : > { %11102 = vst [vmem:[#allocation73_spill] sm:$0xff] %v8413_v45  ;;  %v8432_v19 = vmul.f32 0.125, %v1028_v12  ;;  %v11106_v29 = vcvt.s32.f32 %v8391_v55  ;;  %v8444_v60 = vadd.s32 248, %v7935_v35  ;;  %3882 = vmatprep.subr.bf16.mxu1 %v7169_v56  ;;  %v11110_v2 = vcvt.s32.f32 %v8311_v7  ;;  %v7181_v56 = vld [vmem:[#allocation5 + $0x564] ss:$40 sps:$4 sm:$0xff]  }
 0x24c   : > { %v948_v5 = vmul.f32 32.0, %v11104_v1  ;;  %v8440_v31 = vmul.f32 0.03125, %v755_v0  ;;  %v708_v1 = vadd.s32 240, %v7935_v35  ;;  %v8447_v17 = vmul.f32 0.125, %v1029_v36 }
 0x24d   : > { %11105 = vst [vmem:[#allocation74_spill] sm:$0xff] %v8432_v19  ;;  %v8437_v4 = vmul.f32 0.03125, %v11106_v29  ;;  %v949_v29 = vmul.f32 32.0, %v10879_v51  ;;  %v773_v38 = vcvt.s32.f32 %v8444_v60  ;;  %v11111_v12 = vfloor.f32 %v8403_v37  ;;  %v7173_v51 = vld [vmem:[#allocation5 + $0x510] ss:$40 sps:$4 sm:$0xff]  }
 0x24e   : > { %11108 = vst [vmem:[#allocation76_spill] sm:$0xff] %v8440_v31  ;;  %11109 = vst [vmem:[#allocation77_spill] sm:$0xff] %v8447_v17  ;;  %v1012_v33 = vsub.f32 %v11110_v2, %v948_v5  ;;  %v10883_v42 = vfloor.f32 %v8440_v31  ;;  %v772_v49 = vcvt.s32.f32 %v708_v1  ;;  %3883 = vmatpush1.bf16.msra.mxu1 %v7167_v59  ;;  %v11112_v1 = vfloor.f32 %v8413_v45 }
 0x24f   : > { %11107 = vst [vmem:[#allocation75_spill] sm:$0xff] %v8437_v4  ;;  %v10882_v14 = vfloor.f32 %v8437_v4  ;;  %v966_v63 = vmul.f32 32.0, %v11111_v12  ;;  %3925 = vmatprep.subr.bf16.mxu1 %v7175_v23  ;;  %v11114_v5 = vcvt.s32.f32 %v8322_v15  ;;  %v8477_v45 = vmul.f32 0.03125, %v773_v38  ;;  %v7179_v15 = vld [vmem:[#allocation5 + $0x560] ss:$40 sps:$4 sm:$0xff]  }
 0x250   : > { %v967_v60 = vmul.f32 32.0, %v11112_v1  ;;  %v951_v59 = vmul.f32 32.0, %v10883_v42  ;;  %v8471_v36 = vmul.f32 0.03125, %v772_v49  ;;  %v8475_v2 = vmul.f32 0.125, %v1012_v33  ;;  %v7389_v1 = vld [vmem:[%s7774_s6] ss:$16 sps:$4 sm:$0xff]  }
 0x251   : > { %v950_v12 = vmul.f32 32.0, %v10882_v14  ;;  %v1013_v7 = vsub.f32 %v11114_v5, %v949_v29  ;;  %11116 = vst [vmem:[#allocation80_spill] sm:$0xff] %v8477_v45  ;;  %v692_v23 = vadd.s32 112, %v7935_v35  ;;  %3885 = vmatmul.mubr.bf16.vlgmr.msra.gmra.mrb[48].mxu1 %v7389_v1  ;;  %v11117_v53 = vcvt.s32.f32 %v8333_v16  ;;  %v7390_v33 = vld [vmem:[%s7774_s6 + $0x24] ss:$16 sps:$4 sm:$0xff]  }
 0x252   : > { %11113 = vst [vmem:[#allocation78_spill] sm:$0xff] %v8471_v36  ;;  %11115 = vst [vmem:[#allocation79_spill] sm:$0xff] %v8475_v2  ;;  %v693_v42 = vadd.s32 120, %v7935_v35  ;;  %v8486_v31 = vadd.s32 384, %v7935_v35  ;;  %3926 = vmatpush1.bf16.msra.mxu1 %v7173_v51  ;;  %3894 = vmatprep.mubr.bf16.mxu1 %v7390_v33  ;;  %v11118_v29 = vcvt.s32.f32 %v8343_v41  ;;  %v10890_v37 = vfloor.f32 %v8477_v45  ;;  %v7395_v45 = vld [vmem:[%s7774_s6 + $0x60] ss:$16 sps:$4 sm:$0xff]  }
 0x253   : > { %v1030_v4 = vsub.f32 %v11117_v53, %v966_v63  ;;  %v756_v1 = vcvt.s32.f32 %v692_v23  ;;  %v727_v16 = vadd.s32 392, %v7935_v35  ;;  %3927 = vmatprep.subr.bf16.mxu1 %v7181_v56  ;;  %v7187_v63 = vld [vmem:[#allocation5 + $0x5b4] ss:$40 sps:$4 sm:$0xff]   ;;  %v11119_v53 = vcvt.s32.f32 %v8391_v55 }
 0x254   : > { %v1031_v5 = vsub.f32 %v11118_v29, %v967_v60  ;;  %v1015_v10 = vsub.f32 %v755_v0, %v951_v59  ;;  %v11120_v17 = vfloor.f32 %v8471_v36  ;;  %v757_v19 = vcvt.s32.f32 %v693_v42  ;;  %v7185_v0 = vld [vmem:[#allocation5 + $0x5b0] ss:$40 sps:$4 sm:$0xff]   ;;  %v7193_v59 = vld [vmem:[#allocation5 + $0x604] ss:$40 sps:$4 sm:$0xff]  }
 0x255   : > { %v1014_v14 = vsub.f32 %v11119_v53, %v950_v12  ;;  %v8497_v61 = vmul.f32 0.125, %v1013_v7  ;;  %v969_v60 = vmul.f32 32.0, %v10890_v37  ;;  %v8502_v23 = vmul.f32 0.03125, %v756_v1  ;;  %v7392_v37 = vld [vmem:[%s7774_s6 + $0x44] ss:$16 sps:$4 sm:$0xff]  }
 0x256   : > { %v968_v51 = vmul.f32 32.0, %v11120_v17  ;;  %v8504_v33 = vmul.f32 0.125, %v1030_v4  ;;  %v8506_v29 = vmul.f32 0.03125, %v757_v19  ;;  %v790_v55 = vcvt.s32.f32 %v8486_v31  ;;  %3928 = vmatpush1.bf16.msra.mxu1 %v7179_v15 }
 0x257   : > { %11121 = vst [vmem:[#allocation81_spill] sm:$0xff] %v8497_v61  ;;  %11122 = vst [vmem:[#allocation82_spill] sm:$0xff] %v8502_v23  ;;  %v8509_v42 = vmul.f32 0.125, %v1031_v5  ;;  %v1033_v17 = vsub.f32 %v773_v38, %v969_v60  ;;  %v10891_v7 = vfloor.f32 %v8502_v23  ;;  %v791_v12 = vcvt.s32.f32 %v727_v16  ;;  %3929 = vmatprep.subr.bf16.mxu1 %v7187_v63  ;;  %v7391_v60 = vld [vmem:[%s7774_s6 + $0x20] ss:$16 sps:$4 sm:$0xff]  }
 0x258   : > { %11123 = vst [vmem:[#allocation83_spill] sm:$0xff] %v8504_v33  ;;  %v1032_v56 = vsub.f32 %v772_v49, %v968_v51  ;;  %11124 = vst [vmem:[#allocation84_spill] sm:$0xff] %v8506_v29  ;;  %v8512_v53 = vmul.f32 0.125, %v1014_v14  ;;  %v8514_v4 = vmul.f32 0.125, %v1015_v10  ;;  %v10893_v49 = vfloor.f32 %v8506_v29 }
 0x259   : > { %11125 = vst [vmem:[#allocation85_spill] sm:$0xff] %v8509_v42  ;;  %v858_v51 = vmul.f32 0.03125, %v790_v55  ;;  %v8519_v15 = vmul.f32 0.125, %v1033_v17  ;;  %v952_v38 = vmul.f32 32.0, %v10891_v7  ;;  %v859_v5 = vmul.f32 0.03125, %v791_v12  ;;  %3895 = vmatmul.mubr.bf16.gmra.mrb[52].mxu1 %v7391_v60 }
 0x25a   : > { %11126 = vst [vmem:[#allocation86_spill] sm:$0xff] %v8512_v53  ;;  %11127 = vst [vmem:[#allocation87_spill] sm:$0xff] %v8514_v4  ;;  %v8517_v31 = vmul.f32 0.125, %v1032_v56  ;;  %v953_v14 = vmul.f32 32.0, %v10893_v49  ;;  %v8528_v63 = vadd.s32 256, %v7935_v35  ;;  %3930 = vmatpush1.bf16.msra.mxu1 %v7185_v0  ;;  %3904 = vmatprep.mubr.bf16.mxu1 %v7392_v37  ;;  %v711_v23 = vadd.s32 264, %v7935_v35 }
 0x25b   : > { %11129 = vst [vmem:[#allocation89_spill] sm:$0xff] %v8519_v15  ;;  %v922_v10 = vfloor.f32 %v858_v51  ;;  %v7191_v56 = vld [vmem:[#allocation5 + $0x600] ss:$40 sps:$4 sm:$0xff]   ;;  %v1016_v41 = vsub.f32 %v756_v1, %v952_v38  ;;  %v923_v7 = vfloor.f32 %v859_v5  ;;  %3931 = vmatprep.subr.bf16.mxu1 %v7193_v59  ;;  %v7199_v60 = vld [vmem:[#allocation5 + $0x654] ss:$40 sps:$4 sm:$0xff]   ;;  %v729_v37 = vadd.s32 408, %v7935_v35 }
 0x25c   : > { %11128 = vst [vmem:[#allocation88_spill] sm:$0xff] %v8517_v31  ;;  %v1017_v51 = vsub.f32 %v757_v19, %v953_v14  ;;  %v774_v38 = vcvt.s32.f32 %v8528_v63  ;;  %v775_v59 = vcvt.s32.f32 %v711_v23  ;;  %v7197_v5 = vld [vmem:[#allocation5 + $0x650] ss:$40 sps:$4 sm:$0xff]   ;;  %v728_v14 = vadd.s32 400, %v7935_v35  ;;  %v7203_v15 = vld [vmem:[#allocation5 + $0x6a0] ss:$40 sps:$4 sm:$0xff]  }
 0x25d   : > { %v986_v29 = vmul.f32 32.0, %v922_v10  ;;  %v987_v36 = vmul.f32 32.0, %v923_v7  ;;  %v8538_v17 = vmul.f32 0.125, %v1016_v41  ;;  %vm8542_vm2 = vcmp.eq.f32.partialorder %v922_v10, %v8147_v27  ;;  %v7205_v41 = vld [vmem:[#allocation5 + $0x6a4] ss:$40 sps:$4 sm:$0xff]  }
 0x25e   : > { %3932 = vmatpush1.bf16.msra.mxu1 %v7191_v56  ;;  %v8548_v0 = vmul.f32 0.125, %v1017_v51  ;;  %v842_v23 = vmul.f32 0.03125, %v774_v38  ;;  %vm8551_vm3 = vcmp.eq.f32.partialorder %v923_v7, %v8147_v27  ;;  %v793_v10 = vcvt.s32.f32 %v729_v37  ;;  %v7393_v56 = vld [vmem:[%s7774_s6 + $0x40] ss:$16 sps:$4 sm:$0xff]  }
 0x25f   : > { %11130 = vst [vmem:[#allocation90_spill] sm:$0xff] %v8538_v17  ;;  %v1050_v1 = vsub.f32 %v790_v55, %v986_v29  ;;  %v1051_v16 = vsub.f32 %v791_v12, %v987_v36  ;;  %3933 = vmatprep.subr.bf16.mxu1 %v7199_v60  ;;  %v843_v55 = vmul.f32 0.03125, %v775_v59  ;;  %v792_v12 = vcvt.s32.f32 %v728_v14  ;;  %v7211_v14 = vld [vmem:[#allocation5 + $0x6f4] ss:$40 sps:$4 sm:$0xff]   ;;  %v7209_v19 = vld [vmem:[#allocation5 + $0x6f0] ss:$40 sps:$4 sm:$0xff]  }
 0x260   : > { %11133 = vst [vmem:[#allocation91_spill] sm:$0xff] %v8548_v0  ;;  %v906_v49 = vfloor.f32 %v842_v23  ;;  %v861_v4 = vmul.f32 0.03125, %v793_v10  ;;  %v8559_v7 = vadd.s32 272, %v7935_v35  ;;  %v10902_v36 = vmov 1.0|1.0  }
 0x261   : > { %v1115_v29 = vmul.f32 0.125, %v1050_v1  ;;  %v1116_v63 = vmul.f32 0.125, %v1051_v16  ;;  %3905 = vmatmul.mubr.bf16.gmra.mrb[56].mxu1 %v7393_v56  ;;  %v907_v51 = vfloor.f32 %v843_v55  ;;  %v7394_v1 = vld [vmem:[%s7774_s6 + $0x64] ss:$16 sps:$4 sm:$0xff]   ;;  %v860_v16 = vmul.f32 0.03125, %v792_v12 }
 0x262   : > { %3934 = vmatpush1.bf16.msra.mxu1 %v7197_v5  ;;  %3914 = vmatprep.mubr.bf16.mxu1 %v7394_v1  ;;  %vm8573_vm7 = vcmp.eq.f32.partialorder %v906_v49, %v8147_v27  ;;  %v925_v55 = vfloor.f32 %v861_v4  ;;  %v8580_v1 = vadd.s32 280, %v7935_v35  ;;  %v8596_v37 = vadd.s32 416, %v7935_v35 }
 0x263   : > { %v1179_v60 = vfloor.f32 %v1115_v29  ;;  %v1180_v31 = vfloor.f32 %v1116_v63  ;;  %3935 = vmatprep.subr.bf16.mxu1 %v7205_v41  ;;  %v970_v29 = vmul.f32 32.0, %v906_v49  ;;  %v971_v5 = vmul.f32 32.0, %v907_v51  ;;  %v7229_v41 = vld [vmem:[#allocation5 + $0x7e4] ss:$40 sps:$4 sm:$0xff]  }
 0x264   : > { %v924_v23 = vfloor.f32 %v860_v16  ;;  %vm8584_vm10 = vcmp.eq.f32.partialorder %v907_v51, %v8147_v27  ;;  %v989_v16 = vmul.f32 32.0, %v925_v55  ;;  %v777_v51 = vcvt.s32.f32 %v8580_v1 }
 0x265   : > { %vm8563_vm4 = vcmp.eq.f32.partialorder %v1179_v60, %v8046_v47  ;;  %vm1313_vm5 = vcmp.eq.f32.partialorder %v1180_v31, %v8046_v47  ;;  %v1034_v63 = vsub.f32 %v774_v38, %v970_v29  ;;  %v1035_v60 = vsub.f32 %v775_v59, %v971_v5  ;;  %v7217_v59 = vld [vmem:[#allocation5 + $0x744] ss:$40 sps:$4 sm:$0xff]  }
 0x266   : > { %vm1376_vm6 = vmand %vm8542_vm2, %vm8563_vm4  ;;  %v776_v31 = vcvt.s32.f32 %v8559_v7  ;;  %3936 = vmatpush1.bf16.msra.mxu1 %v7203_v15  ;;  %v988_v4 = vmul.f32 32.0, %v924_v23  ;;  %vm8589_vm11 = vcmp.eq.f32.partialorder %v924_v23, %v8147_v27  ;;  %v1053_v5 = vsub.f32 %v793_v10, %v989_v16 }
 0x267   : > { %vm1377_vm8 = vmand %vm8551_vm3, %vm1313_vm5  ;;  %3937 = vmatprep.subr.bf16.mxu1 %v7211_v14  ;;  %v1099_v15 = vmul.f32 0.125, %v1034_v63  ;;  %v1100_v7 = vmul.f32 0.125, %v1035_v60  ;;  %v8599_v23 = vadd.s32 424, %v7935_v35  ;;  %v845_v17 = vmul.f32 0.03125, %v777_v51  ;;  %v7215_v63 = vld [vmem:[#allocation5 + $0x740] ss:$40 sps:$4 sm:$0xff]  }
 0x268   : > { %vm6551_vm9 = vmpackc.low %vm1377_vm8, %vm1376_vm6  ;;  %v844_v56 = vmul.f32 0.03125, %v776_v31  ;;  %v1052_v29 = vsub.f32 %v792_v12, %v988_v4  ;;  %v7396_v60 = vld [vmem:[%s7774_s6 + $0xc] ss:$16 sps:$4 sm:$0xff]   ;;  %v1118_v53 = vmul.f32 0.125, %v1053_v5  ;;  %v794_v12 = vcvt.s32.f32 %v8596_v37 }
 0x269   : > { %6552 = vmatprep.subr.msk.bf16.mxu0 %vm6551_vm9, %v10902_v36  ;;  %3915 = vmatmul.mubr.bf16.gmra.mrb[60].mxu1 %v7395_v45  ;;  %v1163_v14 = vfloor.f32 %v1099_v15  ;;  %v1164_v0 = vfloor.f32 %v1100_v7  ;;  %v795_v10 = vcvt.s32.f32 %v8599_v23  ;;  %v7223_v4 = vld [vmem:[#allocation5 + $0x794] ss:$40 sps:$4 sm:$0xff]   ;;  %vm8620_vm15 = vcmp.eq.f32.partialorder %v925_v55, %v8147_v27  ;;  %v7221_v55 = vld [vmem:[#allocation5 + $0x790] ss:$40 sps:$4 sm:$0xff]  }
 0x26a   : > { %v908_v36 = vfloor.f32 %v844_v56  ;;  %3938 = vmatpush1.bf16.msra.mxu1 %v7209_v19  ;;  %3957 = vmatprep.mubr.bf16.mxu1 %v7396_v60  ;;  %v1117_v1 = vmul.f32 0.125, %v1052_v29  ;;  %v909_v19 = vfloor.f32 %v845_v17  ;;  %v862_v56 = vmul.f32 0.03125, %v794_v12 }
 0x26b   : > { %3939 = vmatprep.subr.bf16.mxu1 %v7217_v59  ;;  %vm8606_vm12 = vcmp.eq.f32.partialorder %v1163_v14, %v8046_v47  ;;  %vm8611_vm13 = vcmp.eq.f32.partialorder %v1164_v0, %v8046_v47  ;;  %v1182_v59 = vfloor.f32 %v1118_v53  ;;  %v8635_v53 = vmul.f32 0.03125, %v795_v10 }
 0x26c   : > { %v972_v15 = vmul.f32 32.0, %v908_v36  ;;  %vm1360_vm14 = vmand %vm8573_vm7, %vm8606_vm12  ;;  %v1181_v37 = vfloor.f32 %v1117_v1  ;;  %v973_v17 = vmul.f32 32.0, %v909_v19  ;;  %vm8629_vm1 = vcmp.eq.f32.partialorder %v908_v36, %v8147_v27 }
 0x26d   : > { %vm1361_vm0 = vmand %vm8584_vm10, %vm8611_vm13  ;;  %v11152_v5 = vfloor.f32 %v7956_v58  ;;  %v11156_v49 = vmov 0  ;;  %v11158_v36 = vfloor.f32 %v8070_v44  ;;  %v11161_v58 = vfloor.f32 %v8078_v62 }
 0x26e   : > { %v1036_v0 = vsub.f32 %v776_v31, %v972_v15  ;;  %3940 = vmatpush1.bf16.msra.mxu1 %v7215_v63  ;;  %v11155_v31 = vfloor.f32 %v7967_v57  ;;  %v11162_v60 = vmov 0  ;;  %vm6553_vm6 = vmpackc.low %vm1361_vm0, %vm1360_vm14  ;;  %vm8671_vm8 = vcmp.eq.f32.partialorder %v1181_v37, %v8046_v47 }
 0x26f   : > { %vm8640_vm2 = vcmp.eq.f32.partialorder %v11152_v5, %v8147_v27  ;;  %vm8654_vm4 = vcmp.eq.f32.partialorder %v11158_v36, %v8046_v47  ;;  %vm8661_vm5 = vcmp.eq.f32.partialorder %v11161_v58, %v8046_v47  ;;  %vm8676_vm9 = vcmp.eq.f32.partialorder %v1182_v59, %v8046_v47  ;;  %3941 = vmatprep.subr.bf16.mxu1 %v7223_v4  ;;  %vm1378_vm7 = vmand %vm8589_vm11, %vm8671_vm8 }
 0x270   : > { %vm8647_vm3 = vcmp.eq.f32.partialorder %v11155_v31, %v8147_v27  ;;  %v11163_v60 = vsel %vm8661_vm5, 4294967295, %v11162_v60  ;;  %v926_v62 = vfloor.f32 %v862_v56  ;;  %v8681_v1 = vadd.s32 288, %v7935_v35  ;;  %vm1379_vm10 = vmand %vm8620_vm15, %vm8676_vm9 }
 0x271   : > { %v11157_v49 = vsel %vm8647_vm3, 4294967295, %v11156_v49  ;;  %v11168_v45 = vmov 1.0|1.0   ;;  %v1037_v16 = vsub.f32 %v777_v51, %v973_v17  ;;  %v1101_v15 = vmul.f32 0.125, %v1036_v0  ;;  %vm6555_vm0 = vmpackc.low %vm1379_vm10, %vm1378_vm7 }
 0x272   : > { %6554 = vmatpush3.bf16.msk.msra.mxu0 %vm6553_vm6, %v11168_v45  ;;  %v927_v37 = vfloor.f32 %v8635_v53  ;;  %v8690_v59 = vadd.s32 296, %v7935_v35  ;;  %vm8697_vm12 = vcmp.eq.f32.partialorder %v909_v19, %v8147_v27  ;;  %v990_v56 = vmul.f32 32.0, %v926_v62  ;;  %3942 = vmatpush1.bf16.msra.mxu1 %v7221_v55 }
 0x273   : > { %v10906_v38 = vcvt.s32.f32 %v8681_v1  ;;  %v8703_v51 = vadd.s32 432, %v7935_v35  ;;  %v11171_v17 = vfloor.f32 %v7975_v8  ;;  %v11172_v0 = vmov 0  ;;  %6556 = vmatprep.subr.msk.bf16.mxu0 %vm6555_vm0, %v11168_v45  ;;  %3943 = vmatprep.subr.bf16.mxu1 %v7229_v41 }
 0x274   : > { %v11174_v7 = vfloor.f32 %v7978_v9  ;;  %v11175_v19 = vmov 0  ;;  %v11177_v53 = vfloor.f32 %v8110_v30  ;;  %v11178_v5 = vmov 0  ;;  %v7227_v30 = vld [vmem:[#allocation5 + $0x7e0] ss:$40 sps:$4 sm:$0xff]  }
 0x275   : > { %vm8708_vm11 = vcmp.eq.f32.partialorder %v11171_v17, %v8147_v27  ;;  %v11180_v8 = vfloor.f32 %v8112_v32  ;;  %v11181_v31 = vmov 0  ;;  %v1102_v9 = vmul.f32 0.125, %v1037_v16 }
 0x276   : > { %v11173_v0 = vsel %vm8708_vm11, 4294967295, %v11172_v0  ;;  %vm8715_vm13 = vcmp.eq.f32.partialorder %v11174_v7, %v8147_v27  ;;  %vm8722_vm14 = vcmp.eq.f32.partialorder %v11177_v53, %v8046_v47  ;;  %v1165_v36 = vfloor.f32 %v1101_v15  ;;  %v8759_v7 = vpop.f32.mrb[24].mxu0  ;;  %v7235_v53 = vld [vmem:[#allocation5 + $0x834] ss:$40 sps:$4 sm:$0xff]   ;;  %3944 = vmatpush1.bf16.msra.mxu1 %v7227_v30 }
 0x277   : > { %v11176_v19 = vsel %vm8715_vm13, 4294967295, %v11175_v19  ;;  %v11179_v5 = vsel %vm8722_vm14, 4294967295, %v11178_v5  ;;  %vm8729_vm15 = vcmp.eq.f32.partialorder %v11180_v8, %v8046_v47  ;;  %v991_v58 = vmul.f32 32.0, %v927_v37  ;;  %11191 = vst [vmem:[#allocation92_spill] sm:$0xff] %v8759_v7  ;;  %3945 = vmatprep.subr.bf16.mxu1 %v7235_v53 }
 0x278   : > { %v11182_v31 = vsel %vm8729_vm15, 4294967295, %v11181_v31  ;;  %vm8734_vm6 = vcmp.eq.f32.partialorder %v926_v62, %v8147_v27  ;;  %v11185_v44 = vfloor.f32 %v7987_v21  ;;  %v11186_v32 = vmov 0 }
 0x279   : > { %v11188_v17 = vfloor.f32 %v8122_v18  ;;  %v11189_v16 = vmov 0  ;;  %v1054_v62 = vsub.f32 %v794_v12, %v990_v56  ;;  %v10909_v55 = vcvt.s32.f32 %v8690_v59 }
 0x27a   : > { %vm8741_vm8 = vcmp.eq.f32.partialorder %v11185_v44, %v8147_v27  ;;  %v846_v15 = vmul.f32 0.03125, %v10906_v38  ;;  %v8757_v21 = vadd.s32 440, %v7935_v35  ;;  %v11192_v18 = vfloor.f32 %v7991_v22 }
 0x27b   : > { %v11187_v32 = vsel %vm8741_vm8, 4294967295, %v11186_v32  ;;  %vm8748_vm9 = vcmp.eq.f32.partialorder %v11188_v17, %v8046_v47  ;;  %v11193_v8 = vmov 0  ;;  %v11195_v12 = vfloor.f32 %v8124_v13 }
 0x27c   : > { %v11190_v16 = vsel %vm8748_vm9, 4294967295, %v11189_v16  ;;  %vm8764_vm7 = vcmp.eq.f32.partialorder %v11192_v18, %v8147_v27  ;;  %v11196_v56 = vmov 0  ;;  %v1166_v44 = vfloor.f32 %v1102_v9  ;;  %v8783_v18 = vpop.f32.mrb[25].mxu0 }
 0x27d   : > { %v11194_v8 = vsel %vm8764_vm7, 4294967295, %v11193_v8  ;;  %vm8771_vm10 = vcmp.eq.f32.partialorder %v11195_v12, %v8046_v47  ;;  %vm8776_vm0 = vcmp.eq.f32.partialorder %v1165_v36, %v8046_v47  ;;  %v1055_v22 = vsub.f32 %v795_v10, %v991_v58  ;;  %11200 = vst [vmem:[#allocation93_spill] sm:$0xff] %v8783_v18  ;;  %v8792_v38 = vpop.f32.mrb[26].mxu0 }
 0x27e   : > { %v11197_v56 = vsel %vm8771_vm10, 4294967295, %v11196_v56  ;;  %v10915_v41 = vcvt.s32.f32 %v8703_v51  ;;  %v1119_v13 = vmul.f32 0.125, %v1054_v62  ;;  %v847_v9 = vmul.f32 0.03125, %v10909_v55  ;;  %11201 = vst [vmem:[#allocation94_spill] sm:$0xff] %v8792_v38  ;;  %v8834_v12 = vpop.f32.mrb[27].mxu0 }
 0x27f   : > { %v910_v36 = vfloor.f32 %v846_v15  ;;  %v11202_v23 = vfloor.f32 %v8022_v48  ;;  %v11203_v10 = vmov 0  ;;  %v11205_v58 = vfloor.f32 %v8025_v50  ;;  %11218 = vst [vmem:[#allocation95_spill] sm:$0xff] %v8834_v12  ;;  %v8955_v61 = vpop.f32.mrb[28].mxu0 }
 0x280   : > { %v11206_v62 = vmov 0  ;;  %v11208_v15 = vfloor.f32 %v8163_v25  ;;  %v11209_v55 = vmov 0  ;;  %v11211_v48 = vfloor.f32 %v8165_v26  ;;  %v7233_v26 = vld [vmem:[#allocation5 + $0x830] ss:$40 sps:$4 sm:$0xff]  }
 0x281   : > { %vm8797_vm10 = vcmp.eq.f32.partialorder %v11202_v23, %v8147_v27  ;;  %vm8804_vm7 = vcmp.eq.f32.partialorder %v11205_v58, %v8147_v27  ;;  %v11212_v23 = vmov 0  ;;  %v1120_v58 = vmul.f32 0.125, %v1055_v22  ;;  %3946 = vmatpush1.bf16.msra.mxu1 %v7233_v26  ;;  %v11262_v26 = vld [vmem:[#allocation29_spill] sm:$0xff] }
 0x282   : > { %v11204_v10 = vsel %vm8797_vm10, 4294967295, %v11203_v10  ;;  %v11207_v62 = vsel %vm8804_vm7, 4294967295, %v11206_v62  ;;  %vm8811_vm8 = vcmp.eq.f32.partialorder %v11208_v15, %v8046_v47  ;;  %vm8818_vm9 = vcmp.eq.f32.partialorder %v11211_v48, %v8046_v47 }
 0x283   : > { %v11210_v55 = vsel %vm8811_vm8, 4294967295, %v11209_v55  ;;  %v11213_v23 = vsel %vm8818_vm9, 4294967295, %v11212_v23  ;;  %vm8823_vm10 = vcmp.eq.f32.partialorder %v1166_v44, %v8046_v47  ;;  %vm8828_vm7 = vcmp.eq.f32.partialorder %v927_v37, %v8147_v27 }
 0x284   : > { %v864_v15 = vmul.f32 0.03125, %v10915_v41  ;;  %v11219_v48 = vfloor.f32 %v8062_v43  ;;  %v11220_v44 = vmov 0  ;;  %v11222_v37 = vfloor.f32 %v8076_v11 }
 0x285   : > { %v11223_v22 = vmov 0  ;;  %v11226_v41 = vfloor.f32 %v8209_v24  ;;  %v11227_v30 = vmov 0  ;;  %v11229_v43 = vfloor.f32 %v8217_v46 }
 0x286   : > { %vm8839_vm9 = vcmp.eq.f32.partialorder %v11219_v48, %v8147_v27  ;;  %vm8846_vm8 = vcmp.eq.f32.partialorder %v11222_v37, %v8147_v27  ;;  %v11230_v48 = vmov 0  ;;  %v1183_v11 = vfloor.f32 %v1119_v13 }
 0x287   : > { %v11221_v44 = vsel %vm8839_vm9, 4294967295, %v11220_v44  ;;  %v11224_v22 = vsel %vm8846_vm8, 4294967295, %v11223_v22  ;;  %vm8853_vm13 = vcmp.eq.f32.partialorder %v11226_v41, %v8046_v47  ;;  %vm8860_vm15 = vcmp.eq.f32.partialorder %v11229_v43, %v8046_v47  ;;  %vm1363_vm9 = vmand %vm8697_vm12, %vm8823_vm10  ;;  %v7241_v41 = vld [vmem:[#allocation5 + $0x884] ss:$40 sps:$4 sm:$0xff]  }
 0x288   : > { %11225 = vst [vmem:[#allocation96_spill] sm:$0xff] %v11224_v22  ;;  %v11228_v30 = vsel %vm8853_vm13, 4294967295, %v11227_v30  ;;  %v11231_v48 = vsel %vm8860_vm15, 4294967295, %v11230_v48  ;;  %v911_v37 = vfloor.f32 %v847_v9  ;;  %v974_v12 = vmul.f32 32.0, %v910_v36  ;;  %vm11233_vm8 = vmand %vm8629_vm1, %vm8776_vm0  ;;  %3947 = vmatprep.subr.bf16.mxu1 %v7241_v41 }
 0x289   : > { %11232 = vst [vmem:[#allocation97_spill] sm:$0xff] %v11231_v48  ;;  %v8869_v24 = vadd.s32 304, %v7935_v35  ;;  %vm6557_vm13 = vmpackc.low %vm1363_vm9, %vm11233_vm8  ;;  %v1184_v46 = vfloor.f32 %v1120_v58  ;;  %v11234_v50 = vcvt.s32.f32 %v8757_v21  ;;  %v928_v4 = vfloor.f32 %v864_v15  ;;  %v11240_v15 = vld [vmem:[#allocation23_spill] sm:$0xff] }
 0x28a   : > { %v8881_v13 = vadd.s32 312, %v7935_v35  ;;  %6558 = vmatpush3.bf16.msk.msra.mxu0 %vm6557_vm13, %v11168_v45  ;;  %vm8885_vm12 = vcmp.eq.f32.partialorder %v1183_v11, %v8046_v47  ;;  %v975_v29 = vmul.f32 32.0, %v911_v37  ;;  %v11237_v17 = vcvt.s32.f32 %v8681_v1  ;;  %11261 = vst [vmem:[#allocation23_spill] sm:$0xff] %v8955_v61 }
 0x28b   : > { %v8878_v43 = vmul.f32 0.03125, %v11234_v50  ;;  %vm8892_vm1 = vcmp.eq.f32.partialorder %v910_v36, %v8147_v27  ;;  %v11241_v11 = vfloor.f32 %v11240_v15  ;;  %v11242_v1 = vmov 0  ;;  %v11244_v36 = vld [vmem:[#allocation25_spill] sm:$0xff]  ;;  %v11252_v15 = vld [vmem:[#allocation46_spill] sm:$0xff] }
 0x28c   : > { %v1038_v9 = vsub.f32 %v11237_v17, %v974_v12  ;;  %v11245_v12 = vfloor.f32 %v11244_v36  ;;  %v11246_v50 = vmov 0  ;;  %v11248_v17 = vld [vmem:[#allocation42_spill] sm:$0xff]  ;;  %v11250_v18 = vmov 0 }
 0x28d   : > { %vm8907_vm9 = vcmp.eq.f32.partialorder %v11241_v11, %v8147_v27  ;;  %v11249_v38 = vfloor.f32 %v11248_v17  ;;  %v11253_v11 = vfloor.f32 %v11252_v15  ;;  %v11254_v7 = vmov 0  ;;  %v7239_v15 = vld [vmem:[#allocation5 + $0x880] ss:$40 sps:$4 sm:$0xff]  }
 0x28e   : > { %v11243_v1 = vsel %vm8907_vm9, 4294967295, %v11242_v1  ;;  %vm8914_vm10 = vcmp.eq.f32.partialorder %v11245_v12, %v8147_v27  ;;  %vm8933_vm8 = vcmp.eq.f32.partialorder %v1184_v46, %v8046_v47  ;;  %vm8942_vm9 = vcmp.eq.f32.partialorder %v911_v37, %v8147_v27  ;;  %3948 = vmatpush1.bf16.msra.mxu1 %v7239_v15 }
 0x28f   : > { %v11247_v50 = vsel %vm8914_vm10, 4294967295, %v11246_v50  ;;  %vm8921_vm0 = vcmp.eq.f32.partialorder %v11249_v38, %v8046_v47  ;;  %vm8928_vm13 = vcmp.eq.f32.partialorder %v11253_v11, %v8046_v47  ;;  %v929_v12 = vfloor.f32 %v8878_v43  ;;  %v7247_v43 = vld [vmem:[#allocation5 + $0x8d4] ss:$40 sps:$4 sm:$0xff]  }
 0x290   : > { %v11251_v18 = vsel %vm8921_vm0, 4294967295, %v11250_v18  ;;  %v11255_v7 = vsel %vm8928_vm13, 4294967295, %v11254_v7  ;;  %v992_v17 = vmul.f32 32.0, %v928_v4  ;;  %vm1381_vm13 = vmand %vm8828_vm7, %vm8933_vm8  ;;  %v11260_v46 = vcvt.s32.f32 %v8690_v59  ;;  %3949 = vmatprep.subr.bf16.mxu1 %v7247_v43  ;;  %v7251_v43 = vld [vmem:[#allocation5 + $0x920] ss:$40 sps:$4 sm:$0xff]   ;;  %v11357_v38 = vld [vmem:[#allocation58_spill] sm:$0xff] }
 0x291   : > { %v1103_v42 = vmul.f32 0.125, %v1038_v9  ;;  %v10933_v33 = vcvt.s32.f32 %v8869_v24  ;;  %v10935_v37 = vcvt.s32.f32 %v8881_v13  ;;  %v11263_v2 = vfloor.f32 %v11262_v26  ;;  %vm11269_vm8 = vmand %vm8734_vm6, %vm8885_vm12  ;;  %v11410_v9 = vld [vmem:[#allocation70_spill] sm:$0xff] }
 0x292   : > { %v1039_v11 = vsub.f32 %v11260_v46, %v975_v29  ;;  %v11264_v36 = vmov 0  ;;  %v11266_v59 = vfloor.f32 %v8293_v28  ;;  %v11267_v25 = vmov 0  ;;  %vm6559_vm0 = vmpackc.low %vm1381_vm13, %vm11269_vm8  ;;  %v8986_v46 = vpop.f32.mrb[29].mxu0 }
 0x293   : > { %vm8960_vm10 = vcmp.eq.f32.partialorder %v11263_v2, %v8147_v27  ;;  %v993_v41 = vmul.f32 32.0, %v929_v12  ;;  %v11270_v29 = vcvt.s32.f32 %v8703_v51  ;;  %vm8979_vm5 = vcmp.eq.f32.partialorder %v928_v4, %v8147_v27  ;;  %11273 = vst [vmem:[#allocation25_spill] sm:$0xff] %v8986_v46  ;;  %v11276_v51 = vld [vmem:[#allocation31_spill] sm:$0xff]  ;;  %6560 = vmatprep.subr.msk.bf16.mxu0 %vm6559_vm0, %v11168_v45 }
 0x294   : > { %v11265_v36 = vsel %vm8960_vm10, 4294967295, %v11264_v36  ;;  %vm8967_vm7 = vcmp.eq.f32.partialorder %v11266_v59, %v8046_v47  ;;  %v8984_v28 = vadd.s32 448, %v7935_v35  ;;  %v11277_v57 = vfloor.f32 %v11276_v51 }
 0x295   : > { %v11268_v25 = vsel %vm8967_vm7, 4294967295, %v11267_v25  ;;  %v1056_v2 = vsub.f32 %v11270_v29, %v992_v17  ;;  %v11278_v4 = vmov 0  ;;  %v11280_v53 = vfloor.f32 %v8329_v40  ;;  %v11286_v40 = vld [vmem:[#allocation48_spill] sm:$0xff] }
 0x296   : > { %vm8999_vm10 = vcmp.eq.f32.partialorder %v11277_v57, %v8147_v27  ;;  %v11281_v17 = vmov 0  ;;  %v1104_v26 = vmul.f32 0.125, %v1039_v11  ;;  %v1167_v59 = vfloor.f32 %v1103_v42  ;;  %v9017_v57 = vpop.f32.mrb[30].mxu0  ;;  %v11291_v42 = vld [vmem:[#allocation49_spill] sm:$0xff] }
 0x297   : > { %v11279_v4 = vsel %vm8999_vm10, 4294967295, %v11278_v4  ;;  %vm9006_vm7 = vcmp.eq.f32.partialorder %v11280_v53, %v8046_v47  ;;  %v848_v29 = vmul.f32 0.03125, %v10933_v33  ;;  %v9015_v51 = vmul.f32 0.03125, %v10935_v37  ;;  %11283 = vst [vmem:[#allocation42_spill] sm:$0xff] %v9017_v57 }
 0x298   : > { %v11282_v17 = vsel %vm9006_vm7, 4294967295, %v11281_v17  ;;  %v11287_v53 = vfloor.f32 %v11286_v40  ;;  %v11288_v11 = vmov 0  ;;  %v11292_v33 = vfloor.f32 %v11291_v42 }
 0x299   : > { %v11293_v37 = vmov 0  ;;  %v11296_v57 = vfloor.f32 %v8409_v20  ;;  %v11297_v46 = vmov 0  ;;  %v11299_v40 = vfloor.f32 %v8416_v34  ;;  %v11306_v34 = vld [vmem:[#allocation50_spill] sm:$0xff] }
 0x29a   : > { %vm9026_vm0 = vcmp.eq.f32.partialorder %v11287_v53, %v8147_v27  ;;  %vm9033_vm7 = vcmp.eq.f32.partialorder %v11292_v33, %v8147_v27  ;;  %v11300_v53 = vmov 0  ;;  %v11302_v42 = vcvt.s32.f32 %v8757_v21 }
 0x29b   : > { %v11289_v11 = vsel %vm9026_vm0, 4294967295, %v11288_v11  ;;  %v11294_v37 = vsel %vm9033_vm7, 4294967295, %v11293_v37  ;;  %vm9040_vm12 = vcmp.eq.f32.partialorder %v11296_v57, %v8046_v47  ;;  %vm9047_vm10 = vcmp.eq.f32.partialorder %v11299_v40, %v8046_v47  ;;  %v9057_v57 = vpop.f32.mrb[31].mxu0 }
 0x29c   : > { %11290 = vst [vmem:[#allocation46_spill] sm:$0xff] %v11289_v11  ;;  %11295 = vst [vmem:[#allocation29_spill] sm:$0xff] %v11294_v37  ;;  %v11298_v46 = vsel %vm9040_vm12, 4294967295, %v11297_v46  ;;  %v11301_v53 = vsel %vm9047_vm10, 4294967295, %v11300_v53  ;;  %v1057_v33 = vsub.f32 %v11302_v42, %v993_v41  ;;  %v1121_v61 = vmul.f32 0.125, %v1056_v2  ;;  %v11310_v41 = vld [vmem:[#allocation51_spill] sm:$0xff] }
 0x29d   : > { %v9054_v37 = vadd.s32 456, %v7935_v35  ;;  %11303 = vst [vmem:[#allocation31_spill] sm:$0xff] %v9057_v57  ;;  %v7245_v11 = vld [vmem:[#allocation5 + $0x8d0] ss:$40 sps:$4 sm:$0xff]   ;;  %v11307_v40 = vfloor.f32 %v11306_v34  ;;  %v11308_v21 = vmov 0  ;;  %v11311_v2 = vfloor.f32 %v11310_v41 }
 0x29e   : > { %v11312_v42 = vmov 0  ;;  %v11315_v15 = vfloor.f32 %v8418_v39  ;;  %v11316_v20 = vmov 0  ;;  %v11318_v34 = vfloor.f32 %v8423_v3  ;;  %3950 = vmatpush1.bf16.msra.mxu1 %v7245_v11 }
 0x29f   : > { %vm9066_vm10 = vcmp.eq.f32.partialorder %v11307_v40, %v8147_v27  ;;  %vm9073_vm8 = vcmp.eq.f32.partialorder %v11311_v2, %v8147_v27  ;;  %v11319_v40 = vmov 0  ;;  %v1168_v57 = vfloor.f32 %v1104_v26 }
 0x2a0   : > { %v11309_v21 = vsel %vm9066_vm10, 4294967295, %v11308_v21  ;;  %v11313_v42 = vsel %vm9073_vm8, 4294967295, %v11312_v42  ;;  %vm9080_vm6 = vcmp.eq.f32.partialorder %v11315_v15, %v8046_v47  ;;  %vm9087_vm12 = vcmp.eq.f32.partialorder %v11318_v34, %v8046_v47  ;;  %v7253_v15 = vld [vmem:[#allocation5 + $0x924] ss:$40 sps:$4 sm:$0xff]  }
 0x2a1   : > { %11314 = vst [vmem:[#allocation48_spill] sm:$0xff] %v11313_v42  ;;  %v11317_v20 = vsel %vm9080_vm6, 4294967295, %v11316_v20  ;;  %v11320_v40 = vsel %vm9087_vm12, 4294967295, %v11319_v40  ;;  %vm9092_vm10 = vcmp.eq.f32.partialorder %v1167_v59, %v8046_v47  ;;  %v912_v2 = vfloor.f32 %v848_v29  ;;  %3951 = vmatprep.subr.bf16.mxu1 %v7253_v15 }
 0x2a2   : > { %11321 = vst [vmem:[#allocation49_spill] sm:$0xff] %v11320_v40  ;;  %v913_v39 = vfloor.f32 %v9015_v51  ;;  %v1122_v3 = vmul.f32 0.125, %v1057_v33  ;;  %v1185_v34 = vfloor.f32 %v1121_v61  ;;  %v11324_v26 = vcvt.s32.f32 %v8984_v28  ;;  %v11399_v61 = vld [vmem:[#allocation79_spill] sm:$0xff]  ;;  %3952 = vmatpush1.bf16.msra.mxu1 %v7251_v43 }
 0x2a3   : > { %vm9113_vm11 = vcmp.eq.f32.partialorder %v1168_v57, %v8046_v47  ;;  %vm9118_vm8 = vcmp.eq.f32.partialorder %v929_v12, %v8147_v27  ;;  %v976_v29 = vmul.f32 32.0, %v912_v2  ;;  %v11336_v33 = vfloor.f32 %v8275_v6  ;;  %v11340_v57 = vld [vmem:[#allocation53_spill] sm:$0xff] }
 0x2a4   : > { %v866_v59 = vmul.f32 0.03125, %v11324_v26  ;;  %v977_v51 = vmul.f32 32.0, %v913_v39  ;;  %v11337_v12 = vmov 0  ;;  %v11341_v26 = vfloor.f32 %v11340_v57 }
 0x2a5   : > { %vm9133_vm13 = vcmp.eq.f32.partialorder %v11336_v33, %v8147_v27  ;;  %v11342_v42 = vmov 0  ;;  %v11345_v48 = vfloor.f32 %v8425_v52  ;;  %v11346_v22 = vmov 0 }
 0x2a6   : > { %v11338_v12 = vsel %vm9133_vm13, 4294967295, %v11337_v12  ;;  %vm9140_vm6 = vcmp.eq.f32.partialorder %v11341_v26, %v8147_v27  ;;  %v11348_v6 = vfloor.f32 %v8430_v54  ;;  %v11349_v33 = vmov 0  ;;  %vm1365_vm13 = vmand %vm8942_vm9, %vm9113_vm11 }
 0x2a7   : > { %11339 = vst [vmem:[#allocation50_spill] sm:$0xff] %v11338_v12  ;;  %v11343_v42 = vsel %vm9140_vm6, 4294967295, %v11342_v42  ;;  %vm9147_vm12 = vcmp.eq.f32.partialorder %v11345_v48, %v8046_v47  ;;  %v1186_v57 = vfloor.f32 %v1122_v3  ;;  %vm9163_vm6 = vcmp.eq.f32.partialorder %v1185_v34, %v8046_v47  ;;  %v11362_v34 = vld [vmem:[#allocation59_spill] sm:$0xff] }
 0x2a8   : > { %11344 = vst [vmem:[#allocation51_spill] sm:$0xff] %v11343_v42  ;;  %v11347_v22 = vsel %vm9147_vm12, 4294967295, %v11346_v22  ;;  %vm9154_vm0 = vcmp.eq.f32.partialorder %v11348_v6, %v8046_v47  ;;  %vm9168_vm12 = vcmp.eq.f32.partialorder %v912_v2, %v8147_v27  ;;  %v11354_v48 = vmov 0 }
 0x2a9   : > { %v11350_v33 = vsel %vm9154_vm0, 4294967295, %v11349_v33  ;;  %v11355_v48 = vsel %vm9168_vm12, 4294967295, %v11354_v48  ;;  %v11356_v54 = vcvt.s32.f32 %v9054_v37  ;;  %v11358_v6 = vfloor.f32 %v11357_v38  ;;  %v11371_v38 = vld [vmem:[#allocation77_spill] sm:$0xff] }
 0x2aa   : > { %11351 = vst [vmem:[#allocation53_spill] sm:$0xff] %v11350_v33  ;;  %v11359_v3 = vmov 0  ;;  %v11363_v42 = vfloor.f32 %v11362_v34  ;;  %v11364_v2 = vmov 0  ;;  %v11367_v33 = vld [vmem:[#allocation74_spill] sm:$0xff]  ;;  %v11369_v11 = vmov 0 }
 0x2ab   : > { %v9174_v26 = vmul.f32 0.03125, %v11356_v54  ;;  %vm9179_vm11 = vcmp.eq.f32.partialorder %v11358_v6, %v8147_v27  ;;  %v11368_v54 = vfloor.f32 %v11367_v33  ;;  %v11372_v6 = vfloor.f32 %v11371_v38  ;;  %v9216_v38 = vpop.f32.mrb[32].mxu0 }
 0x2ac   : > { %v11360_v3 = vsel %vm9179_vm11, 4294967295, %v11359_v3  ;;  %vm9186_vm9 = vcmp.eq.f32.partialorder %v11363_v42, %v8147_v27  ;;  %v11373_v12 = vmov 0  ;;  %vm11375_vm11 = vmand %vm8892_vm1, %vm9092_vm10  ;;  %v11376_v42 = vcvt.s32.f32 %v8869_v24  ;;  %11378 = vst [vmem:[#allocation74_spill] sm:$0xff] %v9216_v38  ;;  %v9235_v15 = vpop.f32.mrb[33].mxu0 }
 0x2ad   : > { %11361 = vst [vmem:[#allocation58_spill] sm:$0xff] %v11360_v3  ;;  %v11365_v2 = vsel %vm9186_vm9, 4294967295, %v11364_v2  ;;  %vm9193_vm0 = vcmp.eq.f32.partialorder %v11368_v54, %v8046_v47  ;;  %vm9200_vm15 = vcmp.eq.f32.partialorder %v11372_v6, %v8046_v47  ;;  %vm6561_vm9 = vmpackc.low %vm1365_vm13, %vm11375_vm11  ;;  %v11377_v34 = vcvt.s32.f32 %v8881_v13  ;;  %v7256_v6 = vld [vmem:[#allocation5 + $0x974] ss:$40 sps:$4 sm:$0xff]  }
 0x2ae   : > { %11366 = vst [vmem:[#allocation59_spill] sm:$0xff] %v11365_v2  ;;  %v11370_v11 = vsel %vm9193_vm0, 4294967295, %v11369_v11  ;;  %v11374_v12 = vsel %vm9200_vm15, 4294967295, %v11373_v12  ;;  %v1040_v33 = vsub.f32 %v11376_v42, %v976_v29  ;;  %v930_v2 = vfloor.f32 %v866_v59  ;;  %6562 = vmatpush3.bf16.msk.msra.mxu0 %vm6561_vm9, %v11168_v45  ;;  %11381 = vst [vmem:[#allocation77_spill] sm:$0xff] %v9235_v15  ;;  %v9268_v29 = vpop.f32.mrb[34].mxu0  ;;  %3953 = vmatprep.subr.bf16.mxu1 %v7256_v6 }
 0x2af   : > { %v1041_v54 = vsub.f32 %v11377_v34, %v977_v51  ;;  %v9214_v3 = vadd.s32 320, %v7935_v35  ;;  %vm9220_vm15 = vcmp.eq.f32.partialorder %v1186_v57, %v8046_v47  ;;  %v931_v24 = vfloor.f32 %v9174_v26  ;;  %vm11382_vm10 = vmand %vm8640_vm2, %vm8654_vm4  ;;  %11394 = vst [vmem:[#allocation98_spill] sm:$0xff] %v9268_v29  ;;  %v11395_v51 = vld [vmem:[#allocation68_spill] sm:$0xff] }
 0x2b0   : > { %v9230_v13 = vadd.s32 328, %v7935_v35  ;;  %v9233_v41 = vadd.s32 464, %v7935_v35  ;;  %vm11383_vm13 = vnez %v11157_v49  ;;  %vm11384_vm11 = vnez %v11163_v60  ;;  %vm1383_vm2 = vmand %vm9118_vm8, %vm9220_vm15 }
 0x2b1   : > { %vm11385_vm9 = vmand %vm11383_vm13, %vm11384_vm11  ;;  %v11386_v59 = vmov 0  ;;  %v1105_v14 = vmul.f32 0.125, %v1040_v33  ;;  %v1106_v49 = vmul.f32 0.125, %v1041_v54  ;;  %vm9264_vm4 = vcmp.eq.f32.partialorder %v913_v39, %v8147_v27 }
 0x2b2   : > { %vm9247_vm1 = vmpackc.low %vm11385_vm9, %vm11382_vm10  ;;  %v994_v60 = vmul.f32 32.0, %v930_v2  ;;  %v11396_v57 = vfloor.f32 %v11395_v51  ;;  %v11397_v26 = vmov 0  ;;  %v11400_v42 = vfloor.f32 %v11399_v61  ;;  %v9296_v51 = vpop.f32.mrb[35].mxu0  ;;  %v11414_v61 = vld [vmem:[#allocation81_spill] sm:$0xff] }
 0x2b3   : > { %v11387_v59 = vsel %vm9247_vm1, 4294967295, %v11386_v59  ;;  %v11401_v33 = vmov 0  ;;  %vm11403_vm8 = vmmov %vm9163_vm6  ;;  %v995_v39 = vmul.f32 32.0, %v931_v24  ;;  %vm9290_vm9 = vcmp.eq.f32.partialorder %v930_v2, %v8147_v27  ;;  %11407 = vst [vmem:[#allocation68_spill] sm:$0xff] %v9296_v51 }
 0x2b4   : > { %vm9273_vm10 = vcmp.eq.f32.partialorder %v11396_v57, %v8147_v27  ;;  %vm9280_vm15 = vcmp.eq.f32.partialorder %v11400_v42, %v8046_v47  ;;  %vm11404_vm13 = vmand %vm8979_vm5, %vm11403_vm8  ;;  %v7254_v57 = vld [vmem:[#allocation5 + $0x970] ss:$40 sps:$4 sm:$0xff]   ;;  %v11411_v52 = vfloor.f32 %v11410_v9  ;;  %v11412_v2 = vmov 0 }
 0x2b5   : > { %v11398_v26 = vsel %vm9273_vm10, 4294967295, %v11397_v26  ;;  %v11402_v33 = vsel %vm9280_vm15, 4294967295, %v11401_v33  ;;  %vm6563_vm11 = vmpackc.low %vm1383_vm2, %vm11404_vm13  ;;  %v11415_v42 = vfloor.f32 %v11414_v61  ;;  %v11416_v58 = vmov 0  ;;  %3954 = vmatpush1.bf16.msra.mxu1 %v7254_v57 }
 0x2b6   : > { %vm9305_vm2 = vcmp.eq.f32.partialorder %v11411_v52, %v8147_v27  ;;  %6564 = vmatprep.subr.msk.bf16.mxu0 %vm6563_vm11, %v11168_v45  ;;  %v1169_v43 = vfloor.f32 %v1105_v14  ;;  %v1170_v54 = vfloor.f32 %v1106_v49  ;;  %v11418_v51 = vcvt.s32.f32 %v8984_v28  ;;  %v7259_v52 = vld [vmem:[#allocation5 + $0x9c4] ss:$40 sps:$4 sm:$0xff]   ;;  %v11429_v28 = vld [vmem:[#allocation71_spill] sm:$0xff] }
 0x2b7   : > { %v11413_v2 = vsel %vm9305_vm2, 4294967295, %v11412_v2  ;;  %vm9312_vm8 = vcmp.eq.f32.partialorder %v11415_v42, %v8046_v47  ;;  %v9320_v9 = vadd.s32 472, %v7935_v35  ;;  %vm11419_vm13 = vnez %v11173_v0  ;;  %3955 = vmatprep.subr.bf16.mxu1 %v7259_v52 }
 0x2b8   : > { %v11417_v58 = vsel %vm9312_vm8, 4294967295, %v11416_v58  ;;  %v1058_v29 = vsub.f32 %v11418_v51, %v994_v60  ;;  %vm11420_vm5 = vnez %v11179_v5  ;;  %vm11422_vm10 = vnez %v11176_v19  ;;  %v11433_v19 = vld [vmem:[#allocation83_spill] sm:$0xff] }
 0x2b9   : > { %vm11421_vm2 = vmand %vm11419_vm13, %vm11420_vm5  ;;  %vm11423_vm8 = vnez %v11182_v31  ;;  %v11425_v14 = vmov 0  ;;  %v11430_v0 = vfloor.f32 %v11429_v28  ;;  %v11431_v5 = vmov 0 }
 0x2ba   : > { %vm11424_vm11 = vmand %vm11422_vm10, %vm11423_vm8  ;;  %v11434_v31 = vfloor.f32 %v11433_v19  ;;  %v11435_v6 = vmov 0  ;;  %v11437_v49 = vcvt.s32.f32 %v9054_v37  ;;  %v11438_v51 = vcvt.s32.f32 %v9214_v3  ;;  %v11458_v19 = vld [vmem:[#allocation85_spill] sm:$0xff] }
 0x2bb   : > { %vm9332_vm15 = vmpackc.low %vm11424_vm11, %vm11421_vm2  ;;  %vm9343_vm12 = vcmp.eq.f32.partialorder %v11430_v0, %v8147_v27  ;;  %v11439_v42 = vcvt.s32.f32 %v9230_v13  ;;  %v10985_v0 = vcvt.s32.f32 %v9233_v41  ;;  %vm11440_vm5 = vnez %v11187_v32  ;;  %v11452_v32 = vld [vmem:[#allocation29_spill] sm:$0xff] }
 0x2bc   : > { %v11426_v14 = vsel %vm9332_vm15, 4294967295, %v11425_v14  ;;  %v11432_v5 = vsel %vm9343_vm12, 4294967295, %v11431_v5  ;;  %vm9350_vm10 = vcmp.eq.f32.partialorder %v11434_v31, %v8046_v47  ;;  %v1059_v60 = vsub.f32 %v11437_v49, %v995_v39  ;;  %v11449_v39 = vld [vmem:[#allocation46_spill] sm:$0xff] }
 0x2bd   : > { %v11436_v6 = vsel %vm9350_vm10, 4294967295, %v11435_v6  ;;  %v850_v61 = vmul.f32 0.03125, %v11438_v51  ;;  %v851_v28 = vmul.f32 0.03125, %v11439_v42  ;;  %vm11441_vm2 = vnez %v11190_v16  ;;  %v11454_v16 = vld [vmem:[#allocation73_spill] sm:$0xff] }
 0x2be   : > { %vm11442_vm8 = vmand %vm11440_vm5, %vm11441_vm2  ;;  %vm11443_vm13 = vnez %v11194_v8  ;;  %vm11444_vm11 = vnez %v11197_v56  ;;  %v11446_v37 = vmov 0  ;;  %v11455_v8 = vfloor.f32 %v11454_v16  ;;  %v11498_v51 = vld [vmem:[#allocation53_spill] sm:$0xff] }
 0x2bf   : > { %vm11445_vm7 = vmand %vm11443_vm13, %vm11444_vm11  ;;  %v11456_v56 = vmov 0  ;;  %v11459_v31 = vfloor.f32 %v11458_v19  ;;  %v11460_v49 = vmov 0  ;;  %vm9398_vm2 = vcmp.eq.f32.partialorder %v1169_v43, %v8046_v47  ;;  %v11469_v19 = vld [vmem:[#allocation48_spill] sm:$0xff] }
 0x2c0   : > { %vm9371_vm12 = vmpackc.low %vm11445_vm7, %vm11442_vm8  ;;  %vm9386_vm5 = vcmp.eq.f32.partialorder %v11455_v8, %v8147_v27  ;;  %vm9403_vm8 = vcmp.eq.f32.partialorder %v1170_v54, %v8046_v47  ;;  %v1123_v16 = vmul.f32 0.125, %v1058_v29  ;;  %v801_v8 = vcvt.s32.f32 %v9320_v9 }
 0x2c1   : > { %v11447_v37 = vsel %vm9371_vm12, 4294967295, %v11446_v37  ;;  %v11457_v56 = vsel %vm9386_vm5, 4294967295, %v11456_v56  ;;  %vm9393_vm7 = vcmp.eq.f32.partialorder %v11459_v31, %v8046_v47  ;;  %vm11471_vm3 = vnez %v11355_v48  ;;  %v7257_v31 = vld [vmem:[#allocation5 + $0x9c0] ss:$40 sps:$4 sm:$0xff]   ;;  %vm1367_vm14 = vmand %vm9264_vm4, %vm9403_vm8 }
 0x2c2   : > { %v11461_v49 = vsel %vm9393_vm7, 4294967295, %v11460_v49  ;;  %v1124_v54 = vmul.f32 0.125, %v1059_v60  ;;  %v914_v43 = vfloor.f32 %v850_v61  ;;  %v915_v29 = vfloor.f32 %v851_v28  ;;  %v9436_v61 = vpop.f32.mrb[36].mxu0  ;;  %vm11483_vm10 = vmand %vm11471_vm3, %vm9398_vm2  ;;  %v11490_v48 = vld [vmem:[#allocation97_spill] sm:$0xff]  ;;  %v11496_v28 = vld [vmem:[#allocation50_spill] sm:$0xff]  ;;  %3956 = vmatpush1.bf16.msra.mxu1 %v7257_v31 }
 0x2c3   : > { %v868_v9 = vmul.f32 0.03125, %v10985_v0  ;;  %v1187_v15 = vfloor.f32 %v1123_v16  ;;  %vm9427_vm7 = vcmp.eq.f32.partialorder %v931_v24, %v8147_v27  ;;  %v9431_v40 = vmul.f32 0.03125, %v801_v8  ;;  %11474 = vst [vmem:[#allocation79_spill] sm:$0xff] %v9436_v61  ;;  %vm6565_vm15 = vmpackc.low %vm1367_vm14, %vm11483_vm10 }
 0x2c4   : > { %v9434_v60 = vadd.s32 336, %v7935_v35  ;;  %vm11475_vm0 = vnez %v11204_v10  ;;  %vm11476_vm6 = vnez %v11210_v55  ;;  %vm11478_vm4 = vnez %v11207_v62  ;;  %v9460_v62 = vpop.f32.mrb[37].mxu0  ;;  %6566 = vmatpush3.bf16.msk.msra.mxu0 %vm6565_vm15, %v11168_v45 }
 0x2c5   : > { %vm11477_vm5 = vmand %vm11475_vm0, %vm11476_vm6  ;;  %vm11479_vm8 = vnez %v11213_v23  ;;  %v11481_v24 = vmov 0  ;;  %v1188_v63 = vfloor.f32 %v1124_v54  ;;  %v978_v10 = vmul.f32 32.0, %v914_v43  ;;  %11484 = vst [vmem:[#allocation70_spill] sm:$0xff] %v9460_v62  ;;  %v11488_v23 = vld [vmem:[#allocation96_spill] sm:$0xff] }
 0x2c6   : > { %vm11480_vm13 = vmand %vm11478_vm4, %vm11479_vm8  ;;  %v979_v57 = vmul.f32 32.0, %v915_v29  ;;  %v9458_v55 = vadd.s32 344, %v7935_v35  ;;  %vm11485_vm6 = vnez %v11221_v44  ;;  %vm11486_vm0 = vnez %v11228_v30  ;;  %v11500_v44 = vld [vmem:[#allocation51_spill] sm:$0xff] }
 0x2c7   : > { %vm9448_vm11 = vmpackc.low %vm11480_vm13, %vm11477_vm5  ;;  %vm11489_vm13 = vnez %v11488_v23  ;;  %vm11491_vm4 = vnez %v11490_v48  ;;  %vm11497_vm10 = vnez %v11496_v28  ;;  %v932_v16 = vfloor.f32 %v868_v9  ;;  %v9496_v23 = vpop.f32.mrb[38].mxu0  ;;  %v11508_v48 = vld [vmem:[#allocation58_spill] sm:$0xff] }
 0x2c8   : > { %v11482_v24 = vsel %vm9448_vm11, 4294967295, %v11481_v24  ;;  %vm11487_vm5 = vmand %vm11485_vm6, %vm11486_vm0  ;;  %vm9486_vm6 = vcmp.eq.f32.partialorder %v1187_v15, %v8046_v47  ;;  %vm9491_vm0 = vcmp.eq.f32.partialorder %v914_v43, %v8147_v27  ;;  %v933_v54 = vfloor.f32 %v9431_v40  ;;  %11506 = vst [vmem:[#allocation81_spill] sm:$0xff] %v9496_v23  ;;  %v11511_v15 = vld [vmem:[#allocation59_spill] sm:$0xff]  ;;  %v9520_v61 = vpop.f32.mrb[39].mxu0 }
 0x2c9   : > { %vm11492_vm8 = vmand %vm11489_vm13, %vm11491_vm4  ;;  %vm9507_vm2 = vcmp.eq.f32.partialorder %v1188_v63, %v8046_v47  ;;  %v11515_v40 = vcvt.s32.f32 %v9214_v3  ;;  %v11516_v0 = vcvt.s32.f32 %v9230_v13  ;;  %v784_v62 = vcvt.s32.f32 %v9434_v60 }
 0x2ca   : > { %vm9472_vm3 = vmpackc.low %vm11492_vm8, %vm11487_vm5  ;;  %vm9527_vm15 = vcmp.eq.f32.partialorder %v915_v29, %v8147_v27  ;;  %v996_v3 = vmul.f32 32.0, %v932_v16  ;;  %vm9532_vm11 = vcmp.eq.f32.partialorder %v932_v16, %v8147_v27  ;;  %v11519_v13 = vmov 0 }
 0x2cb   : > { %v1042_v9 = vsub.f32 %v11515_v40, %v978_v10  ;;  %v1043_v23 = vsub.f32 %v11516_v0, %v979_v57  ;;  %vm1385_vm1 = vmand %vm9427_vm7, %vm9507_vm2  ;;  %v997_v10 = vmul.f32 32.0, %v933_v54  ;;  %v11520_v13 = vsel %vm9532_vm11, 4294967295, %v11519_v13  ;;  %v11530_v0 = vld [vmem:[#allocation75_spill] sm:$0xff] }
 0x2cc   : > { %vm11521_vm4 = vnez %v11387_v59  ;;  %vm11522_vm8 = vnez %v11243_v1  ;;  %vm11523_vm7 = vnez %v11251_v18  ;;  %vm11525_vm5 = vnez %v11247_v50  ;;  %v11534_v1 = vld [vmem:[#allocation86_spill] sm:$0xff] }
 0x2cd   : > { %6520 = vmatprep.subr.msk.bf16.mxu1 %vm11521_vm4, %v11168_v45  ;;  %vm11524_vm2 = vmand %vm11522_vm8, %vm11523_vm7  ;;  %vm11526_vm13 = vnez %v11255_v7  ;;  %v11528_v38 = vmov 0  ;;  %v11531_v29 = vfloor.f32 %v11530_v0  ;;  %v11532_v59 = vmov 0  ;;  %v7397_v0 = vld [vmem:[%s7774_s6 + $0x8] ss:$16 sps:$4 sm:$0xff]  }
 0x2ce   : > { %vm11527_vm12 = vmand %vm11525_vm5, %vm11526_vm13  ;;  %v11535_v18 = vfloor.f32 %v11534_v1  ;;  %v11536_v50 = vmov 0  ;;  %v1107_v7 = vmul.f32 0.125, %v1042_v9  ;;  %v1108_v31 = vmul.f32 0.125, %v1043_v23  ;;  %3958 = vmatmul.mubr.bf16.vlgmr.msra.gmra.mrb[48].mxu1 %v7397_v0 }
 0x2cf   : > { %vm9549_vm14 = vmpackc.low %vm11527_vm12, %vm11524_vm2  ;;  %vm9556_vm11 = vcmp.eq.f32.partialorder %v11531_v29, %v8147_v27  ;;  %v785_v60 = vcvt.s32.f32 %v9458_v55  ;;  %v852_v57 = vmul.f32 0.03125, %v784_v62  ;;  %vm11539_vm13 = vnez %v11265_v36  ;;  %v11549_v55 = vld [vmem:[#allocation76_spill] sm:$0xff] }
 0x2d0   : > { %v11529_v38 = vsel %vm9549_vm14, 4294967295, %v11528_v38  ;;  %v11533_v59 = vsel %vm9556_vm11, 4294967295, %v11532_v59  ;;  %vm9563_vm4 = vcmp.eq.f32.partialorder %v11535_v18, %v8046_v47  ;;  %vm11538_vm12 = vmand %vm9290_vm9, %vm9486_vm6  ;;  %vm11540_vm8 = vnez %v11268_v25 }
 0x2d1   : > { %v11537_v50 = vsel %vm9563_vm4, 4294967295, %v11536_v50  ;;  %vm6567_vm5 = vmpackc.low %vm1385_vm1, %vm11538_vm12  ;;  %vm11542_vm2 = vnez %v11279_v4  ;;  %vm11543_vm11 = vnez %v11282_v17  ;;  %v11550_v36 = vfloor.f32 %v11549_v55  ;;  %v11553_v4 = vld [vmem:[#allocation87_spill] sm:$0xff] }
 0x2d2   : > { %vm11541_vm7 = vmand %vm11539_vm13, %vm11540_vm8  ;;  %v11551_v25 = vmov 0  ;;  %v11554_v17 = vfloor.f32 %v11553_v4  ;;  %v11555_v30 = vmov 0  ;;  %6568 = vmatprep.subr.msk.bf16.mxu0 %vm6567_vm5, %v11168_v45  ;;  %v11557_v16 = vcvt.s32.f32 %v9233_v41  ;;  %v7398_v41 = vld [vmem:[%s7774_s6 + $0x2c] ss:$16 sps:$4 sm:$0xff]  }
 0x2d3   : > { %vm11544_vm4 = vmand %vm11542_vm2, %vm11543_vm11  ;;  %vm9594_vm12 = vcmp.eq.f32.partialorder %v11550_v36, %v8147_v27  ;;  %v1061_v43 = vsub.f32 %v801_v8, %v997_v10  ;;  %v9609_v40 = vadd.s32 480, %v7935_v35  ;;  %v9612_v9 = vadd.s32 488, %v7935_v35  ;;  %3967 = vmatprep.mubr.bf16.mxu1 %v7398_v41  ;;  %v11563_v8 = vld [vmem:[#allocation78_spill] sm:$0xff] }
 0x2d4   : > { %vm9583_vm14 = vmpackc.low %vm11544_vm4, %vm11541_vm7  ;;  %v11552_v25 = vsel %vm9594_vm12, 4294967295, %v11551_v25  ;;  %vm9601_vm11 = vcmp.eq.f32.partialorder %v11554_v17, %v8046_v47  ;;  %v1060_v23 = vsub.f32 %v11557_v16, %v996_v3  ;;  %v1171_v29 = vfloor.f32 %v1107_v7  ;;  %v11567_v7 = vld [vmem:[#allocation88_spill] sm:$0xff] }
 0x2d5   : > { %v11556_v30 = vsel %vm9601_vm11, 4294967295, %v11555_v30  ;;  %v1172_v1 = vfloor.f32 %v1108_v31  ;;  %v853_v18 = vmul.f32 0.03125, %v785_v60  ;;  %v916_v55 = vfloor.f32 %v852_v57 }
 0x2d6   : > { %vm11560_vm5 = vnez %v11426_v14  ;;  %v11564_v3 = vfloor.f32 %v11563_v8  ;;  %v11565_v10 = vmov 0  ;;  %v11568_v31 = vfloor.f32 %v11567_v7 }
 0x2d7   : > { %6522 = vmatpush3.bf16.msk.msra.mxu1 %vm11560_vm5, %v11168_v45  ;;  %v11569_v14 = vmov 0  ;;  %v1125_v57 = vmul.f32 0.125, %v1060_v23  ;;  %v1126_v36 = vmul.f32 0.125, %v1061_v43  ;;  %v802_v4 = vcvt.s32.f32 %v9609_v40 }
 0x2d8   : > { %vm9630_vm12 = vcmp.eq.f32.partialorder %v11564_v3, %v8147_v27  ;;  %vm9637_vm8 = vcmp.eq.f32.partialorder %v11568_v31, %v8046_v47  ;;  %v803_v17 = vcvt.s32.f32 %v9612_v9  ;;  %vm11571_vm5 = vnez %v11447_v37 }
 0x2d9   : > { %v11566_v10 = vsel %vm9630_vm12, 4294967295, %v11565_v10  ;;  %v11570_v14 = vsel %vm9637_vm8, 4294967295, %v11569_v14  ;;  %6524 = vmatprep.subr.msk.bf16.mxu1 %vm11571_vm5, %v11168_v45  ;;  %vm11572_vm6 = vnez %v11449_v39  ;;  %vm11573_vm12 = vnez %v11298_v46 }
 0x2da   : > { %vm11574_vm7 = vmand %vm11572_vm6, %vm11573_vm12  ;;  %vm11575_vm2 = vnez %v11452_v32  ;;  %vm11576_vm11 = vnez %v11301_v53  ;;  %v11578_v16 = vmov 0  ;;  %vm9665_vm5 = vcmp.eq.f32.partialorder %v1171_v29, %v8046_v47  ;;  %v11590_v32 = vld [vmem:[#allocation49_spill] sm:$0xff] }
 0x2db   : > { %vm11577_vm8 = vmand %vm11575_vm2, %vm11576_vm11  ;;  %vm9670_vm6 = vcmp.eq.f32.partialorder %v1172_v1, %v8046_v47  ;;  %v917_v53 = vfloor.f32 %v853_v18  ;;  %v980_v39 = vmul.f32 32.0, %v916_v55  ;;  %vm11586_vm12 = vnez %v11309_v21  ;;  %v11601_v1 = vld [vmem:[#allocation89_spill] sm:$0xff] }
 0x2dc   : > { %vm9656_vm4 = vmpackc.low %vm11577_vm8, %vm11574_vm7  ;;  %vm11587_vm11 = vnez %v11317_v20  ;;  %vm11589_vm7 = vnez %v11469_v19  ;;  %vm11591_vm2 = vnez %v11590_v32  ;;  %v1189_v43 = vfloor.f32 %v1125_v57  ;;  %v11597_v19 = vld [vmem:[#allocation80_spill] sm:$0xff]  ;;  %v7400_v32 = vld [vmem:[%s7774_s6 + $0x4c] ss:$16 sps:$4 sm:$0xff]  }
 0x2dd   : > { %v11579_v16 = vsel %vm9656_vm4, 4294967295, %v11578_v16  ;;  %vm11588_vm8 = vmand %vm11586_vm12, %vm11587_vm11  ;;  %v1190_v40 = vfloor.f32 %v1126_v36  ;;  %vm9693_vm1 = vcmp.eq.f32.partialorder %v933_v54, %v8147_v27  ;;  %v870_v21 = vmul.f32 0.03125, %v802_v4 }
 0x2de   : > { %vm11592_vm9 = vmand %vm11589_vm7, %vm11591_vm2  ;;  %v11598_v0 = vfloor.f32 %v11597_v19  ;;  %v11599_v29 = vmov 0  ;;  %v11602_v18 = vfloor.f32 %v11601_v1  ;;  %v11603_v42 = vmov 0 }
 0x2df   : > { %vm9684_vm4 = vmpackc.low %vm11592_vm9, %vm11588_vm8  ;;  %v981_v54 = vmul.f32 32.0, %v917_v53  ;;  %v1044_v41 = vsub.f32 %v784_v62, %v980_v39  ;;  %v871_v3 = vmul.f32 0.03125, %v803_v17  ;;  %vm11607_vm11 = vnez %v11482_v24  ;;  %v11723_v62 = vld [vmem:[#allocation34_spill] sm:$0xff] }
 0x2e0   : > { %vm1368_vm13 = vmand %vm9491_vm0, %vm9665_vm5  ;;  %vm9700_vm9 = vcmp.eq.f32.partialorder %v11598_v0, %v8147_v27  ;;  %vm9707_vm12 = vcmp.eq.f32.partialorder %v11602_v18, %v8046_v47  ;;  %vm9716_vm5 = vcmp.eq.f32.partialorder %v916_v55, %v8147_v27  ;;  %6526 = vmatpush3.bf16.msk.msra.mxu1 %vm11607_vm11, %v11168_v45  ;;  %vm9726_vm7 = vcmp.eq.f32.partialorder %v1189_v43, %v8046_v47  ;;  %v11641_v43 = vld [vmem:[#allocation84_spill] sm:$0xff] }
 0x2e1   : > { %v11600_v29 = vsel %vm9700_vm9, 4294967295, %v11599_v29  ;;  %v11604_v42 = vsel %vm9707_vm12, 4294967295, %v11603_v42  ;;  %vm1369_vm0 = vmand %vm9527_vm15, %vm9670_vm6  ;;  %vm9731_vm15 = vcmp.eq.f32.partialorder %v1190_v40, %v8046_v47  ;;  %v934_v63 = vfloor.f32 %v870_v21  ;;  %6528 = vmatprep.subr.msk.bf16.mxu1 %vm9472_vm3, %v11168_v45 }
 0x2e2   : > { %vm6569_vm8 = vmpackc.low %vm1369_vm0, %vm1368_vm13  ;;  %v9736_v55 = vadd.s32 352, %v7935_v35  ;;  %vm11612_vm13 = vnez %v11347_v22  ;;  %vm11614_vm2 = vnez %v11500_v44  ;;  %vm11615_vm0 = vnez %v11498_v51 }
 0x2e3   : > { %vm11613_vm6 = vmand %vm11497_vm10, %vm11612_vm13  ;;  %v11617_v24 = vmov 0  ;;  %6570 = vmatpush3.bf16.msk.msra.mxu0 %vm6569_vm8, %v11168_v45  ;;  %vm11619_vm3 = vnez %v11520_v13  ;;  %v1045_v52 = vsub.f32 %v785_v60, %v981_v54  ;;  %v1109_v28 = vmul.f32 0.125, %v1044_v41  ;;  %v11630_v13 = vld [vmem:[#allocation82_spill] sm:$0xff] }
 0x2e4   : > { %vm11616_vm11 = vmand %vm11614_vm2, %vm11615_vm0  ;;  %v935_v22 = vfloor.f32 %v871_v3  ;;  %v9761_v31 = vadd.s32 360, %v7935_v35  ;;  %vm11620_vm10 = vnez %v11508_v48  ;;  %vm11621_vm13 = vnez %v11370_v11 }
 0x2e5   : > { %vm9751_vm9 = vmpackc.low %vm11616_vm11, %vm11613_vm6  ;;  %vm11623_vm2 = vnez %v11511_v15  ;;  %vm11624_vm8 = vnez %v11374_v12  ;;  %v11626_v51 = vmov 0  ;;  %v998_v11 = vmul.f32 32.0, %v934_v63  ;;  %v7399_v15 = vld [vmem:[%s7774_s6 + $0x28] ss:$16 sps:$4 sm:$0xff]  }
 0x2e6   : > { %v11618_v24 = vsel %vm9751_vm9, 4294967295, %v11617_v24  ;;  %vm1386_vm12 = vmand %vm11619_vm3, %vm9726_vm7  ;;  %vm9782_vm3 = vcmp.eq.f32.partialorder %v917_v53, %v8147_v27  ;;  %v786_v48 = vcvt.s32.f32 %v9736_v55  ;;  %v9788_v12 = vadd.s32 496, %v7935_v35  ;;  %3968 = vmatmul.mubr.bf16.gmra.mrb[52].mxu1 %v7399_v15 }
 0x2e7   : > { %vm11622_vm6 = vmand %vm11620_vm10, %vm11621_vm13  ;;  %v11631_v60 = vfloor.f32 %v11630_v13  ;;  %v11632_v57 = vmov 0  ;;  %v1110_v37 = vmul.f32 0.125, %v1045_v52  ;;  %v1173_v46 = vfloor.f32 %v1109_v28  ;;  %3977 = vmatprep.mubr.bf16.mxu1 %v7400_v32  ;;  %v7401_v52 = vld [vmem:[%s7774_s6 + $0x48] ss:$16 sps:$4 sm:$0xff]  }
 0x2e8   : > { %vm11625_vm0 = vmand %vm11623_vm2, %vm11624_vm8  ;;  %v999_v53 = vmul.f32 32.0, %v935_v22  ;;  %v11636_v39 = vmov 0  ;;  %vm11638_vm13 = vnez %v11529_v38  ;;  %v11642_v40 = vfloor.f32 %v11641_v43  ;;  %v11684_v28 = vld [vmem:[#allocation91_spill] sm:$0xff]  ;;  %v3667_v43 = vpop.f32.mrb[16].mxu1 }
 0x2e9   : > { %vm9773_vm11 = vmpackc.low %vm11625_vm0, %vm11622_vm6  ;;  %vm9794_vm10 = vcmp.eq.f32.partialorder %v11631_v60, %v8147_v27  ;;  %6530 = vmatpush3.bf16.msk.msra.mxu1 %vm11638_vm13, %v11168_v45  ;;  %vm11639_vm6 = vnez %v11537_v50  ;;  %v11643_v20 = vmov 0  ;;  %v1062_v21 = vsub.f32 %v802_v4, %v998_v11 }
 0x2ea   : > { %v11627_v51 = vsel %vm9773_vm11, 4294967295, %v11626_v51  ;;  %vm1387_vm7 = vmand %vm9693_vm1, %vm9731_vm15  ;;  %v11633_v57 = vsel %vm9794_vm10, 4294967295, %v11632_v57  ;;  %vm9803_vm15 = vcmp.eq.f32.partialorder %v934_v63, %v8147_v27  ;;  %vm9818_vm8 = vcmp.eq.f32.partialorder %v11642_v40, %v8147_v27  ;;  %6532 = vmatprep.subr.msk.bf16.mxu1 %vm9583_vm14, %v11168_v45 }
 0x2eb   : > { %vm9798_vm1 = vmpackc.low %vm1387_vm7, %vm1386_vm12  ;;  %v11637_v39 = vsel %vm9803_vm15, 4294967295, %v11636_v39  ;;  %vm11640_vm12 = vnez %v11533_v59  ;;  %v11644_v20 = vsel %vm9818_vm8, 4294967295, %v11643_v20  ;;  %v787_v19 = vcvt.s32.f32 %v9761_v31 }
 0x2ec   : > { %v854_v0 = vmul.f32 0.03125, %v786_v48  ;;  %v9824_v38 = vadd.s32 504, %v7935_v35  ;;  %vm11645_vm0 = vnez %v11398_v26  ;;  %vm11646_vm7 = vnez %v11402_v33  ;;  %6572 = vmatprep.subr.msk.bf16.mxu0 %vm9798_vm1, %v11168_v45 }
 0x2ed   : > { %vm11647_vm13 = vmand %vm11645_vm0, %vm11646_vm7  ;;  %vm11648_vm2 = vnez %v11413_v2  ;;  %vm11649_vm8 = vnez %v11417_v58  ;;  %v11651_v4 = vmov 0  ;;  %vm11653_vm9 = vnez %v11556_v30  ;;  %v11678_v30 = vld [vmem:[#allocation90_spill] sm:$0xff] }
 0x2ee   : > { %vm11650_vm10 = vmand %vm11648_vm2, %vm11649_vm8  ;;  %vm11654_vm15 = vnez %v11552_v25  ;;  %v1174_v26 = vfloor.f32 %v1110_v37  ;;  %vm9851_vm14 = vcmp.eq.f32.partialorder %v1173_v46, %v8046_v47  ;;  %v1063_v58 = vsub.f32 %v803_v17, %v999_v53  ;;  %3978 = vmatmul.mubr.bf16.gmra.mrb[56].mxu1 %v7401_v52  ;;  %v11692_v37 = vld [vmem:[#allocation20_spill] sm:$0xff] }
 0x2ef   : > { %vm9839_vm11 = vmpackc.low %vm11650_vm10, %vm11647_vm13  ;;  %v804_v2 = vcvt.s32.f32 %v9788_v12  ;;  %vm11657_vm10 = vnez %v11432_v5  ;;  %vm11658_vm2 = vnez %v11436_v6  ;;  %vm11660_vm0 = vnez %v11457_v56  ;;  %v7402_v12 = vld [vmem:[%s7774_s6 + $0x6c] ss:$16 sps:$4 sm:$0xff]   ;;  %v11693_v46 = vld [vmem:[#allocation28_spill] sm:$0xff] }
 0x2f0   : > { %v11652_v4 = vsel %vm9839_vm11, 4294967295, %v11651_v4  ;;  %vm11659_vm8 = vmand %vm11657_vm10, %vm11658_vm2  ;;  %vm11661_vm1 = vnez %v11461_v49  ;;  %v1127_v9 = vmul.f32 0.125, %v1062_v21  ;;  %v855_v17 = vmul.f32 0.03125, %v787_v19  ;;  %3987 = vmatprep.mubr.bf16.mxu1 %v7402_v12  ;;  %v11709_v49 = vld [vmem:[#allocation72_spill] sm:$0xff] }
 0x2f1   : > { %vm11662_vm7 = vmand %vm11660_vm0, %vm11661_vm1  ;;  %v918_v5 = vfloor.f32 %v854_v0  ;;  %v805_v6 = vcvt.s32.f32 %v9824_v38  ;;  %vm11665_vm10 = vnez %v11570_v14  ;;  %vm11666_vm2 = vnez %v11566_v10  ;;  %v11698_v0 = vld [vmem:[#allocation54_spill] sm:$0xff] }
 0x2f2   : > { %vm9868_vm13 = vmpackc.low %vm11662_vm7, %vm11659_vm8  ;;  %vm1307_vm8 = vcmp.eq.f32.partialorder %v1174_v26, %v8046_v47  ;;  %v1128_v56 = vmul.f32 0.125, %v1063_v58  ;;  %vm9883_vm0 = vcmp.eq.f32.partialorder %v935_v22, %v8147_v27  ;;  %v9887_v1 = vmul.f32 0.03125, %v804_v2  ;;  %v3669_v26 = vpop.f32.mrb[17].mxu1 }
 0x2f3   : > { %vm11669_vm1 = vnez %v11579_v16  ;;  %vm1371_vm7 = vmand %vm9782_vm3, %vm1307_vm8  ;;  %v1191_v18 = vfloor.f32 %v1127_v9  ;;  %v919_v54 = vfloor.f32 %v855_v17  ;;  %v982_v41 = vmul.f32 32.0, %v918_v5  ;;  %v11702_v9 = vld [vmem:[#allocation60_spill] sm:$0xff] }
 0x2f4   : > { %6534 = vmatpush3.bf16.msk.msra.mxu1 %vm11669_vm1, %v11168_v45  ;;  %v9895_v3 = vadd.s32 368, %v7935_v35  ;;  %vm11670_vm11 = vmmov %vm11639_vm6  ;;  %v11673_v16 = vmov 0  ;;  %v1192_v23 = vfloor.f32 %v1128_v56  ;;  %v9919_v59 = vmul.f32 0.03125, %v805_v6 }
 0x2f5   : > { %6536 = vmatprep.subr.msk.bf16.mxu1 %vm9684_vm4, %v11168_v45  ;;  %vm11671_vm6 = vmand %vm11640_vm12, %vm11670_vm11  ;;  %v936_v50 = vfloor.f32 %v9887_v1  ;;  %v9923_v25 = vadd.s32 376, %v7935_v35  ;;  %vm11677_vm11 = vnez %v11600_v29  ;;  %v11679_v8 = vfloor.f32 %v11678_v30  ;;  %v11721_v30 = vld [vmem:[#allocation19_spill] sm:$0xff] }
 0x2f6   : > { %vm11672_vm3 = vmand %vm11654_vm15, %vm11653_vm9  ;;  %vm11676_vm9 = vnez %v11604_v42  ;;  %v983_v63 = vmul.f32 32.0, %v919_v54  ;;  %v1046_v55 = vsub.f32 %v786_v48, %v982_v41  ;;  %v11685_v22 = vfloor.f32 %v11684_v28  ;;  %v11724_v28 = vld [vmem:[#allocation36_spill] sm:$0xff] }
 0x2f7   : > { %vm9910_vm8 = vmpackc.low %vm11672_vm3, %vm11671_vm6  ;;  %vm9932_vm6 = vcmp.eq.f32.partialorder %v11679_v8, %v8046_v47  ;;  %v937_v11 = vfloor.f32 %v9919_v59  ;;  %v1000_v48 = vmul.f32 32.0, %v936_v50  ;;  %v788_v60 = vcvt.s32.f32 %v9895_v3  ;;  %v7403_v3 = vld [vmem:[%s7774_s6 + $0x68] ss:$16 sps:$4 sm:$0xff]   ;;  %v11722_v8 = vld [vmem:[#allocation32_spill] sm:$0xff]  ;;  %s10770_s6 = scalar_lea.hbm %s10820_s5, %s6255_s15 }
 0x2f8   : > { %v11674_v16 = vsel %vm9910_vm8, 4294967295, %v11673_v16  ;;  %vm11675_vm1 = vmand %vm9716_vm5, %vm9851_vm14  ;;  %vm9938_vm5 = vcmp.eq.f32.partialorder %v1191_v18, %v8046_v47  ;;  %vm9946_vm12 = vcmp.eq.f32.partialorder %v11685_v22, %v8046_v47  ;;  %vm9951_vm14 = vcmp.eq.f32.partialorder %v1192_v23, %v8046_v47  ;;  %3988 = vmatmul.mubr.bf16.gmra.mrb[60].mxu1 %v7403_v3  ;;  %v11734_v23 = vld [vmem:[#allocation92_spill] sm:$0xff] }
 0x2f9   : > { %vm6573_vm4 = vmpackc.low %vm1371_vm7, %vm11675_vm1  ;;  %vm11690_vm7 = vnez %v11637_v39  ;;  %vm11691_vm1 = vnez %v11618_v24  ;;  %v1047_v15 = vsub.f32 %v787_v19, %v983_v63  ;;  %v1111_v13 = vmul.f32 0.125, %v1046_v55 }
 0x2fa   : > { %vm1359_vm15 = vmand %vm11677_vm11, %vm11676_vm9  ;;  %6574 = vmatpush3.bf16.msk.msra.mxu0 %vm6573_vm4, %v11168_v45  ;;  %6538 = vmatpush3.bf16.msk.msra.mxu1 %vm11691_vm1, %v11168_v45  ;;  %v789_v36 = vcvt.s32.f32 %v9923_v25  ;;  %v2033_v53 = vadd.f32 %v11693_v46, %v11692_v37  ;;  %vm9976_vm1 = vcmp.eq.f32.partialorder %v918_v5, %v8147_v27  ;;  %v1001_v39 = vmul.f32 32.0, %v937_v11  ;;  %v3671_v5 = vpop.f32.mrb[18].mxu1 }
 0x2fb   : > { %vm1388_vm3 = vmand %vm11690_vm7, %vm9938_vm5  ;;  %vm11694_vm5 = vnez %v11627_v51  ;;  %v1064_v32 = vsub.f32 %v804_v2, %v1000_v48  ;;  %v1112_v40 = vmul.f32 0.125, %v1047_v15  ;;  %v1175_v21 = vfloor.f32 %v1111_v13  ;;  %v3673_v1 = vpop.f32.mrb[19].mxu1  ;;  %v11725_v48 = vld [vmem:[#allocation38_spill] sm:$0xff] }
 0x2fc   : > { %vm1389_vm4 = vmand %vm9883_vm0, %vm9951_vm14  ;;  %6540 = vmatprep.subr.msk.bf16.mxu1 %vm11694_vm5, %v11168_v45  ;;  %vm11697_vm0 = vnez %v11633_v57  ;;  %v856_v51 = vmul.f32 0.03125, %v788_v60  ;;  %v9985_v19 = vmul.f32 0.03125, %v789_v36  ;;  %v9988_v38 = vmul.f32 %v3667_v43, %v11698_v0  ;;  %v3677_v55 = vpop.f32.mrb[20].mxu1  ;;  %v11727_v43 = vld [vmem:[#allocation45_spill] sm:$0xff] }
 0x2fd   : > { %vm6575_vm7 = vmpackc.low %vm1389_vm4, %vm1388_vm3  ;;  %vm11699_vm3 = vnez %v11644_v20  ;;  %vm9995_vm5 = vcmp.eq.f32.partialorder %v919_v54, %v8147_v27  ;;  %v1065_v58 = vsub.f32 %v805_v6, %v1001_v39  ;;  %v1129_v2 = vmul.f32 0.125, %v1064_v32  ;;  %v3679_v44 = vpop.f32.mrb[21].mxu1  ;;  %v11726_v39 = vld [vmem:[#allocation43_spill] sm:$0xff] }
 0x2fe   : > { %6576 = vmatprep.subr.msk.bf16.mxu0 %vm6575_vm7, %v11168_v45  ;;  %v4145_v17 = vmul.f32 %v3669_v26, %v11702_v9  ;;  %vm11703_vm7 = vnez %v11652_v4  ;;  %vm11704_vm14 = vmand %vm11666_vm2, %vm11665_vm10  ;;  %v1176_v56 = vfloor.f32 %v1112_v40  ;;  %vm10018_vm8 = vcmp.eq.f32.partialorder %v1175_v21, %v8046_v47  ;;  %v3681_v13 = vpop.f32.mrb[22].mxu1 }
 0x2ff   : > { %6542 = vmatpush3.bf16.msk.msra.mxu1 %vm11703_vm7, %v11168_v45  ;;  %vm10013_vm4 = vmpackc.low %vm1359_vm15, %vm11704_vm14  ;;  %v920_v10 = vfloor.f32 %v856_v51  ;;  %v10023_v14 = vmul.f32 %v3671_v5, %v11709_v49  ;;  %v1130_v29 = vmul.f32 0.125, %v1065_v58  ;;  %v1193_v42 = vfloor.f32 %v1129_v2  ;;  %v3683_v46 = vpop.f32.mrb[23].mxu1  ;;  %v11730_v5 = vld [vmem:[#allocation61_spill] sm:$0xff] }
 0x300   : > { %6544 = vmatprep.subr.msk.bf16.mxu1 %vm9868_vm13, %v11168_v45  ;;  %vm1372_vm10 = vmand %vm9976_vm1, %vm10018_vm8  ;;  %v921_v18 = vfloor.f32 %v9985_v19  ;;  %v4149_v54 = vmul.f32 %v3673_v1, %v2033_v53  ;;  %vm1309_vm11 = vcmp.eq.f32.partialorder %v1176_v56, %v8046_v47  ;;  %vm10049_vm15 = vcmp.eq.f32.partialorder %v936_v50, %v8147_v27  ;;  %4248 = vmatprep.mubr.f32.mxu1 %v4145_v17  ;;  %v3687_v21 = vpop.f32.mrb[24].mxu1  ;;  %v11731_v56 = vld [vmem:[#allocation63_spill] sm:$0xff]  ;;  %v11732_v49 = vld [vmem:[#allocation65_spill] sm:$0xff] }
 0x301   : > { %vm11710_vm2 = vmand %vm11697_vm0, %vm9932_vm6  ;;  %v984_v57 = vmul.f32 32.0, %v920_v10  ;;  %v1194_v20 = vfloor.f32 %v1130_v29  ;;  %vm10062_vm0 = vcmp.eq.f32.partialorder %v1193_v42, %v8046_v47  ;;  %vm11720_vm14 = vnez %v11674_v16  ;;  %v3689_v0 = vpop.f32.mrb[25].mxu1  ;;  %v11733_v42 = vld [vmem:[#allocation67_spill] sm:$0xff] }
 0x302   : > { %vm11711_vm13 = vmand %vm11699_vm3, %vm9946_vm12  ;;  %vm10057_vm12 = vcmp.eq.f32.partialorder %v937_v11, %v8147_v27  ;;  %v985_v50 = vmul.f32 32.0, %v921_v18  ;;  %v2037_v7 = vadd.f32 %v11722_v8, %v11721_v30  ;;  %v2039_v63 = vadd.f32 %v11723_v62, %v11692_v37  ;;  %v3691_v58 = vpop.f32.mrb[26].mxu1  ;;  %v11736_v8 = vld [vmem:[#allocation24_spill] sm:$0xff] }
 0x303   : > { %vm10043_vm9 = vmpackc.low %vm11711_vm13, %vm11710_vm2  ;;  %6546 = vmatpush3.bf16.msk.msra.mxu1 %vm11720_vm14, %v11168_v45  ;;  %v1048_v25 = vsub.f32 %v788_v60, %v984_v57  ;;  %v2043_v22 = vadd.f32 %v11724_v28, %v11721_v30  ;;  %v2045_v12 = vadd.f32 %v11725_v48, %v11692_v37  ;;  %v2049_v32 = vadd.f32 %v11726_v39, %v11721_v30  ;;  %v3693_v9 = vpop.f32.mrb[27].mxu1  ;;  %v11739_v28 = vld [vmem:[#allocation95_spill] sm:$0xff] }
 0x304   : > { %vm1373_vm6 = vmand %vm9995_vm5, %vm1309_vm11  ;;  %6548 = vmatprep.subr.msk.bf16.mxu1 %vm10013_vm4, %v11168_v45  ;;  %vm1327_vm5 = vcmp.eq.f32.partialorder %v1194_v20, %v8046_v47  ;;  %v1049_v16 = vsub.f32 %v789_v36, %v985_v50  ;;  %v4152_v31 = vmul.f32 %v3677_v55, %v2037_v7  ;;  %v4153_v15 = vmul.f32 %v3679_v44, %v2039_v63  ;;  %v11738_v55 = vld [vmem:[#allocation26_spill] sm:$0xff] }
 0x305   : > { %vm6577_vm3 = vmpackc.low %vm1373_vm6, %vm1372_vm10  ;;  %v1113_v52 = vmul.f32 0.125, %v1048_v25  ;;  %vm1246_vm4 = vcmp.eq.f32.partialorder %v920_v10, %v8147_v27  ;;  %v4156_v36 = vmul.f32 %v3681_v13, %v2043_v22  ;;  %vm1247_vm10 = vcmp.eq.f32.partialorder %v921_v18, %v8147_v27  ;;  %v11728_v27 = vld [vmem:[#allocation52_spill] sm:$0xff]  ;;  %v3697_v10 = vpop.f32.mrb[28].mxu1  ;;  %v11735_v25 = vld [vmem:[#allocation93_spill] sm:$0xff] }
 0x306   : > { %6578 = vmatpush3.bf16.msk.msra.mxu0 %vm6577_vm3, %v11168_v45  ;;  %vm1390_vm7 = vmand %vm10049_vm15, %vm10062_vm0  ;;  %v1114_v11 = vmul.f32 0.125, %v1049_v16  ;;  %v4157_v24 = vmul.f32 %v3683_v46, %v2045_v12  ;;  %v2051_v40 = vadd.f32 %v11727_v43, %v11692_v37  ;;  %v2055_v51 = vadd.f32 %v11728_v27, %v11721_v30  ;;  %v3699_v29 = vpop.f32.mrb[29].mxu1  ;;  %v11737_v16 = vld [vmem:[#allocation94_spill] sm:$0xff] }
 0x307   : > { %vm1391_vm8 = vmand %vm10057_vm12, %vm1327_vm5  ;;  %6550 = vmatpush3.bf16.msk.msra.mxu1 %vm10043_vm9, %v11168_v45  ;;  %v1177_v60 = vfloor.f32 %v1113_v52  ;;  %v4160_v19 = vmul.f32 %v3687_v21, %v2049_v32  ;;  %v2061_v6 = vadd.f32 %v11730_v5, %v11721_v30  ;;  %v2063_v4 = vadd.f32 %v11731_v56, %v11692_v37  ;;  %v3701_v34 = vpop.f32.mrb[30].mxu1  ;;  %v11745_v32 = vld [vmem:[#allocation42_spill] sm:$0xff]  ;;  %v11746_v21 = vld [vmem:[#allocation35_spill] sm:$0xff] }
 0x308   : > { %vm6579_vm1 = vmpackc.low %vm1391_vm8, %vm1390_vm7  ;;  %v1178_v53 = vfloor.f32 %v1114_v11  ;;  %v4161_v33 = vmul.f32 %v3689_v0, %v2051_v40  ;;  %v4164_v2 = vmul.f32 %v3691_v58, %v2055_v51  ;;  %v2069_v18 = vadd.f32 %v11733_v42, %v11692_v37  ;;  %v3703_v57 = vpop.f32.mrb[31].mxu1  ;;  %v11741_v11 = vld [vmem:[#allocation30_spill] sm:$0xff]  ;;  %v11747_v51 = vld [vmem:[#allocation31_spill] sm:$0xff]  ;;  %v10136_v58 = vpop.f32.mrb[40].mxu0 }
 0x309   : > { %6580 = vmatprep.subr.msk.bf16.mxu0 %vm6579_vm1, %v11168_v45  ;;  %vm1310_vm2 = vcmp.eq.f32.partialorder %v1177_v60, %v8046_v47  ;;  %v4168_v1 = vmul.f32 %v3697_v10, %v2061_v6  ;;  %v3740_v20 = vpop.f32.mrb[32].mxu1  ;;  %v11748_v0 = vld [vmem:[#allocation37_spill] sm:$0xff]  ;;  %v11750_v5 = vld [vmem:[#allocation74_spill] sm:$0xff]  ;;  %vm10998_vm7 = vcmask 523264  }
 0x30a   : > { %4249 = vmatmul.mubr.f32.vlgmr.msra.gmra.mrb[64].mxu1 %v9988_v38  ;;  %vm1311_vm13 = vcmp.eq.f32.partialorder %v1178_v53, %v8046_v47  ;;  %vm1374_vm11 = vmand %vm1246_vm4, %vm1310_vm2  ;;  %v11729_v38 = vld [vmem:[#allocation56_spill] sm:$0xff]  ;;  %v4173_v3 = vmul.f32 %v3703_v57, %v2069_v18  ;;  %v3814_v59 = vadd.f32 %v11734_v23, %v3740_v20  ;;  %v3742_v50 = vpop.f32.mrb[33].mxu1  ;;  %v11751_v10 = vld [vmem:[#allocation77_spill] sm:$0xff] }
 0x30b   : > { %4253 = vmatprep.mubr.f32.mxu1 %v4149_v54  ;;  %vm1375_vm9 = vmand %vm1247_vm10, %vm1311_vm13  ;;  %v2057_v26 = vadd.f32 %v11729_v38, %v11692_v37  ;;  %v4169_v54 = vmul.f32 %v3699_v29, %v2063_v4  ;;  %v3744_v37 = vpop.f32.mrb[34].mxu1  ;;  %v11753_v42 = vld [vmem:[#allocation98_spill] sm:$0xff]  ;;  %v11755_v57 = vld [vmem:[#allocation68_spill] sm:$0xff] }
 0x30c   : > { %vm6581_vm15 = vmpackc.low %vm1375_vm9, %vm1374_vm11  ;;  %v4146_v7 = vmul.f32 %v3814_v59, %v11736_v8  ;;  %v3818_v62 = vadd.f32 %v11737_v16, %v3744_v37  ;;  %v3746_v63 = vpop.f32.mrb[35].mxu1  ;;  %v11756_v20 = vld [vmem:[#allocation55_spill] sm:$0xff]  ;;  %v11757_v59 = vld [vmem:[#allocation57_spill] sm:$0xff] }
 0x30d   : > { %6582 = vmatpush3.bf16.msk.msra.mxu0 %vm6581_vm15, %v11168_v45  ;;  %v4165_v17 = vmul.f32 %v3693_v9, %v2057_v26  ;;  %v3820_v22 = vadd.f32 %v11739_v28, %v3746_v63  ;;  %v3750_v12 = vpop.f32.mrb[36].mxu1  ;;  %v11749_v26 = vld [vmem:[#allocation39_spill] sm:$0xff]  ;;  %v11760_v63 = vld [vmem:[#allocation62_spill] sm:$0xff] }
 0x30e   : > { %4254 = vmatmul.mubr.f32.gmra.mrb[66].mxu1 %v10023_v14  ;;  %v2067_v14 = vadd.f32 %v11732_v49, %v11721_v30  ;;  %v3816_v30 = vadd.f32 %v11735_v25, %v3742_v50  ;;  %v3752_v60 = vpop.f32.mrb[37].mxu1 }
 0x30f   : > { %4258 = vmatprep.mubr.f32.mxu1 %v4153_v15  ;;  %v4151_v48 = vmul.f32 %v3820_v22, %v11741_v11  ;;  %v11742_v15 = vld [vmem:[#allocation23_spill] sm:$0xff]  ;;  %v3754_v53 = vpop.f32.mrb[38].mxu1 }
 0x310   : > { %v4172_v41 = vmul.f32 %v3701_v34, %v2067_v14  ;;  %v4147_v52 = vmul.f32 %v3816_v30, %v11738_v55  ;;  %v3824_v13 = vadd.f32 %v11742_v15, %v3750_v12  ;;  %v3828_v43 = vadd.f32 %v11745_v32, %v3754_v53  ;;  %v3756_v40 = vpop.f32.mrb[39].mxu1  ;;  %v11754_v34 = vld [vmem:[#allocation47_spill] sm:$0xff]  ;;  %v11763_v15 = vld [vmem:[#allocation66_spill] sm:$0xff] }
 0x311   : > { %v3760_v9 = vpop.f32.mrb[40].mxu1  ;;  %v11758_v30 = vld [vmem:[#allocation79_spill] sm:$0xff] }
 0x312   : > { %4259 = vmatmul.mubr.f32.gmra.mrb[68].mxu1 %v4152_v31  ;;  %v11740_v31 = vld [vmem:[#allocation27_spill] sm:$0xff]  ;;  %4353 = vmatprep.mubr.f32.mxu0 %v4147_v52  ;;  %v4158_v38 = vmul.f32 %v3828_v43, %v11748_v0  ;;  %v3834_v6 = vadd.f32 %v11750_v5, %v3760_v9  ;;  %v3762_v56 = vpop.f32.mrb[41].mxu1  ;;  %v11761_v52 = vld [vmem:[#allocation81_spill] sm:$0xff]  ;;  %v11777_v5 = vld [vmem:[#allocation18_spill] sm:$0xff] }
 0x313   : > { %4263 = vmatprep.mubr.f32.mxu1 %v4157_v24  ;;  %v4150_v44 = vmul.f32 %v3818_v62, %v11740_v31  ;;  %4354 = vmatmul.mubr.f32.vlgmr.msra.gmra.mrb[56].mxu0 %v4146_v7  ;;  %v11744_v24 = vld [vmem:[#allocation33_spill] sm:$0xff]  ;;  %v3836_v49 = vadd.f32 %v11751_v10, %v3762_v56  ;;  %v3764_v14 = vpop.f32.mrb[42].mxu1  ;;  %v11759_v7 = vld [vmem:[#allocation70_spill] sm:$0xff] }
 0x314   : > { %4358 = vmatprep.mubr.f32.mxu0 %v4151_v48  ;;  %v4154_v39 = vmul.f32 %v3824_v13, %v11744_v24  ;;  %v3838_v18 = vadd.f32 %v11753_v42, %v3764_v14  ;;  %v11765_v24 = vmov 0.0  }
 0x316   : > { %4264 = vmatmul.mubr.f32.gmra.mrb[70].mxu1 %v4156_v36  ;;  %v11743_v36 = vld [vmem:[#allocation25_spill] sm:$0xff]  ;;  %v4166_v23 = vmul.f32 %v3838_v18, %v11756_v20 }
 0x317   : > { %4268 = vmatprep.mubr.f32.mxu1 %v4161_v33  ;;  %v3826_v46 = vadd.f32 %v11743_v36, %v3752_v60  ;;  %4359 = vmatmul.mubr.f32.gmra.mrb[58].mxu0 %v4150_v44  ;;  %v11762_v44 = vld [vmem:[#allocation64_spill] sm:$0xff]  ;;  %v11764_v60 = vld [vmem:[#allocation69_spill] sm:$0xff] }
 0x319   : > { %v4155_v27 = vmul.f32 %v3826_v46, %v11746_v21 }
 0x31a   : > { %4269 = vmatmul.mubr.f32.gmra.mrb[72].mxu1 %v4160_v19  ;;  %v3830_v19 = vadd.f32 %v11747_v51, %v3756_v40 }
 0x31b   : > { %4273 = vmatprep.mubr.f32.mxu1 %v4165_v17  ;;  %4363 = vmatprep.mubr.f32.mxu0 %v4155_v27 }
 0x31c   : > { %v4159_v33 = vmul.f32 %v3830_v19, %v11749_v26  ;;  %4364 = vmatmul.mubr.f32.gmra.mrb[60].mxu0 %v4154_v39  ;;  %v11774_v19 = vld [vmem:[#allocation13_spill] sm:$0xff] }
 0x31d   : > { %v1526_v0 = vmul.f32 0.0625, %v11774_v19 }
 0x31e   : > { %4274 = vmatmul.mubr.f32.gmra.mrb[74].mxu1 %v4164_v2  ;;  %v10138_v2 = vpop.f32.mrb[41].mxu0  ;;  %4368 = vmatprep.mubr.f32.mxu0 %v4159_v33  ;;  %v11776_v33 = vld [vmem:[#allocation17_spill] sm:$0xff] }
 0x31f   : > { %4278 = vmatprep.mubr.f32.mxu1 %v4169_v54  ;;  %v10140_v17 = vpop.f32.mrb[42].mxu0  ;;  %v3766_v54 = vpop.f32.mrb[43].mxu1  ;;  %v1528_v9 = vmul.f32 0.0625, %v11776_v33  ;;  %v10189_v56 = vfloor.f32 %v1526_v0  ;;  %v4179_v0 = vld [vmem:[%s10246_s8 + $0x18] sm:$0xff] }
 0x320   : > { %v10143_v4 = vpop.f32.mrb[43].mxu0  ;;  %4369 = vmatmul.mubr.f32.gmra.mrb[62].mxu0 %v4158_v38  ;;  %v3770_v25 = vpop.f32.mrb[44].mxu1  ;;  %v11775_v38 = vld [vmem:[#allocation14_spill] sm:$0xff] }
 0x321   : > { %v3844_v37 = vadd.f32 %v11758_v30, %v3770_v25  ;;  %v3772_v8 = vpop.f32.mrb[45].mxu1  ;;  %v10156_v31 = vpop.f32.mrb[44].mxu0  ;;  %v1527_v26 = vmul.f32 0.0625, %v11775_v38  ;;  %vm1742_vm6 = vcmp.eq.f32.partialorder %v10189_v56, %v8046_v47 }
 0x322   : > { %4279 = vmatmul.mubr.f32.gmra.mrb[76].mxu1 %v4168_v1  ;;  %v11752_v1 = vld [vmem:[#allocation44_spill] sm:$0xff]  ;;  %v3846_v16 = vadd.f32 %v11759_v7, %v3772_v8  ;;  %v3774_v62 = vpop.f32.mrb[46].mxu1  ;;  %v10160_v12 = vpop.f32.mrb[45].mxu0 }
 0x323   : > { %4283 = vmatprep.mubr.f32.mxu1 %v4173_v3  ;;  %v4162_v29 = vmul.f32 %v3834_v6, %v11752_v1  ;;  %v3840_v3 = vadd.f32 %v11755_v57, %v3766_v54  ;;  %v4170_v55 = vmul.f32 %v3844_v37, %v11760_v63  ;;  %v3848_v28 = vadd.f32 %v11761_v52, %v3774_v62  ;;  %v3776_v22 = vpop.f32.mrb[47].mxu1  ;;  %v10164_v46 = vpop.f32.mrb[46].mxu0  ;;  %v4176_v7 = vld [vmem:[%s10246_s8] sm:$0xff]  ;;  %v4177_v52 = vld [vmem:[%s10246_s8 + $0x8] sm:$0xff] }
 0x324   : > { %v4171_v11 = vmul.f32 %v3846_v16, %v11762_v44  ;;  %v3850_v48 = vadd.f32 %v9520_v61, %v3776_v22  ;;  %v10166_v53 = vpop.f32.mrb[47].mxu0  ;;  %v1529_v6 = vmul.f32 0.0625, %v11777_v5  ;;  %v10191_v10 = vfloor.f32 %v1527_v26 }
 0x325   : > { %v4167_v50 = vmul.f32 %v3840_v3, %v11757_v59  ;;  %v4174_v13 = vmul.f32 %v3848_v28, %v11763_v15  ;;  %v10169_v39 = vpop.f32.mrb[48].mxu0 }
 0x326   : > { %4284 = vmatmul.mubr.f32.gmra.mrb[78].mxu1 %v4172_v41  ;;  %v4163_v41 = vmul.f32 %v3836_v49, %v11754_v34  ;;  %v4175_v36 = vmul.f32 %v3850_v48, %v11764_v60  ;;  %11766 = vst [vmem:[#allocation71_spill] sm:$0xff] %v10169_v39  ;;  %v10171_v32 = vpop.f32.mrb[49].mxu0  ;;  %v10193_v49 = vfloor.f32 %v1528_v9  ;;  %v10195_v14 = vfloor.f32 %v1529_v6  ;;  %v4178_v48 = vld [vmem:[%s10246_s8 + $0x10] sm:$0xff] }
 0x327   : > { %11767 = vst [vmem:[#allocation83_spill] sm:$0xff] %v10171_v32  ;;  %v10173_v61 = vpop.f32.mrb[50].mxu0  ;;  %vm1743_vm12 = vcmp.eq.f32.partialorder %v10191_v10, %v8046_v47 }
 0x328   : > { %4373 = vmatprep.mubr.f32.mxu0 %v4163_v41  ;;  %11768 = vst [vmem:[#allocation46_spill] sm:$0xff] %v10173_v61  ;;  %v10175_v43 = vpop.f32.mrb[51].mxu0  ;;  %vm1744_vm0 = vcmp.eq.f32.partialorder %v10193_v49, %v8046_v47  ;;  %vm1745_vm14 = vcmp.eq.f32.partialorder %v10195_v14, %v8046_v47  ;;  %vm6583_vm3 = vmpackc.low %vm1743_vm12, %vm1742_vm6 }
 0x329   : > { %4374 = vmatmul.mubr.f32.gmra.mrb[64].mxu0 %v4162_v29  ;;  %11769 = vst [vmem:[#allocation29_spill] sm:$0xff] %v10175_v43  ;;  %v10177_v40 = vpop.f32.mrb[52].mxu0  ;;  %6584 = vmatprep.subr.msk.bf16.mxu1 %vm6583_vm3, %v11168_v45  ;;  %vm6587_vm5 = vmpackc.low %vm1745_vm14, %vm1744_vm0 }
 0x32a   : > { %4378 = vmatprep.mubr.f32.mxu0 %v4167_v50  ;;  %11770 = vst [vmem:[#allocation73_spill] sm:$0xff] %v10177_v40  ;;  %v10179_v21 = vpop.f32.mrb[53].mxu0  ;;  %6586 = vmatpush3.bf16.msk.msra.mxu1 %vm6583_vm3, %v11168_v45 }
 0x32b   : > { %11771 = vst [vmem:[#allocation85_spill] sm:$0xff] %v10179_v21  ;;  %v10181_v27 = vpop.f32.mrb[54].mxu0  ;;  %6588 = vmatprep.subr.msk.bf16.mxu1 %vm6587_vm5, %v11168_v45 }
 0x32c   : > { %11772 = vst [vmem:[#allocation48_spill] sm:$0xff] %v10181_v27  ;;  %v10183_v51 = vpop.f32.mrb[55].mxu0 }
 0x32d   : > { %4379 = vmatmul.mubr.f32.gmra.mrb[66].mxu0 %v4166_v23  ;;  %11773 = vst [vmem:[#allocation96_spill] sm:$0xff] %v10183_v51 }
 0x32e   : > { %4383 = vmatprep.mubr.f32.mxu0 %v4171_v11  ;;  %6590 = vmatpush3.bf16.msk.msra.mxu1 %vm6587_vm5, %v11168_v45 }
 0x331   : > { %4384 = vmatmul.mubr.f32.gmra.mrb[68].mxu0 %v4170_v55 }
 0x332   : > { %4388 = vmatprep.mubr.f32.mxu0 %v4175_v36 }
 0x335   : > { %4389 = vmatmul.mubr.f32.gmra.mrb[70].mxu0 %v4174_v13 }
 0x336   : > { %4684 = vmatprep.mubr.f32.mxu0 %v11765_v24 }
 0x3a1   : > { %v10197_v1 = vpop.f32.mrb[48].mxu1 }
 0x3a2   : > { %v10199_v29 = vpop.f32.mrb[49].mxu1 }
 0x3a3   : > { %v10209_v42 = vpop.f32.mrb[50].mxu1 }
 0x3a4   : > { %v10211_v18 = vpop.f32.mrb[51].mxu1 }
 0x3b9   : > { %v10216_v54 = vpop.f32.mrb[52].mxu1 }
 0x3ba   : > { %v10219_v34 = vpop.f32.mrb[53].mxu1 }
 0x3bb   : > { %v10221_v41 = vpop.f32.mrb[54].mxu1 }
 0x3bc   : > { %v10223_v57 = vpop.f32.mrb[55].mxu1 }
 0x3c1   : > { %v10225_v3 = vpop.f32.mrb[56].mxu1 }
 0x3c2   : > { %v10227_v20 = vpop.f32.mrb[57].mxu1 }
 0x3c3   : > { %11778 = vst [vmem:[#allocation97_spill] sm:$0xff] %v10227_v20  ;;  %v10229_v23 = vpop.f32.mrb[58].mxu1 }
 0x3c4   : > { %11779 = vst [vmem:[#allocation50_spill] sm:$0xff] %v10229_v23  ;;  %v10231_v59 = vpop.f32.mrb[59].mxu1 }
 0x3c5   : > { %11780 = vst [vmem:[#allocation53_spill] sm:$0xff] %v10231_v59 }
 0x3cb   : > { %v10233_v50 = vpop.f32.mrb[60].mxu1 }
 0x3cc   : > { %11781 = vst [vmem:[#allocation51_spill] sm:$0xff] %v10233_v50  ;;  %v10235_v25 = vpop.f32.mrb[61].mxu1 }
 0x3cd   : > { %11782 = vst [vmem:[#allocation58_spill] sm:$0xff] %v10235_v25  ;;  %v10237_v30 = vpop.f32.mrb[62].mxu1 }
 0x3ce   : > { %11783 = vst [vmem:[#allocation59_spill] sm:$0xff] %v10237_v30  ;;  %v10239_v37 = vpop.f32.mrb[63].mxu1  ;;  %v4183_v30 = vld [vmem:[%s10246_s8 + $0x38] sm:$0xff] }
 0x3cf   : > { %11784 = vst [vmem:[#allocation75_spill] sm:$0xff] %v10239_v37 }
 0x3dd   : > { %v6297_v8 = vpop.f32.mrb[64].mxu1 }
 0x3de   : > { %v6298_v16 = vpop.f32.mrb[65].mxu1 }
 0x3df   : > { %v6299_v62 = vadd.f32 %v6298_v16, %v6297_v8 }
 0x3e1   : > { %v4251_v63 = vadd.f32 %v6299_v62, %v4176_v7  ;;  %v6300_v55 = vpop.f32.mrb[66].mxu1  ;;  %v4180_v7 = vld [vmem:[%s10246_s8 + $0x20] sm:$0xff] }
 0x3e2   : > { %v6301_v28 = vpop.f32.mrb[67].mxu1 }
 0x3e3   : > { %v6302_v22 = vadd.f32 %v6301_v28, %v6300_v55 }
 0x3e5   : > { %v4256_v44 = vadd.f32 %v6302_v22, %v4177_v52  ;;  %v6303_v11 = vpop.f32.mrb[68].mxu1  ;;  %v4181_v52 = vld [vmem:[%s10246_s8 + $0x28] sm:$0xff] }
 0x3e6   : > { %v6304_v15 = vpop.f32.mrb[69].mxu1 }
 0x3e7   : > { %v6305_v13 = vadd.f32 %v6304_v15, %v6303_v11  ;;  %v4182_v11 = vld [vmem:[%s10246_s8 + $0x30] sm:$0xff] }
 0x3e9   : > { %v4261_v60 = vadd.f32 %v6305_v13, %v4178_v48  ;;  %v6306_v36 = vpop.f32.mrb[70].mxu1 }
 0x3ea   : > { %v6307_v26 = vpop.f32.mrb[71].mxu1 }
 0x3eb   : > { %v6308_v9 = vadd.f32 %v6307_v26, %v6306_v36 }
 0x3ed   : > { %v4266_v6 = vadd.f32 %v6308_v9, %v4179_v0  ;;  %v6309_v8 = vpop.f32.mrb[72].mxu1  ;;  %v6353_v9 = vpop.f32.mrb[56].mxu0 }
 0x3ee   : > { %v6310_v16 = vpop.f32.mrb[73].mxu1  ;;  %v6354_v21 = vpop.f32.mrb[57].mxu0 }
 0x3ef   : > { %v6311_v62 = vadd.f32 %v6310_v16, %v6309_v8  ;;  %v6355_v25 = vadd.f32 %v6354_v21, %v6353_v9  ;;  %v6356_v8 = vpop.f32.mrb[58].mxu0 }
 0x3f0   : > { %v6357_v16 = vpop.f32.mrb[59].mxu0 }
 0x3f1   : > { %v4271_v35 = vadd.f32 %v6311_v62, %v4180_v7  ;;  %v6312_v55 = vpop.f32.mrb[74].mxu1  ;;  %v10256_v7 = vadd.f32 %v6355_v25, %v4251_v63  ;;  %v6358_v62 = vadd.f32 %v6357_v16, %v6356_v8 }
 0x3f2   : > { %v6313_v28 = vpop.f32.mrb[75].mxu1 }
 0x3f3   : > { %v6314_v22 = vadd.f32 %v6313_v28, %v6312_v55  ;;  %v4395_v55 = vsel %vm10998_vm7, %v10256_v7, -inf }
 0x3f4   : > { %4396 = vmax.xlane.f32.xlu0 %v4395_v55 }
 0x3f5   : > { %v4276_v51 = vadd.f32 %v6314_v22, %v4181_v52  ;;  %v6315_v37 = vpop.f32.mrb[76].mxu1  ;;  %v10260_v52 = vadd.f32 %v6358_v62, %v4256_v44 }
 0x3f6   : > { %v6316_v48 = vpop.f32.mrb[77].mxu1 }
 0x3f7   : > { %v6317_v15 = vadd.f32 %v6316_v48, %v6315_v37  ;;  %v6359_v37 = vpop.f32.mrb[60].mxu0 }
 0x3f8   : > { %v6360_v28 = vpop.f32.mrb[61].mxu0 }
 0x3f9   : > { %v4281_v13 = vadd.f32 %v6317_v15, %v4182_v11  ;;  %v6318_v27 = vpop.f32.mrb[78].mxu1  ;;  %v6361_v22 = vadd.f32 %v6360_v28, %v6359_v37  ;;  %v6362_v21 = vpop.f32.mrb[62].mxu0  ;;  %v11785_v28 = vld [vmem:[#allocation21_spill] sm:$0xff] }
 0x3fa   : > { %v6319_v36 = vpop.f32.mrb[79].mxu1  ;;  %v6363_v25 = vpop.f32.mrb[63].mxu0 }
 0x3fb   : > { %v6320_v0 = vadd.f32 %v6319_v36, %v6318_v27  ;;  %v4398_v27 = vsel %vm10998_vm7, %v10260_v52, -inf  ;;  %v6364_v63 = vadd.f32 %v6363_v25, %v6362_v21 }
 0x3fc   : > { %4399 = vmax.xlane.f32.xlu0 %v4398_v27  ;;  %v6365_v48 = vpop.f32.mrb[64].mxu0  ;;  %v11786_v27 = vld [vmem:[#allocation22_spill] sm:$0xff] }
 0x3fd   : > { %v4286_v26 = vadd.f32 %v6320_v0, %v4183_v30  ;;  %v10264_v30 = vadd.f32 %v6361_v22, %v4261_v60  ;;  %v10268_v15 = vadd.f32 %v6364_v63, %v4266_v6  ;;  %v6366_v44 = vpop.f32.mrb[65].mxu0  ;;  %v1530_v22 = vmul.f32 0.0625, %v11785_v28 }
 0x3fe   : > { %v6367_v36 = vadd.f32 %v6366_v44, %v6365_v48  ;;  %v1531_v21 = vmul.f32 0.0625, %v11786_v27 }
 0x3ff   : > { %v4401_v11 = vsel %vm10998_vm7, %v10264_v30, -inf  ;;  %v4404_v0 = vsel %vm10998_vm7, %v10268_v15, -inf }
 0x400   : > { %4402 = vmax.xlane.f32.xlu1 %v4401_v11  ;;  %v6368_v9 = vpop.f32.mrb[66].mxu0  ;;  %v10272_v8 = vadd.f32 %v6367_v36, %v4271_v35  ;;  %v10282_v35 = vfloor.f32 %v1530_v22  ;;  %v10284_v11 = vfloor.f32 %v1531_v21 }
 0x401   : > { %v6369_v60 = vpop.f32.mrb[67].mxu0 }
 0x402   : > { %v6370_v16 = vadd.f32 %v6369_v60, %v6368_v9  ;;  %v4407_v62 = vsel %vm10998_vm7, %v10272_v8, -inf  ;;  %vm1746_vm8 = vcmp.eq.f32.partialorder %v10282_v35, %v8046_v47  ;;  %vm1747_vm1 = vcmp.eq.f32.partialorder %v10284_v11, %v8046_v47  ;;  %v11787_v9 = vld [vmem:[#allocation40_spill] sm:$0xff] }
 0x403   : > { %4408 = vmax.xlane.f32.xlu0 %v4407_v62  ;;  %vm6591_vm4 = vmpackc.low %vm1747_vm1, %vm1746_vm8  ;;  %v1532_v60 = vmul.f32 0.0625, %v11787_v9 }
 0x404   : > { %4405 = vmax.xlane.f32.xlu1 %v4404_v0  ;;  %v6371_v55 = vpop.f32.mrb[68].mxu0  ;;  %v10276_v37 = vadd.f32 %v6370_v16, %v4276_v51  ;;  %v11788_v16 = vld [vmem:[#allocation41_spill] sm:$0xff]  ;;  %6592 = vmatprep.subr.msk.bf16.mxu1 %vm6591_vm4, %v11168_v45 }
 0x405   : > { %v6372_v6 = vpop.f32.mrb[69].mxu0  ;;  %v1533_v62 = vmul.f32 0.0625, %v11788_v16  ;;  %6594 = vmatpush3.bf16.msk.msra.mxu1 %vm6591_vm4, %v11168_v45 }
 0x406   : > { %v6373_v25 = vadd.f32 %v6372_v6, %v6371_v55  ;;  %v4410_v63 = vsel %vm10998_vm7, %v10276_v37, -inf  ;;  %v10300_v55 = vfloor.f32 %v1532_v60 }
 0x407   : > { %v10302_v6 = vfloor.f32 %v1533_v62  ;;  %v1544_v62 = vmul.f32 16.0, %v10193_v49 }
 0x408   : > { %4411 = vmax.xlane.f32.xlu1 %v4410_v63  ;;  %v6374_v48 = vpop.f32.mrb[70].mxu0  ;;  %v10286_v44 = vadd.f32 %v6373_v25, %v4281_v13  ;;  %vm1748_vm10 = vcmp.eq.f32.partialorder %v10300_v55, %v8046_v47  ;;  %v11790_v25 = vld [vmem:[#allocation16_spill] sm:$0xff] }
 0x409   : > { %v6375_v36 = vpop.f32.mrb[71].mxu0  ;;  %vm1749_vm2 = vcmp.eq.f32.partialorder %v10302_v6, %v8046_v47  ;;  %v1558_v63 = vmul.f32 0.03125, %v11790_v25  ;;  %v10331_v59 = vsub.f32 %v11776_v33, %v1544_v62 }
 0x40a   : > { %v6376_v51 = vadd.f32 %v6375_v36, %v6374_v48  ;;  %v4413_v0 = vsel %vm10998_vm7, %v10286_v44, -inf  ;;  %vm6595_vm13 = vmpackc.low %vm1749_vm2, %vm1748_vm10  ;;  %v1542_v36 = vmul.f32 16.0, %v10189_v56 }
 0x40b   : > { %4414 = vmax.xlane.f32.xlu0 %v4413_v0  ;;  %6596 = vmatprep.subr.msk.bf16.mxu1 %vm6595_vm13, %v11168_v45  ;;  %v1543_v0 = vmul.f32 16.0, %v10191_v10 }
 0x40c   : > { %v10297_v13 = vadd.f32 %v6376_v51, %v4286_v26  ;;  %6598 = vmatpush3.bf16.msk.msra.mxu1 %vm6595_vm13, %v11168_v45  ;;  %v11789_v26 = vld [vmem:[#allocation15_spill] sm:$0xff]  ;;  %v10315_v51 = vfloor.f32 %v1558_v63 }
 0x40d   : > { %v1520_v21 = vadd.s32 128, %v11789_v26 }
 0x40e   : > { %v4416_v22 = vsel %vm10998_vm7, %v10297_v13, -inf  ;;  %v1566_v47 = vmul.f32 32.0, %v10315_v51  ;;  %vm1590_vm0 = vcmp.eq.f32.partialorder %v10331_v59, %v10315_v51 }
 0x40f   : > { %4417 = vmax.xlane.f32.xlu1 %v4416_v22  ;;  %v1523_v48 = vcvt.s32.f32 %v1520_v21  ;;  %v10321_v22 = vsub.f32 %v11774_v19, %v1542_v36  ;;  %v10327_v21 = vsub.f32 %v11775_v38, %v1543_v0  ;;  %v1545_v19 = vmul.f32 16.0, %v10195_v14 }
 0x410   : > { %v1570_v50 = vsub.f32 %v11790_v25, %v1566_v47 }
 0x411   : > { %v1559_v60 = vmul.f32 0.03125, %v1523_v48  ;;  %vm1582_vm11 = vcmp.eq.f32.partialorder %v10321_v22, %v10315_v51  ;;  %vm1586_vm9 = vcmp.eq.f32.partialorder %v10327_v21, %v10315_v51  ;;  %v10361_v33 = vsub.f32 %v11777_v5, %v1545_v19 }
 0x412   : > { %v1574_v43 = vmul.f32 0.125, %v1570_v50 }
 0x413   : > { %v10323_v40 = vfloor.f32 %v1559_v60 }
 0x414   : > { %v10333_v23 = vfloor.f32 %v1574_v43 }
 0x415   : > { %v1567_v63 = vmul.f32 32.0, %v10323_v40  ;;  %vm1583_vm3 = vcmp.eq.f32.partialorder %v10321_v22, %v10323_v40  ;;  %vm1587_vm8 = vcmp.eq.f32.partialorder %v10327_v21, %v10323_v40 }
 0x416   : > { %vm1614_vm15 = vcmp.eq.f32.partialorder %v10189_v56, %v10333_v23  ;;  %vm1618_vm6 = vcmp.eq.f32.partialorder %v10191_v10, %v10333_v23  ;;  %vm1622_vm14 = vcmp.eq.f32.partialorder %v10193_v49, %v10333_v23 }
 0x417   : > { %v1571_v61 = vsub.f32 %v1523_v48, %v1567_v63  ;;  %vm10344_vm12 = vmand %vm1582_vm11, %vm1614_vm15  ;;  %vm1591_vm11 = vcmp.eq.f32.partialorder %v10331_v59, %v10323_v40 }
 0x418   : > { %vm10356_vm5 = vmand %vm1586_vm9, %vm1618_vm6  ;;  %vm1595_vm6 = vcmp.eq.f32.partialorder %v10361_v33, %v10323_v40 }
 0x419   : > { %v1575_v25 = vmul.f32 0.125, %v1571_v61  ;;  %vm6601_vm1 = vmpackc.low %vm10356_vm5, %vm10344_vm12 }
 0x41a   : > { %vm10373_vm2 = vmand %vm1590_vm0, %vm1622_vm14  ;;  %vm1594_vm14 = vcmp.eq.f32.partialorder %v10361_v33, %v10315_v51 }
 0x41b   : > { %v10352_v43 = vfloor.f32 %v1575_v25 }
 0x41d   : > { %vm1615_vm4 = vcmp.eq.f32.partialorder %v10189_v56, %v10352_v43  ;;  %vm1619_vm10 = vcmp.eq.f32.partialorder %v10191_v10, %v10352_v43  ;;  %vm1623_vm9 = vcmp.eq.f32.partialorder %v10193_v49, %v10352_v43  ;;  %vm1627_vm12 = vcmp.eq.f32.partialorder %v10195_v14, %v10352_v43 }
 0x41e   : > { %vm1647_vm13 = vmand %vm1583_vm3, %vm1615_vm4  ;;  %vm1626_vm3 = vcmp.eq.f32.partialorder %v10195_v14, %v10333_v23 }
 0x41f   : > { %vm1651_vm15 = vmand %vm1587_vm8, %vm1619_vm10 }
 0x420   : > { %vm6599_vm5 = vmpackc.low %vm1651_vm15, %vm1647_vm13 }
 0x421   : > { %6600 = vmatprep.subr.msk.bf16.mxu0 %vm6599_vm5, %v11168_v45  ;;  %vm1655_vm0 = vmand %vm1591_vm11, %vm1623_vm9 }
 0x422   : > { %6602 = vmatpush1.bf16.msk.msra.mxu0 %vm6601_vm1, %v11168_v45  ;;  %vm1659_vm4 = vmand %vm1595_vm6, %vm1627_vm12 }
 0x423   : > { %vm6603_vm8 = vmpackc.low %vm1659_vm4, %vm1655_vm0 }
 0x424   : > { %6604 = vmatprep.subr.msk.bf16.mxu0 %vm6603_vm8, %v11168_v45  ;;  %vm1658_vm10 = vmand %vm1594_vm14, %vm1626_vm3 }
 0x425   : > { %vm6605_vm7 = vmpackc.low %vm1658_vm10, %vm10373_vm2 }
 0x426   : > { %6606 = vmatpush1.bf16.msk.msra.mxu0 %vm6605_vm7, %v11168_v45  ;;  %vm11797_vm7 = vcmask 523264  }
 0x427   : > { %vm11798_vm1 = vmmov %vm11797_vm7 }
 0x428   : > { %vm11799_vm2 = vmmov %vm11798_vm1 }
 0x429   : > { %vm11800_vm13 = vmmov %vm11798_vm1 }
 0x42a   : > { %vm11801_vm11 = vmmov %vm11798_vm1 }
 0x42b   : > { %vm11802_vm9 = vmmov %vm11798_vm1 }
 0x42c   : > { %vm11803_vm15 = vmmov %vm11798_vm1 }
 0x42d   : > { %vm11804_vm6 = vmmov %vm11798_vm1 }
 0x481   : > { %v4397_v5 = vpop.xlane.xlu0 %4396 }
 0x482   : > { %v4419_v48 = vsub.f32 %v10256_v7, %v4397_v5 }
 0x484   : > { %v4427_v36 = vmul.f32 1.442695, %v4419_v48 }
 0x486   : > { %7356 = vpow2.f32 %v4427_v36 }
 0x489   : > { %v4400_v0 = vpop.xlane.xlu0 %4399 }
 0x48a   : > { %v4420_v60 = vsub.f32 %v10260_v52, %v4400_v0 }
 0x48c   : > { %v4429_v47 = vmul.f32 1.442695, %v4420_v60 }
 0x48d   : > { %v4403_v62 = vpop.xlane.xlu1 %4402 }
 0x48e   : > { %7358 = vpow2.f32 %v4429_v47  ;;  %v4421_v63 = vsub.f32 %v10264_v30, %v4403_v62 }
 0x490   : > { %v4431_v19 = vmul.f32 1.442695, %v4421_v63  ;;  %v10399_v61 = vpop.eup %7356  ;;  %v4409_v7 = vpop.xlane.xlu0 %4408 }
 0x491   : > { %v4406_v25 = vpop.xlane.xlu1 %4405  ;;  %6447 = vmatprep.mubr.msk.f32.mxu1 %vm11797_vm7, %v10399_v61  ;;  %v4423_v52 = vsub.f32 %v10272_v8, %v4409_v7  ;;  %v1521_v7 = vadd.s32 256, %v11789_v26 }
 0x492   : > { %7360 = vpow2.f32 %v4431_v19  ;;  %v4422_v38 = vsub.f32 %v10268_v15, %v4406_v25 }
 0x493   : > { %v4435_v48 = vmul.f32 1.442695, %v4423_v52 }
 0x494   : > { %v4433_v50 = vmul.f32 1.442695, %v4422_v38 }
 0x495   : > { %v4412_v36 = vpop.xlane.xlu1 %4411 }
 0x496   : > { %7362 = vpow2.f32 %v4433_v50  ;;  %v4424_v30 = vsub.f32 %v10276_v37, %v4412_v36 }
 0x497   : > { %7364 = vpow2.f32 %v4435_v48  ;;  %v1524_v48 = vcvt.s32.f32 %v1521_v7 }
 0x498   : > { %v10404_v5 = vpop.eup %7358  ;;  %v4437_v0 = vmul.f32 1.442695, %v4424_v30  ;;  %v4415_v60 = vpop.xlane.xlu0 %4414 }
 0x499   : > { %6448 = vmatmul.mubr.msk.f32.vlgmr.msra.gmra.mrb[80].mxu1 %vm11798_vm1, %v10404_v5  ;;  %v4425_v8 = vsub.f32 %v10286_v44, %v4415_v60  ;;  %v1560_v30 = vmul.f32 0.03125, %v1524_v48 }
 0x49a   : > { %7366 = vpow2.f32 %v4437_v0 }
 0x49b   : > { %v4439_v62 = vmul.f32 1.442695, %v4425_v8  ;;  %v10440_v60 = vfloor.f32 %v1560_v30 }
 0x49c   : > { %v10409_v15 = vpop.eup %7360  ;;  %v4418_v63 = vpop.xlane.xlu1 %4417 }
 0x49d   : > { %6450 = vmatprep.mubr.msk.f32.mxu1 %vm11799_vm2, %v10409_v15  ;;  %7368 = vpow2.f32 %v4439_v62  ;;  %v4426_v37 = vsub.f32 %v10297_v13, %v4418_v63  ;;  %v1522_v13 = vadd.s32 384, %v11789_v26  ;;  %v1568_v62 = vmul.f32 32.0, %v10440_v60 }
 0x49e   : > { %vm1584_vm4 = vcmp.eq.f32.partialorder %v10321_v22, %v10440_v60  ;;  %vm1588_vm7 = vcmp.eq.f32.partialorder %v10327_v21, %v10440_v60  ;;  %v1547_v26 = vmul.f32 16.0, %v10284_v11 }
 0x49f   : > { %v4441_v25 = vmul.f32 1.442695, %v4426_v37  ;;  %v1525_v52 = vcvt.s32.f32 %v1522_v13  ;;  %v1572_v37 = vsub.f32 %v1524_v48, %v1568_v62  ;;  %v7271_v62 = vld [vmem:[#allocation5 + $0x114] ss:$40 sps:$4 sm:$0xff]  }
 0x4a0   : > { %v10414_v47 = vpop.eup %7362 }
 0x4a1   : > { %6451 = vmatmul.mubr.msk.f32.gmra.mrb[82].mxu1 %vm11800_vm13, %v10414_v47  ;;  %v10419_v19 = vpop.eup %7364  ;;  %7370 = vpow2.f32 %v4441_v25  ;;  %v1561_v36 = vmul.f32 0.03125, %v1525_v52  ;;  %v1576_v32 = vmul.f32 0.125, %v1572_v37 }
 0x4a2   : > { %6453 = vmatprep.mubr.msk.f32.mxu1 %vm11801_vm11, %v10419_v19 }
 0x4a3   : > { %v10438_v0 = vfloor.f32 %v1561_v36  ;;  %v10446_v39 = vfloor.f32 %v1576_v32  ;;  %v1546_v32 = vmul.f32 16.0, %v10282_v35  ;;  %v7263_v36 = vld [vmem:[#allocation5 + $0x70] ss:$40 sps:$4 sm:$0xff]  }
 0x4a4   : > { %v10423_v38 = vpop.eup %7366 }
 0x4a5   : > { %6454 = vmatmul.mubr.msk.f32.gmra.mrb[84].mxu1 %vm11802_vm9, %v10423_v38  ;;  %v1569_v8 = vmul.f32 32.0, %v10438_v0  ;;  %vm1585_vm12 = vcmp.eq.f32.partialorder %v10321_v22, %v10438_v0  ;;  %vm1589_vm5 = vcmp.eq.f32.partialorder %v10327_v21, %v10438_v0  ;;  %vm1616_vm8 = vcmp.eq.f32.partialorder %v10189_v56, %v10446_v39  ;;  %v7272_v22 = vld [vmem:[#allocation5 + $0x160] ss:$40 sps:$4 sm:$0xff]  }
 0x4a6   : > { %vm1620_vm1 = vcmp.eq.f32.partialorder %v10191_v10, %v10446_v39  ;;  %vm1648_vm13 = vmand %vm1584_vm4, %vm1616_vm8  ;;  %vm1593_vm11 = vcmp.eq.f32.partialorder %v10331_v59, %v10438_v0  ;;  %v1549_v21 = vmul.f32 16.0, %v10302_v6 }
 0x4a7   : > { %v10427_v44 = vpop.eup %7368  ;;  %v1573_v63 = vsub.f32 %v1525_v52, %v1569_v8  ;;  %vm1652_vm9 = vmand %vm1588_vm7, %vm1620_vm1 }
 0x4a8   : > { %6456 = vmatprep.mubr.msk.f32.mxu1 %vm11803_vm15, %v10427_v44  ;;  %vm1597_vm15 = vcmp.eq.f32.partialorder %v10361_v33, %v10438_v0  ;;  %v1557_v7 = vsub.f32 %v11788_v16, %v1549_v21  ;;  %v7275_v21 = vld [vmem:[#allocation5 + $0x1b0] ss:$40 sps:$4 sm:$0xff]  }
 0x4a9   : > { %v1577_v25 = vmul.f32 0.125, %v1573_v63 }
 0x4ab   : > { %v10431_v50 = vpop.eup %7370  ;;  %v10444_v20 = vfloor.f32 %v1577_v25 }
 0x4ac   : > { %6457 = vmatmul.mubr.msk.f32.gmra.mrb[86].mxu1 %vm11804_vm6, %v10431_v50 }
 0x4ad   : > { %4797 = vmatprep.mubr.f32.mxu1 %v11765_v24  ;;  %vm1617_vm0 = vcmp.eq.f32.partialorder %v10189_v56, %v10444_v20  ;;  %vm1621_vm14 = vcmp.eq.f32.partialorder %v10191_v10, %v10444_v20  ;;  %vm1625_vm6 = vcmp.eq.f32.partialorder %v10193_v49, %v10444_v20  ;;  %v10476_v56 = vsub.f32 %v11785_v28, %v1546_v32  ;;  %v7277_v28 = vld [vmem:[#allocation5 + $0x1b4] ss:$40 sps:$4 sm:$0xff]  }
 0x4ae   : > { %vm1649_vm3 = vmand %vm1585_vm12, %vm1617_vm0  ;;  %vm1629_vm12 = vcmp.eq.f32.partialorder %v10195_v14, %v10444_v20  ;;  %v10479_v10 = vsub.f32 %v11786_v27, %v1547_v26  ;;  %v1548_v27 = vmul.f32 16.0, %v10300_v55  ;;  %v7274_v26 = vld [vmem:[#allocation5 + $0x164] ss:$40 sps:$4 sm:$0xff]  }
 0x4af   : > { %vm1653_vm10 = vmand %vm1589_vm5, %vm1621_vm14  ;;  %vm1631_vm5 = vcmp.eq.f32.partialorder %v10282_v35, %v10352_v43  ;;  %vm1635_vm14 = vcmp.eq.f32.partialorder %v10284_v11, %v10352_v43  ;;  %vm1599_vm4 = vcmp.eq.f32.partialorder %v10476_v56, %v10323_v40  ;;  %vm1598_vm1 = vcmp.eq.f32.partialorder %v10476_v56, %v10315_v51 }
 0x4b0   : > { %vm6615_vm2 = vmpackc.low %vm1653_vm10, %vm1649_vm3  ;;  %vm1603_vm8 = vcmp.eq.f32.partialorder %v10479_v10, %v10323_v40  ;;  %v1556_v13 = vsub.f32 %v11787_v9, %v1548_v27 }
 0x4b1   : > { %6616 = vmatprep.subr.msk.bf16.mxu1 %vm6615_vm2, %v11168_v45  ;;  %vm6617_vm0 = vmpackc.low %vm1652_vm9, %vm1648_vm13  ;;  %vm1630_vm2 = vcmp.eq.f32.partialorder %v10282_v35, %v10333_v23  ;;  %vm1634_vm9 = vcmp.eq.f32.partialorder %v10284_v11, %v10333_v23 }
 0x4b2   : > { %6618 = vmatpush1.bf16.msk.msra.mxu1 %vm6617_vm0, %v11168_v45  ;;  %vm10486_vm3 = vmand %vm1593_vm11, %vm1625_vm6  ;;  %vm1602_vm11 = vcmp.eq.f32.partialorder %v10479_v10, %v10315_v51  ;;  %vm1624_vm0 = vcmp.eq.f32.partialorder %v10193_v49, %v10446_v39 }
 0x4b3   : > { %vm10494_vm10 = vmand %vm1597_vm15, %vm1629_vm12 }
 0x4b4   : > { %vm1663_vm7 = vmand %vm1599_vm4, %vm1631_vm5  ;;  %vm1592_vm5 = vcmp.eq.f32.partialorder %v10331_v59, %v10440_v60  ;;  %vm1596_vm4 = vcmp.eq.f32.partialorder %v10361_v33, %v10440_v60 }
 0x4b5   : > { %vm1667_vm13 = vmand %vm1603_vm8, %vm1635_vm14  ;;  %vm1628_vm8 = vcmp.eq.f32.partialorder %v10195_v14, %v10446_v39 }
 0x4b6   : > { %vm6607_vm15 = vmpackc.low %vm1667_vm13, %vm1663_vm7  ;;  %vm1639_vm13 = vcmp.eq.f32.partialorder %v10300_v55, %v10352_v43 }
 0x4b7   : > { %6608 = vmatprep.subr.msk.bf16.mxu0 %vm6607_vm15, %v11168_v45  ;;  %vm1662_vm6 = vmand %vm1598_vm1, %vm1630_vm2  ;;  %vm1607_vm2 = vcmp.eq.f32.partialorder %v1556_v13, %v10323_v40  ;;  %vm1643_vm15 = vcmp.eq.f32.partialorder %v10302_v6, %v10352_v43 }
 0x4b8   : > { %vm1666_vm12 = vmand %vm1602_vm11, %vm1634_vm9  ;;  %vm1611_vm9 = vcmp.eq.f32.partialorder %v1557_v7, %v10323_v40  ;;  %v7262_v40 = vld [vmem:[#allocation5 + $0x24] ss:$40 sps:$4 sm:$0xff]  }
 0x4b9   : > { %vm6609_vm14 = vmpackc.low %vm1666_vm12, %vm1662_vm6 }
 0x4ba   : > { %6610 = vmatpush1.bf16.msk.msra.mxu0 %vm6609_vm14, %v11168_v45  ;;  %vm6619_vm7 = vmpackc.low %vm10494_vm10, %vm10486_vm3  ;;  %vm1606_vm3 = vcmp.eq.f32.partialorder %v1556_v13, %v10315_v51  ;;  %vm1638_vm10 = vcmp.eq.f32.partialorder %v10300_v55, %v10333_v23  ;;  %vm1642_vm14 = vcmp.eq.f32.partialorder %v10302_v6, %v10333_v23 }
 0x4bb   : > { %6620 = vmatprep.subr.msk.bf16.mxu1 %vm6619_vm7, %v11168_v45  ;;  %vm1656_vm1 = vmand %vm1592_vm5, %vm1624_vm0  ;;  %vm1610_vm0 = vcmp.eq.f32.partialorder %v1557_v7, %v10315_v51  ;;  %vm1601_vm7 = vcmp.eq.f32.partialorder %v10476_v56, %v10438_v0  ;;  %v7265_v51 = vld [vmem:[#allocation5 + $0x74] ss:$40 sps:$4 sm:$0xff]  }
 0x4bc   : > { %vm1660_vm11 = vmand %vm1596_vm4, %vm1628_vm8 }
 0x4bd   : > { %vm6621_vm6 = vmpackc.low %vm1660_vm11, %vm1656_vm1  ;;  %vm1633_vm1 = vcmp.eq.f32.partialorder %v10282_v35, %v10444_v20  ;;  %vm1637_vm11 = vcmp.eq.f32.partialorder %v10284_v11, %v10444_v20 }
 0x4be   : > { %6622 = vmatpush1.bf16.msk.msra.mxu1 %vm6621_vm6, %v11168_v45  ;;  %vm1671_vm12 = vmand %vm1607_vm2, %vm1639_vm13  ;;  %vm1605_vm13 = vcmp.eq.f32.partialorder %v10479_v10, %v10438_v0  ;;  %vm1600_vm6 = vcmp.eq.f32.partialorder %v10476_v56, %v10440_v60 }
 0x4bf   : > { %vm1675_vm5 = vmand %vm1611_vm9, %vm1643_vm15 }
 0x4c0   : > { %vm6611_vm4 = vmpackc.low %vm1675_vm5, %vm1671_vm12  ;;  %vm1632_vm12 = vcmp.eq.f32.partialorder %v10282_v35, %v10446_v39  ;;  %vm1636_vm5 = vcmp.eq.f32.partialorder %v10284_v11, %v10446_v39 }
 0x4c1   : > { %6612 = vmatprep.subr.msk.bf16.mxu0 %vm6611_vm4, %v11168_v45  ;;  %vm1670_vm8 = vmand %vm1606_vm3, %vm1638_vm10  ;;  %vm1604_vm10 = vcmp.eq.f32.partialorder %v10479_v10, %v10440_v60  ;;  %vm1609_vm4 = vcmp.eq.f32.partialorder %v1556_v13, %v10438_v0 }
 0x4c2   : > { %vm1674_vm2 = vmand %vm1610_vm0, %vm1642_vm14 }
 0x4c3   : > { %vm6613_vm9 = vmpackc.low %vm1674_vm2, %vm1670_vm8  ;;  %vm1641_vm8 = vcmp.eq.f32.partialorder %v10300_v55, %v10444_v20  ;;  %vm1645_vm2 = vcmp.eq.f32.partialorder %v10302_v6, %v10444_v20 }
 0x4c4   : > { %6614 = vmatpush1.bf16.msk.msra.mxu0 %vm6613_vm9, %v11168_v45  ;;  %vm1665_vm15 = vmand %vm1601_vm7, %vm1633_vm1  ;;  %vm1613_vm1 = vcmp.eq.f32.partialorder %v1557_v7, %v10438_v0  ;;  %vm1608_vm9 = vcmp.eq.f32.partialorder %v1556_v13, %v10440_v60  ;;  %v7280_v13 = vld [vmem:[#allocation5 + $0x204] ss:$40 sps:$4 sm:$0xff]  }
 0x4c5   : > { %vm1669_vm3 = vmand %vm1605_vm13, %vm1637_vm11  ;;  %5225 = vmatprep.subr.bf16.mxu0 %v7262_v40  ;;  %v7278_v40 = vld [vmem:[#allocation5 + $0x200] ss:$40 sps:$4 sm:$0xff]  }
 0x4c6   : > { %vm6623_vm0 = vmpackc.low %vm1669_vm3, %vm1665_vm15  ;;  %vm1640_vm15 = vcmp.eq.f32.partialorder %v10300_v55, %v10446_v39  ;;  %vm1644_vm3 = vcmp.eq.f32.partialorder %v10302_v6, %v10446_v39  ;;  %v7260_v55 = vld [vmem:[#allocation5 + $0x20] ss:$40 sps:$4 sm:$0xff]  }
 0x4c7   : > { %6624 = vmatprep.subr.msk.bf16.mxu1 %vm6623_vm0, %v11168_v45  ;;  %vm1664_vm14 = vmand %vm1600_vm6, %vm1632_vm12  ;;  %vm1612_vm12 = vcmp.eq.f32.partialorder %v1557_v7, %v10440_v60  ;;  %v7266_v60 = vld [vmem:[#allocation5 + $0xc0] ss:$40 sps:$4 sm:$0xff]  }
 0x4c8   : > { %vm1668_vm7 = vmand %vm1604_vm10, %vm1636_vm5 }
 0x4c9   : > { %vm6625_vm13 = vmpackc.low %vm1668_vm7, %vm1664_vm14 }
 0x4ca   : > { %6626 = vmatpush1.bf16.msk.msra.mxu1 %vm6625_vm13, %v11168_v45  ;;  %vm1673_vm11 = vmand %vm1609_vm4, %vm1641_vm8  ;;  %vm11809_vm4 = vcmask 523264  }
 0x4cb   : > { %vm1677_vm6 = vmand %vm1613_vm1, %vm1645_vm2 }
 0x4cc   : > { %vm6627_vm10 = vmpackc.low %vm1677_vm6, %vm1673_vm11 }
 0x4cd   : > { %6628 = vmatprep.subr.msk.bf16.mxu1 %vm6627_vm10, %v11168_v45  ;;  %vm1672_vm5 = vmand %vm1608_vm9, %vm1640_vm15 }
 0x4ce   : > { %vm1676_vm0 = vmand %vm1612_vm12, %vm1644_vm3 }
 0x4cf   : > { %vm6629_vm14 = vmpackc.low %vm1676_vm0, %vm1672_vm5 }
 0x4d0   : > { %6630 = vmatpush1.bf16.msk.msra.mxu1 %vm6629_vm14, %v11168_v45  ;;  %vm11810_vm8 = vmmov %vm11809_vm4 }
 0x4d1   : > { %vm11811_vm7 = vmmov %vm11809_vm4 }
 0x4d2   : > { %vm11812_vm1 = vmmov %vm11809_vm4 }
 0x4d3   : > { %vm11813_vm2 = vmmov %vm11812_vm1 }
 0x4d4   : > { %vm11814_vm13 = vmmov %vm11812_vm1 }
 0x4d5   : > { %vm11815_vm11 = vmmov %vm11812_vm1 }
 0x4d6   : > { %vm11816_vm9 = vmmov %vm11812_vm1 }
 0x4d7   : > { %vm11817_vm15 = vmmov %vm11812_vm1 }
 0x4d8   : > { %vm11818_vm6 = vmmov %vm11812_vm1 }
 0x4d9   : > { %vm11819_vm12 = vmmov %vm11812_vm1 }
 0x4da   : > { %vm11820_vm3 = vmmov %vm11812_vm1 }
 0x4db   : > { %vm11821_vm10 = vmmov %vm11812_vm1 }
 0x4dc   : > { %vm11822_vm5 = vmmov %vm11812_vm1 }
 0x4dd   : > { %vm11823_vm0 = vmmov %vm11812_vm1 }
 0x4de   : > { %vm11824_vm14 = vmmov %vm11823_vm0 }
 0x56c   : > { %v6449_v49 = vpop.f32.mrb[80].mxu1 }
 0x56d   : > { %v4533_v14 = vpop.f32.mrb[81].mxu1  ;;  %v4573_v20 = vmax.f32 %v6449_v49, 1e-30 }
 0x56e   : > { %v4572_v23 = vmax.f32 %v4533_v14, 1e-30 }
 0x570   : > { %7372 = vrcp.f32 %v4572_v23  ;;  %v7286_v23 = vld [vmem:[#allocation5 + $0x2a4] ss:$40 sps:$4 sm:$0xff]  }
 0x571   : > { %7374 = vrcp.f32 %v4573_v20  ;;  %v7281_v20 = vld [vmem:[#allocation5 + $0x250] ss:$40 sps:$4 sm:$0xff]  }
 0x574   : > { %v6452_v59 = vpop.f32.mrb[82].mxu1 }
 0x575   : > { %v4543_v35 = vpop.f32.mrb[83].mxu1  ;;  %v4575_v11 = vmax.f32 %v6452_v59, 1e-30  ;;  %v7289_v59 = vld [vmem:[#allocation5 + $0x2f4] ss:$40 sps:$4 sm:$0xff]  }
 0x576   : > { %v4574_v39 = vmax.f32 %v4543_v35, 1e-30  ;;  %v7287_v35 = vld [vmem:[#allocation5 + $0x2f0] ss:$40 sps:$4 sm:$0xff]  }
 0x578   : > { %7376 = vrcp.f32 %v4574_v39  ;;  %v6455_v45 = vpop.f32.mrb[84].mxu1  ;;  %v7293_v39 = vld [vmem:[#allocation5 + $0x390] ss:$40 sps:$4 sm:$0xff]  }
 0x579   : > { %7378 = vrcp.f32 %v4575_v11  ;;  %v4553_v43 = vpop.f32.mrb[85].mxu1  ;;  %v4577_v33 = vmax.f32 %v6455_v45, 1e-30  ;;  %v7292_v11 = vld [vmem:[#allocation5 + $0x344] ss:$40 sps:$4 sm:$0xff]  }
 0x57a   : > { %v7373_v9 = vpop.eup %7372  ;;  %v4576_v52 = vmax.f32 %v4553_v43, 1e-30  ;;  %v7304_v45 = vld [vmem:[#allocation5 + $0x484] ss:$40 sps:$4 sm:$0xff]   ;;  %v7307_v43 = vld [vmem:[#allocation5 + $0x4d4] ss:$40 sps:$4 sm:$0xff]  }
 0x57b   : > { %v4588_v16 = vmul.f32 %v7373_v9, %v10399_v61  ;;  %v7375_v6 = vpop.eup %7374  ;;  %v7268_v61 = vld [vmem:[#allocation5 + $0xc4] ss:$40 sps:$4 sm:$0xff]  }
 0x57c   : > { %v4589_v48 = vmul.f32 %v7375_v6, %v10404_v5  ;;  %7380 = vrcp.f32 %v4576_v52  ;;  %v7298_v9 = vld [vmem:[#allocation5 + $0x3e4] ss:$40 sps:$4 sm:$0xff]   ;;  %v7299_v6 = vld [vmem:[#allocation5 + $0x430] ss:$40 sps:$4 sm:$0xff]  }
 0x57d   : > { %6152 = vmatmul.mubr.msk.f32.vlgmr.msra.gmra.mrb[72].mxu0 %vm11809_vm4, %v4588_v16  ;;  %6176 = vmatmul.mubr.msk.f32.vlgmr.msra.gmra.mrb[88].mxu1 %vm11810_vm8, %v4588_v16  ;;  %7382 = vrcp.f32 %v4577_v33  ;;  %v7296_v16 = vld [vmem:[#allocation5 + $0x3e0] ss:$40 sps:$4 sm:$0xff]   ;;  %v7305_v33 = vld [vmem:[#allocation5 + $0x4d0] ss:$40 sps:$4 sm:$0xff]   ;;  %v7310_v52 = vld [vmem:[#allocation5 + $0x524] ss:$40 sps:$4 sm:$0xff]  }
 0x57e   : > { %4690 = vmatprep.mubr.f32.mxu0 %v11765_v24  ;;  %4803 = vmatprep.mubr.f32.mxu1 %v11765_v24 }
 0x57f   : > { %5226 = vmatpush1.bf16.msra.mxu0 %v7260_v55  ;;  %v6458_v8 = vpop.f32.mrb[86].mxu1  ;;  %v7301_v55 = vld [vmem:[#allocation5 + $0x434] ss:$40 sps:$4 sm:$0xff]  }
 0x580   : > { %5227 = vmatprep.subr.bf16.mxu0 %v7265_v51  ;;  %v4563_v63 = vpop.f32.mrb[87].mxu1  ;;  %v4579_v37 = vmax.f32 %v6458_v8, 1e-30  ;;  %v7302_v51 = vld [vmem:[#allocation5 + $0x480] ss:$40 sps:$4 sm:$0xff]  }
 0x581   : > { %6153 = vmatmul.mubr.msk.f32.gmra.mrb[74].mxu0 %vm11811_vm7, %v4589_v48  ;;  %6177 = vmatmul.mubr.msk.f32.gmra.mrb[90].mxu1 %vm11812_vm1, %v4589_v48  ;;  %v4578_v25 = vmax.f32 %v4563_v63, 1e-30  ;;  %v639_v48 = vld [vmem:[#allocation7] sm:$0xff] }
 0x582   : > { %v7377_v30 = vpop.eup %7376  ;;  %4696 = vmatprep.mubr.f32.mxu0 %v11765_v24  ;;  %4809 = vmatprep.mubr.f32.mxu1 %v11765_v24  ;;  %v644_v8 = vld [vmem:[#allocation7 + $0xa0] sm:$0xff] }
 0x583   : > { %v4590_v0 = vmul.f32 %v7377_v30, %v10409_v15  ;;  %5228 = vmatpush1.bf16.msra.mxu0 %v7263_v36  ;;  %v7379_v5 = vpop.eup %7378  ;;  %v7269_v15 = vld [vmem:[#allocation5 + $0x110] ss:$40 sps:$4 sm:$0xff]   ;;  %7384 = vrcp.f32 %v4578_v25  ;;  %v640_v36 = vld [vmem:[#allocation7 + $0x20] sm:$0xff] }
 0x584   : > { %5229 = vmatprep.subr.bf16.mxu0 %v7268_v61  ;;  %v4591_v32 = vmul.f32 %v7379_v5, %v10414_v47  ;;  %7386 = vrcp.f32 %v4579_v37  ;;  %v641_v61 = vld [vmem:[#allocation7 + $0x40] sm:$0xff]  ;;  %v10610_v30 = vpack.c.bf16 %v640_v36, %v639_v48 }
 0x585   : > { %6154 = vmatmul.mubr.msk.f32.gmra.mrb[76].mxu0 %vm11813_vm2, %v4590_v0  ;;  %6178 = vmatmul.mubr.msk.f32.gmra.mrb[92].mxu1 %vm11814_vm13, %v4590_v0  ;;  %v642_v0 = vld [vmem:[#allocation7 + $0x60] sm:$0xff] }
 0x586   : > { %4702 = vmatprep.mubr.f32.mxu0 %v11765_v24  ;;  %4815 = vmatprep.mubr.f32.mxu1 %v11765_v24  ;;  %v7381_v56 = vpop.eup %7380  ;;  %v643_v5 = vld [vmem:[#allocation7 + $0x80] sm:$0xff] }
 0x587   : > { %5230 = vmatpush1.bf16.msra.mxu0 %v7266_v60  ;;  %v4592_v10 = vmul.f32 %v7381_v56, %v10419_v19  ;;  %v7383_v47 = vpop.eup %7382  ;;  %v10612_v60 = vpack.c.bf16 %v642_v0, %v641_v61  ;;  %6663 = vmatprep.subr.bf16.mxu1 %v10610_v30  ;;  %v645_v63 = vld [vmem:[#allocation7 + $0xc0] sm:$0xff] }
 0x588   : > { %5231 = vmatprep.subr.bf16.mxu0 %v7271_v62  ;;  %v4593_v27 = vmul.f32 %v7383_v47, %v10423_v38  ;;  %v7283_v38 = vld [vmem:[#allocation5 + $0x254] ss:$40 sps:$4 sm:$0xff]   ;;  %6671 = vmatpush3.bf16.msra.mxu1 %v10610_v30  ;;  %v10617_v62 = vpack.c.bf16 %v644_v8, %v643_v5  ;;  %v646_v37 = vld [vmem:[#allocation7 + $0xe0] sm:$0xff] }
 0x589   : > { %6155 = vmatmul.mubr.msk.f32.gmra.mrb[78].mxu0 %vm11815_vm11, %v4591_v32  ;;  %6179 = vmatmul.mubr.msk.f32.gmra.mrb[94].mxu1 %vm11816_vm9, %v4591_v32  ;;  %v10621_v25 = vpack.c.bf16 %v646_v37, %v645_v63  ;;  %v647_v32 = vld [vmem:[#allocation7 + $0x100] sm:$0xff] }
 0x58a   : > { %4708 = vmatprep.mubr.f32.mxu0 %v11765_v24  ;;  %4821 = vmatprep.mubr.f32.mxu1 %v11765_v24  ;;  %v649_v56 = vld [vmem:[#allocation7 + $0x140] sm:$0xff] }
 0x58b   : > { %5232 = vmatpush1.bf16.msra.mxu0 %v7269_v15  ;;  %6664 = vmatprep.subr.bf16.mxu1 %v10612_v60  ;;  %v648_v15 = vld [vmem:[#allocation7 + $0x120] sm:$0xff] }
 0x58c   : > { %5233 = vmatprep.subr.bf16.mxu0 %v7274_v26  ;;  %6672 = vmatpush3.bf16.msra.mxu1 %v10612_v60  ;;  %v10625_v26 = vpack.c.bf16 %v648_v15, %v647_v32  ;;  %v651_v47 = vld [vmem:[#allocation7 + $0x180] sm:$0xff]  ;;  %v11825_v32 = vld [vmem:[#allocation71_spill] sm:$0xff] }
 0x58d   : > { %6156 = vmatmul.mubr.msk.f32.gmra.mrb[80].mxu0 %vm11817_vm15, %v4592_v10  ;;  %6180 = vmatmul.mubr.msk.f32.gmra.mrb[96].mxu1 %vm11818_vm6, %v4592_v10  ;;  %v7385_v19 = vpop.eup %7384  ;;  %v650_v10 = vld [vmem:[#allocation7 + $0x160] sm:$0xff] }
 0x58e   : > { %4714 = vmatprep.mubr.f32.mxu0 %v11765_v24  ;;  %4827 = vmatprep.mubr.f32.mxu1 %v11765_v24  ;;  %v4594_v7 = vmul.f32 %v7385_v19, %v10427_v44  ;;  %v7387_v49 = vpop.eup %7386  ;;  %v7284_v44 = vld [vmem:[#allocation5 + $0x2a0] ss:$40 sps:$4 sm:$0xff]   ;;  %v7316_v36 = vld [vmem:[#allocation5 + $0x5c4] ss:$40 sps:$4 sm:$0xff]  }
 0x58f   : > { %5234 = vmatpush1.bf16.msra.mxu0 %v7272_v22  ;;  %v4595_v14 = vmul.f32 %v7387_v49, %v10431_v50  ;;  %v7295_v50 = vld [vmem:[#allocation5 + $0x394] ss:$40 sps:$4 sm:$0xff]   ;;  %6665 = vmatprep.subr.bf16.mxu1 %v10617_v62  ;;  %v10629_v22 = vpack.c.bf16 %v650_v10, %v649_v56  ;;  %v7314_v63 = vld [vmem:[#allocation5 + $0x5c0] ss:$40 sps:$4 sm:$0xff]  }
 0x590   : > { %5235 = vmatprep.subr.bf16.mxu0 %v7277_v28  ;;  %6673 = vmatpush3.bf16.msra.mxu1 %v10617_v62  ;;  %v652_v28 = vld [vmem:[#allocation7 + $0x1a0] sm:$0xff]  ;;  %v7319_v56 = vld [vmem:[#allocation5 + $0x614] ss:$40 sps:$4 sm:$0xff]   ;;  %v11826_v10 = vld [vmem:[#allocation97_spill] sm:$0xff] }
 0x591   : > { %6157 = vmatmul.mubr.msk.f32.gmra.mrb[82].mxu0 %vm11819_vm12, %v4593_v27  ;;  %6181 = vmatmul.mubr.msk.f32.gmra.mrb[98].mxu1 %vm11820_vm3, %v4593_v27  ;;  %v10633_v27 = vpack.c.bf16 %v652_v28, %v651_v47  ;;  %v11827_v28 = vld [vmem:[#allocation83_spill] sm:$0xff] }
 0x592   : > { %4720 = vmatprep.mubr.f32.mxu0 %v11765_v24  ;;  %4833 = vmatprep.mubr.f32.mxu1 %v11765_v24 }
 0x593   : > { %5236 = vmatpush1.bf16.msra.mxu0 %v7275_v21  ;;  %6666 = vmatprep.subr.bf16.mxu1 %v10621_v25 }
 0x594   : > { %5237 = vmatprep.subr.bf16.mxu0 %v7280_v13  ;;  %6674 = vmatpush3.bf16.msra.mxu1 %v10621_v25 }
 0x595   : > { %6158 = vmatmul.mubr.msk.f32.gmra.mrb[84].mxu0 %vm11821_vm10, %v4594_v7  ;;  %6182 = vmatmul.mubr.msk.f32.gmra.mrb[100].mxu1 %vm11822_vm5, %v4594_v7 }
 0x596   : > { %4726 = vmatprep.mubr.f32.mxu0 %v11765_v24  ;;  %4839 = vmatprep.mubr.f32.mxu1 %v11765_v24  ;;  %v7290_v24 = vld [vmem:[#allocation5 + $0x340] ss:$40 sps:$4 sm:$0xff]  }
 0x597   : > { %5238 = vmatpush1.bf16.msra.mxu0 %v7278_v40  ;;  %6667 = vmatprep.subr.bf16.mxu1 %v10625_v26 }
 0x598   : > { %5239 = vmatprep.subr.bf16.mxu0 %v7283_v38  ;;  %6675 = vmatpush3.bf16.msra.mxu1 %v10625_v26 }
 0x599   : > { %6159 = vmatmul.mubr.msk.f32.gmra.mrb[86].mxu0 %vm11823_vm0, %v4595_v14  ;;  %6183 = vmatmul.mubr.msk.f32.gmra.mrb[102].mxu1 %vm11824_vm14, %v4595_v14 }
 0x59a   : > { %6668 = vmatprep.subr.bf16.mxu1 %v10629_v22 }
 0x59b   : > { %5240 = vmatpush1.bf16.msra.mxu0 %v7281_v20 }
 0x59c   : > { %5241 = vmatprep.subr.bf16.mxu0 %v7286_v23  ;;  %6676 = vmatpush3.bf16.msra.mxu1 %v10629_v22 }
 0x59d   : > { %6669 = vmatprep.subr.bf16.mxu1 %v10633_v27 }
 0x59f   : > { %5242 = vmatpush1.bf16.msra.mxu0 %v7284_v44 }
 0x5a0   : > { %5243 = vmatprep.subr.bf16.mxu0 %v7289_v59  ;;  %6677 = vmatpush3.bf16.msra.mxu1 %v10633_v27 }
 0x5a3   : > { %5244 = vmatpush1.bf16.msra.mxu0 %v7287_v35 }
 0x5a4   : > { %5245 = vmatprep.subr.bf16.mxu0 %v7292_v11 }
 0x5a7   : > { %5246 = vmatpush1.bf16.msra.mxu0 %v7290_v24 }
 0x5a8   : > { %5247 = vmatprep.subr.bf16.mxu0 %v7295_v50 }
 0x5ab   : > { %5248 = vmatpush1.bf16.msra.mxu0 %v7293_v39 }
 0x5ac   : > { %5249 = vmatprep.subr.bf16.mxu0 %v7298_v9  ;;  %v7308_v9 = vld [vmem:[#allocation5 + $0x520] ss:$40 sps:$4 sm:$0xff]  }
 0x5af   : > { %5250 = vmatpush1.bf16.msra.mxu0 %v7296_v16 }
 0x5b0   : > { %5251 = vmatprep.subr.bf16.mxu0 %v7301_v55 }
 0x5b3   : > { %5252 = vmatpush1.bf16.msra.mxu0 %v7299_v6 }
 0x5b4   : > { %5253 = vmatprep.subr.bf16.mxu0 %v7304_v45 }
 0x5b7   : > { %5254 = vmatpush1.bf16.msra.mxu0 %v7302_v51 }
 0x5b8   : > { %5255 = vmatprep.subr.bf16.mxu0 %v7307_v43 }
 0x5bb   : > { %5256 = vmatpush1.bf16.msra.mxu0 %v7305_v33  ;;  %v7311_v33 = vld [vmem:[#allocation5 + $0x570] ss:$40 sps:$4 sm:$0xff]  }
 0x5bc   : > { %5298 = vmatprep.subr.bf16.mxu0 %v7310_v52 }
 0x650   : > { %v4686_v21 = vpop.f32.mrb[72].mxu0  ;;  %v4799_v13 = vpop.f32.mrb[88].mxu1 }
 0x651   : > { %v4846_v19 = vmul.f32 %v4686_v21, %v10197_v1  ;;  %v10640_v7 = vmul.f32 %v4799_v13, %v10136_v58  ;;  %v4688_v40 = vpop.f32.mrb[73].mxu0  ;;  %v4801_v49 = vpop.f32.mrb[89].mxu1 }
 0x652   : > { %v4847_v38 = vmul.f32 %v4688_v40, %v10199_v29  ;;  %v10644_v14 = vmul.f32 %v4801_v49, %v10138_v2  ;;  %v7317_v40 = vld [vmem:[#allocation5 + $0x610] ss:$40 sps:$4 sm:$0xff]  }
 0x653   : > { %v11828_v49 = vld [vmem:[#allocation50_spill] sm:$0xff] }
 0x654   : > { %v4692_v20 = vpop.f32.mrb[74].mxu0  ;;  %v4805_v23 = vpop.f32.mrb[90].mxu1 }
 0x655   : > { %v4850_v44 = vmul.f32 %v4692_v20, %v10209_v42  ;;  %v10648_v59 = vmul.f32 %v4805_v23, %v10140_v17  ;;  %v4694_v35 = vpop.f32.mrb[75].mxu0  ;;  %v4807_v11 = vpop.f32.mrb[91].mxu1 }
 0x656   : > { %v4851_v1 = vmul.f32 %v4694_v35, %v10211_v18  ;;  %v10652_v58 = vmul.f32 %v4807_v11, %v10143_v4  ;;  %v7313_v4 = vld [vmem:[#allocation5 + $0x574] ss:$40 sps:$4 sm:$0xff]   ;;  %v7322_v35 = vld [vmem:[#allocation5 + $0x664] ss:$40 sps:$4 sm:$0xff]  }
 0x657   : > { %v4878_v24 = vpack.c.bf16 %v4850_v44, %v4846_v19  ;;  %v4880_v29 = vpack.c.bf16 %v10648_v59, %v10640_v7  ;;  %v11830_v11 = vld [vmem:[#allocation53_spill] sm:$0xff] }
 0x658   : > { %v4879_v2 = vpack.c.bf16 %v4851_v1, %v4847_v38  ;;  %v4881_v50 = vpack.c.bf16 %v10652_v58, %v10644_v14  ;;  %v4698_v39 = vpop.f32.mrb[76].mxu0  ;;  %v4811_v42 = vpop.f32.mrb[92].mxu1  ;;  %v11829_v38 = vld [vmem:[#allocation46_spill] sm:$0xff]  ;;  %v7346_v14 = vld [vmem:[#allocation5 + $0x8e4] ss:$40 sps:$4 sm:$0xff]  }
 0x659   : > { %v4854_v17 = vmul.f32 %v4698_v39, %v10216_v54  ;;  %v10660_v16 = vmul.f32 %v4811_v42, %v10156_v31  ;;  %v4700_v18 = vpop.f32.mrb[77].mxu0  ;;  %v4813_v55 = vpop.f32.mrb[93].mxu1  ;;  %v7344_v58 = vld [vmem:[#allocation5 + $0x8e0] ss:$40 sps:$4 sm:$0xff]  }
 0x65a   : > { %v4855_v6 = vmul.f32 %v4700_v18, %v10219_v34  ;;  %v10664_v45 = vmul.f32 %v4813_v55, %v10160_v12  ;;  %5257 = vmatprep.mubr.bf16.mxu0 %v4879_v2 }
 0x65b   : > { %5258 = vmatmul.mubr.bf16.vlgmr.msra.gmra.mrb[88].mxu0 %v4878_v24  ;;  %v11831_v24 = vld [vmem:[#allocation29_spill] sm:$0xff] }
 0x65c   : > { %5299 = vmatpush1.bf16.msra.mxu0 %v7308_v9  ;;  %v4704_v51 = vpop.f32.mrb[78].mxu0  ;;  %v4817_v43 = vpop.f32.mrb[94].mxu1 }
 0x65d   : > { %v4858_v52 = vmul.f32 %v4704_v51, %v10221_v41  ;;  %v10668_v54 = vmul.f32 %v4817_v43, %v10164_v46  ;;  %v4706_v31 = vpop.f32.mrb[79].mxu0  ;;  %v4819_v48 = vpop.f32.mrb[95].mxu1  ;;  %5300 = vmatprep.subr.bf16.mxu0 %v7313_v4  ;;  %v7320_v4 = vld [vmem:[#allocation5 + $0x660] ss:$40 sps:$4 sm:$0xff]  }
 0x65e   : > { %v4859_v34 = vmul.f32 %v4706_v31, %v10223_v57  ;;  %v10672_v12 = vmul.f32 %v4819_v48, %v10166_v53  ;;  %v11833_v43 = vld [vmem:[#allocation73_spill] sm:$0xff]  ;;  %v7325_v48 = vld [vmem:[#allocation5 + $0x6b4] ss:$40 sps:$4 sm:$0xff]  }
 0x65f   : > { %v4882_v61 = vpack.c.bf16 %v4858_v52, %v4854_v17  ;;  %v4884_v0 = vpack.c.bf16 %v10668_v54, %v10660_v16 }
 0x660   : > { %v4883_v5 = vpack.c.bf16 %v4859_v34, %v4855_v6  ;;  %v4885_v41 = vpack.c.bf16 %v10672_v12, %v10664_v45  ;;  %5301 = vmatpush1.bf16.msra.mxu0 %v7311_v33  ;;  %v4710_v46 = vpop.f32.mrb[80].mxu0  ;;  %v4823_v8 = vpop.f32.mrb[96].mxu1  ;;  %v11832_v6 = vld [vmem:[#allocation51_spill] sm:$0xff] }
 0x661   : > { %v4862_v37 = vmul.f32 %v4710_v46, %v10225_v3  ;;  %v10680_v15 = vmul.f32 %v4823_v8, %v11825_v32  ;;  %v4712_v57 = vpop.f32.mrb[81].mxu0  ;;  %v4825_v53 = vpop.f32.mrb[97].mxu1  ;;  %5302 = vmatprep.subr.bf16.mxu0 %v7316_v36  ;;  %v11834_v36 = vld [vmem:[#allocation58_spill] sm:$0xff] }
 0x662   : > { %v4863_v47 = vmul.f32 %v4712_v57, %v11826_v10  ;;  %v10684_v21 = vmul.f32 %v4825_v53, %v11827_v28  ;;  %5267 = vmatprep.mubr.bf16.mxu0 %v4883_v5  ;;  %v11837_v57 = vld [vmem:[#allocation48_spill] sm:$0xff]  ;;  %v11838_v28 = vld [vmem:[#allocation75_spill] sm:$0xff] }
 0x663   : > { %5268 = vmatmul.mubr.bf16.gmra.mrb[92].mxu0 %v4882_v61  ;;  %v11835_v61 = vld [vmem:[#allocation85_spill] sm:$0xff] }
 0x664   : > { %5303 = vmatpush1.bf16.msra.mxu0 %v7314_v63  ;;  %v4716_v13 = vpop.f32.mrb[82].mxu0  ;;  %v4829_v19 = vpop.f32.mrb[98].mxu1  ;;  %v7323_v63 = vld [vmem:[#allocation5 + $0x6b0] ss:$40 sps:$4 sm:$0xff]  }
 0x665   : > { %v4866_v3 = vmul.f32 %v4716_v13, %v11828_v49  ;;  %v10688_v20 = vmul.f32 %v4829_v19, %v11829_v38  ;;  %v4718_v23 = vpop.f32.mrb[83].mxu0  ;;  %v4831_v44 = vpop.f32.mrb[99].mxu1  ;;  %5304 = vmatprep.subr.bf16.mxu0 %v7319_v56  ;;  %v11839_v19 = vld [vmem:[#allocation96_spill] sm:$0xff] }
 0x666   : > { %v4867_v1 = vmul.f32 %v4718_v23, %v11830_v11  ;;  %v10692_v2 = vmul.f32 %v4831_v44, %v11831_v24  ;;  %v7326_v44 = vld [vmem:[#allocation5 + $0x700] ss:$40 sps:$4 sm:$0xff]   ;;  %v7329_v11 = vld [vmem:[#allocation5 + $0x750] ss:$40 sps:$4 sm:$0xff]  }
 0x667   : > { %v4886_v39 = vpack.c.bf16 %v4866_v3, %v4862_v37  ;;  %v4888_v42 = vpack.c.bf16 %v10688_v20, %v10680_v15  ;;  %v11836_v37 = vld [vmem:[#allocation59_spill] sm:$0xff]  ;;  %v7332_v24 = vld [vmem:[#allocation5 + $0x7a0] ss:$40 sps:$4 sm:$0xff]  }
 0x668   : > { %v4887_v9 = vpack.c.bf16 %v4867_v1, %v4863_v47  ;;  %v4889_v17 = vpack.c.bf16 %v10692_v2, %v10684_v21  ;;  %5305 = vmatpush1.bf16.msra.mxu0 %v7317_v40  ;;  %v4722_v18 = vpop.f32.mrb[84].mxu0  ;;  %v4835_v55 = vpop.f32.mrb[100].mxu1  ;;  %v7328_v47 = vld [vmem:[#allocation5 + $0x704] ss:$40 sps:$4 sm:$0xff]  }
 0x669   : > { %v4870_v51 = vmul.f32 %v4722_v18, %v11832_v6  ;;  %v10700_v33 = vmul.f32 %v4835_v55, %v11833_v43  ;;  %v4724_v52 = vpop.f32.mrb[85].mxu0  ;;  %v4837_v31 = vpop.f32.mrb[101].mxu1  ;;  %5306 = vmatprep.subr.bf16.mxu0 %v7322_v35  ;;  %v7331_v35 = vld [vmem:[#allocation5 + $0x754] ss:$40 sps:$4 sm:$0xff]   ;;  %v7334_v1 = vld [vmem:[#allocation5 + $0x7a4] ss:$40 sps:$4 sm:$0xff]  }
 0x66a   : > { %v4871_v34 = vmul.f32 %v4724_v52, %v11834_v36  ;;  %v10704_v5 = vmul.f32 %v4837_v31, %v11835_v61  ;;  %5277 = vmatprep.mubr.bf16.mxu0 %v4887_v9  ;;  %v7335_v9 = vld [vmem:[#allocation5 + $0x7f0] ss:$40 sps:$4 sm:$0xff]   ;;  %v7340_v18 = vld [vmem:[#allocation5 + $0x844] ss:$40 sps:$4 sm:$0xff]   ;;  %v7338_v55 = vld [vmem:[#allocation5 + $0x840] ss:$40 sps:$4 sm:$0xff]  }
 0x66b   : > { %5278 = vmatmul.mubr.bf16.gmra.mrb[96].mxu0 %v4886_v39  ;;  %v7337_v39 = vld [vmem:[#allocation5 + $0x7f4] ss:$40 sps:$4 sm:$0xff]   ;;  %v7341_v6 = vld [vmem:[#allocation5 + $0x890] ss:$40 sps:$4 sm:$0xff]   ;;  %v7352_v43 = vld [vmem:[#allocation5 + $0x984] ss:$40 sps:$4 sm:$0xff]  }
 0x66c   : > { %5307 = vmatpush1.bf16.msra.mxu0 %v7320_v4  ;;  %v4728_v46 = vpop.f32.mrb[86].mxu0  ;;  %v4841_v8 = vpop.f32.mrb[102].mxu1  ;;  %v7343_v4 = vld [vmem:[#allocation5 + $0x894] ss:$40 sps:$4 sm:$0xff]   ;;  %v7350_v52 = vld [vmem:[#allocation5 + $0x980] ss:$40 sps:$4 sm:$0xff]  }
 0x66d   : > { %v4874_v32 = vmul.f32 %v4728_v46, %v11836_v37  ;;  %v10708_v53 = vmul.f32 %v4841_v8, %v11837_v57  ;;  %v4730_v56 = vpop.f32.mrb[87].mxu0  ;;  %v4843_v10 = vpop.f32.mrb[103].mxu1  ;;  %5308 = vmatprep.subr.bf16.mxu0 %v7325_v48  ;;  %v7355_v31 = vld [vmem:[#allocation5 + $0x9d4] ss:$40 sps:$4 sm:$0xff]   ;;  %v7353_v48 = vld [vmem:[#allocation5 + $0x9d0] ss:$40 sps:$4 sm:$0xff]  }
 0x66e   : > { %v4875_v13 = vmul.f32 %v4730_v56, %v11838_v28  ;;  %v4877_v40 = vmul.f32 %v4843_v10, %v11839_v19 }
 0x66f   : > { %v4890_v49 = vpack.c.bf16 %v4874_v32, %v4870_v51  ;;  %v4892_v3 = vpack.c.bf16 %v10708_v53, %v10700_v33  ;;  %v7347_v51 = vld [vmem:[#allocation5 + $0x930] ss:$40 sps:$4 sm:$0xff]  }
 0x670   : > { %v4891_v38 = vpack.c.bf16 %v4875_v13, %v4871_v34  ;;  %v4893_v23 = vpack.c.bf16 %v4877_v40, %v10704_v5  ;;  %5309 = vmatpush1.bf16.msra.mxu0 %v7323_v63 }
 0x671   : > { %5310 = vmatprep.subr.bf16.mxu0 %v7328_v47 }
 0x672   : > { %5287 = vmatprep.mubr.bf16.mxu0 %v4891_v38 }
 0x673   : > { %5288 = vmatmul.mubr.bf16.gmra.mrb[100].mxu0 %v4890_v49 }
 0x674   : > { %5311 = vmatpush1.bf16.msra.mxu0 %v7326_v44  ;;  %5330 = vmatprep.mubr.bf16.mxu0 %v4881_v50  ;;  %v7349_v50 = vld [vmem:[#allocation5 + $0x934] ss:$40 sps:$4 sm:$0xff]  }
 0x675   : > { %5312 = vmatprep.subr.bf16.mxu0 %v7331_v35 }
 0x678   : > { %5313 = vmatpush1.bf16.msra.mxu0 %v7329_v11 }
 0x679   : > { %5314 = vmatprep.subr.bf16.mxu0 %v7334_v1 }
 0x67c   : > { %5315 = vmatpush1.bf16.msra.mxu0 %v7332_v24 }
 0x67d   : > { %5316 = vmatprep.subr.bf16.mxu0 %v7337_v39 }
 0x680   : > { %5317 = vmatpush1.bf16.msra.mxu0 %v7335_v9 }
 0x681   : > { %5318 = vmatprep.subr.bf16.mxu0 %v7340_v18 }
 0x684   : > { %5319 = vmatpush1.bf16.msra.mxu0 %v7338_v55 }
 0x685   : > { %5320 = vmatprep.subr.bf16.mxu0 %v7343_v4 }
 0x688   : > { %5321 = vmatpush1.bf16.msra.mxu0 %v7341_v6 }
 0x689   : > { %5322 = vmatprep.subr.bf16.mxu0 %v7346_v14 }
 0x68c   : > { %5323 = vmatpush1.bf16.msra.mxu0 %v7344_v58 }
 0x68d   : > { %5324 = vmatprep.subr.bf16.mxu0 %v7349_v50 }
 0x690   : > { %5325 = vmatpush1.bf16.msra.mxu0 %v7347_v51 }
 0x691   : > { %5326 = vmatprep.subr.bf16.mxu0 %v7352_v43 }
 0x694   : > { %5327 = vmatpush1.bf16.msra.mxu0 %v7350_v52 }
 0x695   : > { %5328 = vmatprep.subr.bf16.mxu0 %v7355_v31 }
 0x698   : > { %5329 = vmatpush1.bf16.msra.mxu0 %v7353_v48 }
 0x699   : > { %6632 = vmatprep.subr.bf16.mxu0 %v10610_v30 }
 0x69b   : > { %5331 = vmatmul.mubr.bf16.vlgmr.msra.gmra.mrb[88].mxu0 %v4880_v29 }
 0x69c   : > { %5340 = vmatprep.mubr.bf16.mxu0 %v4885_v41  ;;  %6634 = vmatpush3.bf16.msra.mxu0 %v10610_v30  ;;  %v653_v30 = vld [vmem:[#allocation7 + $0x1c0] sm:$0xff] }
 0x69d   : > { %6636 = vmatprep.subr.bf16.mxu0 %v10612_v60 }
 0x6a0   : > { %6638 = vmatpush3.bf16.msra.mxu0 %v10612_v60  ;;  %v654_v60 = vld [vmem:[#allocation7 + $0x1e0] sm:$0xff] }
 0x6a1   : > { %6640 = vmatprep.subr.bf16.mxu0 %v10617_v62 }
 0x6a3   : > { %5341 = vmatmul.mubr.bf16.gmra.mrb[92].mxu0 %v4884_v0 }
 0x6a4   : > { %5350 = vmatprep.mubr.bf16.mxu0 %v4889_v17  ;;  %6642 = vmatpush3.bf16.msra.mxu0 %v10617_v62  ;;  %v6659_v62 = vpack.c.bf16 %v654_v60, %v653_v30 }
 0x6a5   : > { %6644 = vmatprep.subr.bf16.mxu0 %v10621_v25 }
 0x6a6   : > { %6670 = vmatprep.subr.bf16.mxu1 %v6659_v62 }
 0x6a7   : > { %6678 = vmatpush3.bf16.msra.mxu1 %v6659_v62 }
 0x6a8   : > { %6646 = vmatpush3.bf16.msra.mxu0 %v10621_v25  ;;  %v676_v25 = vld [vmem:[#allocation7 + $0x2e0] ss:$8 sm:$0x3] }
 0x6a9   : > { %6648 = vmatprep.subr.bf16.mxu0 %v10625_v26 }
 0x6ab   : > { %5351 = vmatmul.mubr.bf16.gmra.mrb[96].mxu0 %v4888_v42 }
 0x6ac   : > { %5360 = vmatprep.mubr.bf16.mxu0 %v4893_v23  ;;  %6650 = vmatpush3.bf16.msra.mxu0 %v10625_v26  ;;  %v11840_v26 = vld [vmem:[#allocation12_spill] sm:$0xff] }
 0x6ad   : > { %6652 = vmatprep.subr.bf16.mxu0 %v10629_v22  ;;  %v11841_v7 = vsub.s32 0, %v11840_v26  ;;  %v11842_v19 = vsub.s32 1, %v11840_v26 }
 0x6af   : > { %v4898_v59 = vrot.slane %v676_v25, %v11841_v7  ;;  %v4902_v40 = vrot.slane %v676_v25, %v11842_v19 }
 0x6b0   : > { %6654 = vmatpush3.bf16.msra.mxu0 %v10629_v22 }
 0x6b1   : > { %6656 = vmatprep.subr.bf16.mxu0 %v10633_v27 }
 0x6b3   : > { %5361 = vmatmul.mubr.bf16.gmra.mrb[100].mxu0 %v4892_v3 }
 0x6b4   : > { %6658 = vmatpush3.bf16.msra.mxu0 %v10633_v27 }
 0x6b5   : > { %6660 = vmatprep.subr.bf16.mxu0 %v6659_v62 }
 0x6b8   : > { %6662 = vmatpush3.bf16.msra.mxu0 %v6659_v62 }
 0x76e   : > { %v5332_v22 = vpop.f32.mrb[88].mxu0 }
 0x76f   : > { %v6695_v29 = vadd.f32 %v5332_v22, %v4898_v59  ;;  %v5334_v16 = vpop.f32.mrb[89].mxu0 }
 0x770   : > { %v5336_v45 = vpop.f32.mrb[90].mxu0  ;;  %v6696_v3 = vadd.f32 %v5334_v16, %v4902_v40 }
 0x771   : > { %v5371_v54 = vmax.f32 %v6695_v29, 0.0  ;;  %v6697_v12 = vadd.f32 %v5336_v45, %v4898_v59  ;;  %v5338_v0 = vpop.f32.mrb[91].mxu0 }
 0x772   : > { %v6698_v49 = vadd.f32 %v5338_v0, %v4902_v40 }
 0x773   : > { %v5372_v41 = vmax.f32 %v6697_v12, 0.0  ;;  %6491 = vmatprep.mubr.f32.mxu0 %v5371_v54 }
 0x775   : > { %6492 = vmatmul.mubr.f32.vlgmr.msra.gmra.mrb[104].mxu0 %v5372_v41 }
 0x776   : > { %v5342_v27 = vpop.f32.mrb[92].mxu0 }
 0x777   : > { %v6699_v15 = vadd.f32 %v5342_v27, %v4898_v59  ;;  %v5344_v21 = vpop.f32.mrb[93].mxu0 }
 0x778   : > { %v5346_v20 = vpop.f32.mrb[94].mxu0  ;;  %v6700_v39 = vadd.f32 %v5344_v21, %v4902_v40 }
 0x779   : > { %v5373_v2 = vmax.f32 %v6699_v15, 0.0  ;;  %v6701_v42 = vadd.f32 %v5346_v20, %v4898_v59  ;;  %v5348_v17 = vpop.f32.mrb[95].mxu0 }
 0x77a   : > { %v6702_v24 = vadd.f32 %v5348_v17, %v4902_v40 }
 0x77b   : > { %v5374_v33 = vmax.f32 %v6701_v42, 0.0  ;;  %6494 = vmatprep.mubr.f32.mxu0 %v5373_v2 }
 0x77d   : > { %6495 = vmatmul.mubr.f32.gmra.mrb[106].mxu0 %v5374_v33 }
 0x77e   : > { %v5352_v36 = vpop.f32.mrb[96].mxu0 }
 0x77f   : > { %v6703_v34 = vadd.f32 %v5352_v36, %v4898_v59  ;;  %v5354_v61 = vpop.f32.mrb[97].mxu0 }
 0x780   : > { %v5356_v5 = vpop.f32.mrb[98].mxu0  ;;  %v6704_v50 = vadd.f32 %v5354_v61, %v4902_v40 }
 0x781   : > { %v5375_v46 = vmax.f32 %v6703_v34, 0.0  ;;  %v6705_v8 = vadd.f32 %v5356_v5, %v4898_v59  ;;  %v5358_v63 = vpop.f32.mrb[99].mxu0 }
 0x782   : > { %v6706_v58 = vadd.f32 %v5358_v63, %v4902_v40 }
 0x783   : > { %v5376_v37 = vmax.f32 %v6705_v8, 0.0  ;;  %6497 = vmatprep.mubr.f32.mxu0 %v5375_v46 }
 0x785   : > { %6498 = vmatmul.mubr.f32.gmra.mrb[108].mxu0 %v5376_v37 }
 0x786   : > { %v5362_v32 = vpop.f32.mrb[100].mxu0 }
 0x787   : > { %v6707_v57 = vadd.f32 %v5362_v32, %v4898_v59  ;;  %v5364_v53 = vpop.f32.mrb[101].mxu0 }
 0x788   : > { %v5366_v56 = vpop.f32.mrb[102].mxu0  ;;  %v6708_v62 = vadd.f32 %v5364_v53, %v4902_v40 }
 0x789   : > { %v5377_v10 = vmax.f32 %v6707_v57, 0.0  ;;  %v6709_v47 = vadd.f32 %v5366_v56, %v4898_v59  ;;  %v5368_v28 = vpop.f32.mrb[103].mxu0 }
 0x78a   : > { %v6710_v60 = vadd.f32 %v5368_v28, %v4902_v40 }
 0x78b   : > { %v5378_v13 = vmax.f32 %v6709_v47, 0.0  ;;  %6500 = vmatprep.mubr.f32.mxu1 %v5377_v10 }
 0x78d   : > { %6501 = vmatmul.mubr.f32.vlgmr.msra.gmra.mrb[104].mxu1 %v5378_v13 }
 0x848   : > { %v6493_v38 = vpop.f32.mrb[104].mxu0 }
 0x849   : > { %v5485_v23 = vadd.f32 %v6698_v49, %v6493_v38  ;;  %v5445_v44 = vpop.f32.mrb[105].mxu0 }
 0x84a   : > { %v5484_v35 = vadd.f32 %v6696_v3, %v5445_v44 }
 0x84b   : > { %v5493_v11 = vmax.f32 %v5485_v23, 0.0 }
 0x84c   : > { %v5492_v1 = vmax.f32 %v5484_v35, 0.0 }
 0x84d   : > { %5501 = vst [vmem:[%s10755_s11 + $0x8] sm:$0xff] %v5493_v11 }
 0x84e   : > { %5500 = vst [vmem:[%s10755_s11] sm:$0xff] %v5492_v1 }
 0x850   : > { %v6496_v9 = vpop.f32.mrb[106].mxu0 }
 0x851   : > { %v5487_v18 = vadd.f32 %v6702_v24, %v6496_v9  ;;  %v5455_v55 = vpop.f32.mrb[107].mxu0 }
 0x852   : > { %v5486_v4 = vadd.f32 %v6700_v39, %v5455_v55 }
 0x853   : > { %v5495_v6 = vmax.f32 %v5487_v18, 0.0 }
 0x854   : > { %v5494_v14 = vmax.f32 %v5486_v4, 0.0 }
 0x855   : > { %5503 = vst [vmem:[%s10755_s11 + $0x18] sm:$0xff] %v5495_v6 }
 0x856   : > { %5502 = vst [vmem:[%s10755_s11 + $0x10] sm:$0xff] %v5494_v14 }
 0x858   : > { %v6499_v51 = vpop.f32.mrb[108].mxu0 }
 0x859   : > { %v5489_v43 = vadd.f32 %v6706_v58, %v6499_v51  ;;  %v5465_v52 = vpop.f32.mrb[109].mxu0 }
 0x85a   : > { %v5488_v31 = vadd.f32 %v6704_v50, %v5465_v52 }
 0x85b   : > { %v5497_v48 = vmax.f32 %v5489_v43, 0.0 }
 0x85c   : > { %v5496_v30 = vmax.f32 %v5488_v31, 0.0 }
 0x85d   : > { %5505 = vst [vmem:[%s10755_s11 + $0x28] sm:$0xff] %v5497_v48 }
 0x85e   : > { %5504 = vst [vmem:[%s10755_s11 + $0x20] sm:$0xff] %v5496_v30 }
 0x860   : > { %v6502_v25 = vpop.f32.mrb[104].mxu1 }
 0x861   : > { %v5491_v26 = vadd.f32 %v6710_v60, %v6502_v25  ;;  %v5475_v7 = vpop.f32.mrb[105].mxu1 }
 0x862   : > { %v5490_v59 = vadd.f32 %v6708_v62, %v5475_v7 }
 0x863   : > { %v5499_v22 = vmax.f32 %v5491_v26, 0.0 }
 0x864   : > { %v5498_v29 = vmax.f32 %v5490_v59, 0.0 }
 0x865   : > { %5507 = vst [vmem:[%s10755_s11 + $0x38] sm:$0xff] %v5499_v22 }
 0x866   : > { %5506 = vst [vmem:[%s10755_s11 + $0x30] sm:$0xff] %v5498_v29 }
 0x867   : > { %7503 = shalt.err (!%p7500_p9)
}
 0x868   : > { %s7504_s24 = scalar_lea.hbm %s10770_s6, 1024  ;;  %s7508_s8 = scalar_lea.hbm %s10820_s5, 8192 }
 0x869   : > { %p7505_p12 = scmp.ne.s32.totalorder %s10770_s6, %s7504_s24  ;;  %p7509_p10 = scmp.lt.u32.totalorder %s10770_s6, %s10820_s5 }
 0x86a   : > { %p7510_p11 = scmp.lt.u32.totalorder %s7508_s8, %s7504_s24  ;;  %p7512_p2 = scmp.lt.u32.totalorder %s7504_s24, %s10770_s6 }
 0x86b   : > { %p7506_p0 = pnand %p7505_p12, %p7721_p6 }
 0x86c   : > { %p7511_p1 = por %p7510_p11, %p7509_p10 }
 0x86d   : > { %p7507_p5 = pneg %p7506_p0 }
 0x86e   : > { %p7513_p4 = por %p7512_p2, %p7511_p1 }
 0x870   : > { %p7514_p8 = pnand %p7513_p4, %p7507_p5 }
 0x872   : > { %7517 = shalt.err (!%p7514_p8)
}
 0x873   : > { %s7574_s15 = smov 128   ;;  %s7575_s23 = smov 8  }
 0x874   : > { %6785 = dma.vmem_to_hbm [thread:$0]  (%p7721_p6), %s10765_s14, 1024, %s10770_s6, %s5509_s26, %s7574_s15, %s7574_s15, %s7575_s23  }
 0x875 PF: > { %p6807_p13 = scmp.ge.s32.totalorder %s7560_s21, 2  ;;  %s5537_s7 = sand.u32 1, %s7548_s18  }
 0x876   : > { %p11843_p3 = scmp.ne.s32.totalorder %s11000_s25, 0  ;;  %s5538_s10 = scalar_lea.sflag [#allocation4], %s5537_s7 }
 0x878   : > { %p6799_p7 = pnand %p6807_p13, %p11843_p3 }
 0x87a   : > { %7543 = dma.done.wait (!%p6799_p7), %s5538_s10, 1024  }
 0x87b   : > { %7545 = vsyncadd (!%p6799_p7), %s5538_s10, 4294966272  ;;  %p19_p9 = scmp.ge.s32.totalorder %s7708_s16, 10   ;;  %s11844_s18 = smov %s7552_s19 }
 0x87c   : > { %s11845_s19 = smov %s7556_s20  ;;  %s11846_s20 = smov %s7717_s27 }
 0x87d   : > { %s11847_s21 = smov %s7708_s16  ;;  %21 = sbr.rel (!%p19_p9) target bundleno = 6 (0x6), region = 101 }
 0x884   :  { %5543 = vsyncpa [#allocation3], 1 }
 0x885   :  { %5545 = vsyncpa [#allocation3 + $0x1], 1 }
 0x886   :  { %5546 = vsyncpa [#allocation6], 1 }
 0x887   :  { %5547 = vsyncpa [#allocation4], 1 }
 0x888   :  { %5549 = vsyncpa [#allocation4 + $0x1], 1 }

</bundles_post_ra>
